<compile_context>
chip_gen: v5e
topology: v5e:2x2
jax: 0.10.0
libtpu: 0.0.40
codegen_flags: <defaults>
</compile_context>

<pallas_src>
import functools
import numpy as np

import jax
import jax.numpy as jnp
from jax.experimental import pallas as pl
from jax.experimental.pallas import tpu as pltpu

LANE = 128  # TPU lane width


def get_same_padding(kernel_size):
    assert kernel_size % 2 > 0, "kernel size should be odd"
    return kernel_size // 2


def build_kernel_masks(kernel_size_list):
    """Exactly mirrors the mask construction in the PyTorch __init__."""
    K = max(kernel_size_list)
    masks = []
    prev = None
    for ks in kernel_size_list:
        m = np.ones((K, K), np.float32)
        pad = (K - ks) // 2
        inner = np.zeros((K, K), np.float32)
        inner[pad:pad + ks, pad:pad + ks] = 1.0
        m = m * inner
        if prev:
            padp = (K - prev) // 2
            outer = np.ones((K, K), np.float32)
            outer[padp:padp + prev, padp:padp + prev] = 0.0
            m = m * outer
        prev = ks
        masks.append(m)
    return np.stack(masks, axis=0)  # (num_ks, K, K)


def _round_up(x, m):
    return (x + m - 1) // m * m


def _cdiv(a, b):
    return (a + b - 1) // b


def _vmem_capacity_bytes():
    """Per-generation VMEM capacity (v5e/v6e: 128 MiB, v7x: 64 MiB)."""
    try:
        info = pltpu.get_tpu_info()
        cap = getattr(info, "vmem_capacity_bytes", None)
        if cap:
            return int(cap)
    except Exception:
        pass
    return 64 << 20  # conservative fallback (v7x per-TensorCore VMEM)


def _tile_cost_bytes(th, *, s, d, K, wp, w_out, cp, x_bytes, y_bytes):
    """Complete VMEM accounting for one output-H tile of size `th`."""
    th_in = (th - 1) * s + d * (K - 1) + 1
    xbuf = 2 * th_in * wp * cp * x_bytes      # double-buffered halo scratch
    outb = 2 * th * w_out * cp * y_bytes      # auto-pipelined output block (x2)
    acc = 2 * th * w_out * cp * 4             # f32 accumulator + one live temp
    return xbuf + outb + acc


def _pick_h_tile(h_out, *, budget_bytes, s, d, K, wp, w_out, cp,
                 x_bytes, y_bytes):
    """Largest multiple-of-8 output-H tile under the VMEM budget; prefers at
    least two tiles (pipelining + megacore h-split) when h_out allows it."""
    th_max = min(_round_up(h_out, 8), 512)
    if h_out >= 16:
        th_max = min(th_max, _round_up(_cdiv(h_out, 2), 8))
    th = 8
    for cand in range(th_max, 7, -8):
        if _tile_cost_bytes(cand, s=s, d=d, K=K, wp=wp, w_out=w_out, cp=cp,
                            x_bytes=x_bytes, y_bytes=y_bytes) <= budget_bytes:
            th = cand
            break
    return th


def _dw_conv_kernel(x_hbm, w_ref, o_ref, xbuf, sem, *,
                    K, TH, TH_in, W_out, stride, dilation, n_hpc):
    """Masked depthwise conv for one (batch, segment, H-tile) output slab.

    x_hbm: (Nb, Hp, Wp, Cp)   zero-padded input, raw HBM ref (manual DMA)
    w_ref: (K, K, Cp)         pre-masked depthwise filters, f32 (VMEM)
    o_ref: (1, TH, W_out, Cp) output slab (VMEM, auto-pipelined)
    xbuf : (2, TH_in, Wp, Cp) double-buffered haloed input tile (scratch)
    sem  : (2,) DMA semaphores
    """
    n = pl.program_id(0)      # batch element (or 0 when batch is lane-folded)
    c = pl.program_id(1)      # h-segment ("core") axis -- parallel
    i = pl.program_id(2)      # h-tile within the segment -- arbitrary
    slot = i % 2
    tile = c * n_hpc + i      # global output-H tile index

    def start_fetch(glob_tile, buf_slot):
        row0 = glob_tile * (TH * stride)
        pltpu.make_async_copy(
            x_hbm.at[n, pl.ds(row0, TH_in)],
            xbuf.at[buf_slot],
            sem.at[buf_slot],
        ).start()

    # Each (batch, segment) primes its own pipeline -> both leading grid axes
    # can be marked "parallel" (megacore-safe on v7x, even with N == 1).
    @pl.when(i == 0)
    def _():
        start_fetch(tile, slot)

    # Prefetch the next h-tile of this segment into the other slot.
    @pl.when(i + 1 < n_hpc)
    def _():
        start_fetch(tile + 1, 1 - slot)

    # Wait for the current tile's DMA (dummy src of matching shape).
    pltpu.make_async_copy(
        x_hbm.at[n, pl.ds(0, TH_in)], xbuf.at[slot], sem.at[slot]
    ).wait()

    s, d = stride, dilation

    def _ds(start, size):
        # Static starts/sizes; stride only materialized when s > 1.
        return pl.ds(start, size) if s == 1 else pl.ds(start, size, stride=s)

    # Hoist all K*K per-channel weight rows (lane vectors) out of the tap loop.
    w_rows = [[w_ref[kh, kw, :] for kw in range(K)] for kh in range(K)]

    # Fully unrolled K*K tap reduction: taps read straight from the scratch
    # ref (no strip copy / slice temporaries); the first tap initializes the
    # accumulator (no zero-splat + store); accumulation stays f32 throughout.
    acc = None
    for kh in range(K):
        hsl = _ds(kh * d, TH)
        for kw in range(K):
            tap = xbuf[slot, hsl, _ds(kw * d, W_out), :]   # (TH, W_out, Cp)
            term = tap * w_rows[kh][kw]                    # f32 products
            acc = term if acc is None else acc + term

    # Single lane-dense store of the whole output slab.
    o_ref[0] = acc.astype(o_ref.dtype)


class DynamicSinglePathSeparableConv2d:
    KERNEL_TRANSFORM_MODE = 1

    def __init__(self, max_in_channels, kernel_size_list, stride=1, dilation=1,
                 *, key):
        self.max_in_channels = max_in_channels
        self.kernel_size_list = list(kernel_size_list)
        self.stride = stride
        self.dilation = dilation

        K = max(self.kernel_size_list)
        # Depthwise nn.Conv2d(groups=C) weight: (C, 1, K, K).
        fan_in = 1 * K * K
        bound = 1.0 / np.sqrt(fan_in)
        self.weight = jax.random.uniform(
            key, (max_in_channels, 1, K, K), jnp.float32, -bound, bound)

        # Kernel-transform matrices exist in the PyTorch module but are not
        # used in forward(); kept here (identity init) for parameter parity.
        ks_set = sorted(set(self.kernel_size_list))
        self.scale_params = {}
        for i in range(len(ks_set) - 1):
            ks_small, ks_larger = ks_set[i], ks_set[i + 1]
            self.scale_params['%dto%d_matrix' % (ks_larger, ks_small)] = \
                jnp.eye(ks_small ** 2, dtype=jnp.float32)

        self.kernel_masks = jnp.asarray(build_kernel_masks(self.kernel_size_list))
        self.delta_kernel_sizes = jnp.asarray(
            [self.kernel_size_list[0]] +
            [self.kernel_size_list[i] - self.kernel_size_list[i - 1]
             for i in range(1, len(self.kernel_size_list))], dtype=jnp.float32)
        self.active_kernel_size = K

    def __call__(self, x, kernel_cum_indicator):
        # x: NCHW (like PyTorch); kernel_cum_indicator: (B, num_ks) -> row 0 used
        N, C, H, W = x.shape
        K = max(self.kernel_size_list)
        d = self.dilation
        s = self.stride
        pad = get_same_padding(K)

        # Fold the cumulative indicator into a (K, K) mask and pre-multiply it
        # into the depthwise weights (one tiny XLA op).  Weights stay f32 so
        # products/accumulation match the f32 reference conv.
        ind = kernel_cum_indicator[0]                                  # (num_ks,)
        cur_mask = jnp.sum(ind[:, None, None] * self.kernel_masks, axis=0)
        w_kkc = jnp.transpose(self.weight[:, 0, :, :], (1, 2, 0))      # (K, K, C)
        w_kkc = cur_mask[:, :, None] * w_kkc

        # Lane folding: depthwise channels are independent, so for small C the
        # batch axis is folded into the channel/lane dimension -> full vreg
        # utilization instead of padding a handful of channels up to 128 lanes.
        fold_batch = (N * C <= LANE)
        if fold_batch:
            Nb, Ceff = 1, N * C
            x_nhwc = jnp.transpose(x, (2, 3, 0, 1)).reshape(1, H, W, Ceff)
            w_kkc = jnp.tile(w_kkc, (1, 1, N))                         # (K, K, N*C)
        else:
            Nb, Ceff = N, C
            x_nhwc = jnp.transpose(x, (0, 2, 3, 1))

        Cp = _round_up(Ceff, LANE)
        w_in = jnp.pad(w_kkc, ((0, 0), (0, 0), (0, Cp - Ceff)))        # (K, K, Cp)

        Hp = H + 2 * pad
        Wp = W + 2 * pad
        H_out = (Hp - d * (K - 1) - 1) // s + 1
        W_out = (Wp - d * (K - 1) - 1) // s + 1

        # Generation-aware VMEM budgeting (v5e/v6e 128 MiB, v7x 64 MiB).
        x_bytes = x.dtype.itemsize
        vmem_cap = _vmem_capacity_bytes()
        vmem_limit = min(int(vmem_cap * 0.75), 100 << 20)
        tile_budget = int(vmem_limit * 0.55)
        TH = _pick_h_tile(H_out, budget_bytes=tile_budget, s=s, d=d, K=K,
                          wp=Wp, w_out=W_out, cp=Cp,
                          x_bytes=x_bytes, y_bytes=x_bytes)

        # Ragged H: pad H_out to a whole (even) number of tiles so the h range
        # splits into two parallel segments (keeps both v7x TCs busy even when
        # the batch grid axis is 1) and never falls back to a whole-H tile.
        n_h = _cdiv(H_out, TH)
        n_seg = 2 if n_h >= 2 else 1
        n_h = _round_up(n_h, n_seg)
        n_hpc = n_h // n_seg
        H_out_pad = n_h * TH

        TH_in = (TH - 1) * s + d * (K - 1) + 1      # haloed input rows per tile
        Hp_need = (H_out_pad - 1) * s + d * (K - 1) + 1
        extra_h = max(0, Hp_need - Hp)

        # NCHW -> lane-dense layout, zero "same" padding (K//2, like the module
        # -- ignores dilation on purpose to match PyTorch), ragged-tile rows,
        # channel pad to Cp.
        # TODO(synk): fuse this transpose/pad (and the output transpose back to
        # NCHW) into the kernel by zero-filling the halo in-kernel; currently
        # one extra HBM pass over x / y.
        x_p = jnp.pad(x_nhwc, ((0, 0), (pad, pad + extra_h), (pad, pad),
                               (0, Cp - Ceff)))
        # TODO(synk): for stride > 1 a space-to-batch W-phase decomposition in
        # the wrapper would turn the strided W taps into unit-stride reads.

        kernel = functools.partial(
            _dw_conv_kernel, K=K, TH=TH, TH_in=TH_in, W_out=W_out,
            stride=s, dilation=d, n_hpc=n_hpc)

        cost = pl.CostEstimate(
            flops=2 * N * H_out * W_out * C * K * K,
            transcendentals=0,
            bytes_accessed=(x_p.size * x_bytes
                            + Nb * H_out_pad * W_out * Cp * x_bytes
                            + w_in.size * w_in.dtype.itemsize))

        y = pl.pallas_call(
            kernel,
            out_shape=jax.ShapeDtypeStruct((Nb, H_out_pad, W_out, Cp), x.dtype),
            grid=(Nb, n_seg, n_hpc),
            in_specs=[
                pl.BlockSpec(memory_space=pl.ANY),                   # x: raw HBM
                pl.BlockSpec((K, K, Cp), lambda n, c, i: (0, 0, 0)),  # filters
            ],
            out_specs=pl.BlockSpec((1, TH, W_out, Cp),
                                   lambda n, c, i: (n, c * n_hpc + i, 0, 0)),
            scratch_shapes=[
                pltpu.VMEM((2, TH_in, Wp, Cp), x.dtype),   # double-buffered halo
                pltpu.SemaphoreType.DMA((2,)),
            ],
            compiler_params=pltpu.CompilerParams(
                dimension_semantics=("parallel", "parallel", "arbitrary"),
                vmem_limit_bytes=vmem_limit),
            cost_estimate=cost,
        )(x_p, w_in)

        # Crop padding, unfold, back to NCHW.
        y = y[:, :H_out, :, :Ceff]
        if fold_batch:
            y = y.reshape(H_out, W_out, N, C)
            return jnp.transpose(y, (2, 3, 0, 1))
        return jnp.transpose(y, (0, 3, 1, 2))


def _reference_forward(module, x, kernel_cum_indicator):
    """Pure-JAX reference (mirrors F.conv2d with groups=C)."""
    K = max(module.kernel_size_list)
    pad = get_same_padding(K)
    ind = kernel_cum_indicator[0]
    cur_mask = jnp.sum(ind[:, None, None] * module.kernel_masks, axis=0)
    filters = cur_mask[None, None, :, :] * module.weight            # (C,1,K,K)
    return jax.lax.conv_general_dilated(
        x, filters,
        window_strides=(module.stride, module.stride),
        padding=[(pad, pad), (pad, pad)],
        rhs_dilation=(module.dilation, module.dilation),
        feature_group_count=x.shape[1],
        dimension_numbers=('NCHW', 'OIHW', 'NCHW'))


if __name__ == "__main__":
    key = jax.random.PRNGKey(0)
    k_x, k_w = jax.random.split(key)

    max_in_channels = 8
    kernel_size_list = [3, 5, 7]
    N, C, H, W = 2, max_in_channels, 16, 16

    module = DynamicSinglePathSeparableConv2d(
        max_in_channels, kernel_size_list, stride=1, dilation=1, key=k_w)

    x = jax.random.normal(k_x, (N, C, H, W), jnp.float32)
    # Cumulative kernel-size indicator (row 0 is used), e.g. kernel size 5 active:
    kernel_cum_indicator = jnp.array([[1.0, 1.0, 0.0]], dtype=jnp.float32)

    y = module(x, kernel_cum_indicator)
    y = jax.block_until_ready(y)

    y_ref = jax.block_until_ready(
        _reference_forward(module, x, kernel_cum_indicator))
    np.testing.assert_allclose(np.asarray(y), np.asarray(y_ref),
                               rtol=1e-5, atol=1e-5)

    print("KERNEL_OK")
</pallas_src>

<mosaic_0001>
module attributes {stable_mosaic.version = 11 : i64} {
  func.func @_dw_conv_kernel(%arg0: i32, %arg1: i32, %arg2: i32, %arg3: memref<1x22x22x128xf32, #tpu.memory_space<any>>, %arg4: memref<7x7x128xf32, #tpu.memory_space<vmem>>, %arg5: memref<1x8x16x128xf32, #tpu.memory_space<vmem>>, %arg6: memref<2x14x22x128xf32, #tpu.memory_space<vmem>>, %arg7: memref<2x!tpu.dma_semaphore, #tpu.memory_space<semaphore_mem>>) attributes {dimension_semantics = [#tpu.dimension_semantics<parallel>, #tpu.dimension_semantics<parallel>, #tpu.dimension_semantics<arbitrary>], iteration_bounds = array<i64: 1, 2, 1>, scalar_prefetch = 0 : i64, scratch_operands = 2 : i64, tpu.core_type = #tpu.core_type<tc>, window_params = [{}, {pipeline_mode = #tpu.pipeline_mode<synchronous>, transform_indices = @transform_1, window_bounds = array<i64: 7, 7, 128>}, {transform_indices = @transform_2, window_bounds = array<i64: 1, 8, 16, 128>}]} {
    %c2_i32 = arith.constant 2 : i32
    %c0_i32 = arith.constant 0 : i32
    %0 = arith.cmpi eq, %c2_i32, %c0_i32 : i32
    %c1_i32 = arith.constant 1 : i32
    %1 = arith.select %0, %c1_i32, %c2_i32 : i32
    %2 = arith.remsi %arg2, %1 : i32
    %c0_i32_0 = arith.constant 0 : i32
    %3 = arith.cmpi ne, %2, %c0_i32_0 : i32
    %c0_i32_1 = arith.constant 0 : i32
    %4 = arith.cmpi slt, %2, %c0_i32_1 : i32
    %c0_i32_2 = arith.constant 0 : i32
    %5 = arith.cmpi slt, %1, %c0_i32_2 : i32
    %6 = arith.xori %4, %5 : i1
    %7 = arith.andi %6, %3 : i1
    %8 = arith.addi %2, %1 : i32
    %9 = arith.select %7, %8, %2 : i32
    %c1_i32_3 = arith.constant 1 : i32
    %10 = arith.muli %arg1, %c1_i32_3 : i32
    %11 = arith.addi %10, %arg2 : i32
    %c0_i32_4 = arith.constant 0 : i32
    %12 = arith.cmpi eq, %arg2, %c0_i32_4 : i32
    %13 = arith.extui %12 : i1 to i32
    %c0_i32_5 = arith.constant 0 : i32
    %14 = arith.cmpi ne, %13, %c0_i32_5 : i32
    scf.if %14 {
      %c8_i32 = arith.constant 8 : i32
      %468 = arith.muli %11, %c8_i32 : i32
      %c0_i32_306 = arith.constant 0 : i32
      %c0_i32_307 = arith.constant 0 : i32
      %469 = tpu.memref_slice %arg3[%arg0, %468, %c0_i32_306, %c0_i32_307] : memref<1x22x22x128xf32, #tpu.memory_space<any>> -> memref<1x14x22x128xf32, #tpu.memory_space<any>>
      %470 = tpu.memref_squeeze %469 : memref<1x14x22x128xf32, #tpu.memory_space<any>> -> memref<14x22x128xf32, #tpu.memory_space<any>>
      %c0_i32_308 = arith.constant 0 : i32
      %c0_i32_309 = arith.constant 0 : i32
      %c0_i32_310 = arith.constant 0 : i32
      %471 = tpu.memref_slice %arg6[%9, %c0_i32_308, %c0_i32_309, %c0_i32_310] : memref<2x14x22x128xf32, #tpu.memory_space<vmem>> -> memref<1x14x22x128xf32, #tpu.memory_space<vmem>>
      %472 = tpu.memref_squeeze %471 : memref<1x14x22x128xf32, #tpu.memory_space<vmem>> -> memref<14x22x128xf32, #tpu.memory_space<vmem>>
      %473 = tpu.memref_slice %arg7[%9] : memref<2x!tpu.dma_semaphore, #tpu.memory_space<semaphore_mem>> -> memref<1x!tpu.dma_semaphore, #tpu.memory_space<semaphore_mem>>
      %474 = tpu.memref_squeeze %473 : memref<1x!tpu.dma_semaphore, #tpu.memory_space<semaphore_mem>> -> memref<!tpu.dma_semaphore, #tpu.memory_space<semaphore_mem>>
      tpu.enqueue_dma source(%470 : memref<14x22x128xf32, #tpu.memory_space<any>>) target(%472 : memref<14x22x128xf32, #tpu.memory_space<vmem>>) target_semaphore(%474 : memref<!tpu.dma_semaphore, #tpu.memory_space<semaphore_mem>>)
    } else {
    }
    %c1_i32_6 = arith.constant 1 : i32
    %15 = arith.addi %arg2, %c1_i32_6 : i32
    %c1_i32_7 = arith.constant 1 : i32
    %16 = arith.cmpi slt, %15, %c1_i32_7 : i32
    %17 = arith.extui %16 : i1 to i32
    %c0_i32_8 = arith.constant 0 : i32
    %18 = arith.cmpi ne, %17, %c0_i32_8 : i32
    scf.if %18 {
      %c1_i32_306 = arith.constant 1 : i32
      %468 = arith.addi %11, %c1_i32_306 : i32
      %c1_i32_307 = arith.constant 1 : i32
      %469 = arith.subi %c1_i32_307, %9 : i32
      %c8_i32 = arith.constant 8 : i32
      %470 = arith.muli %468, %c8_i32 : i32
      %c0_i32_308 = arith.constant 0 : i32
      %c0_i32_309 = arith.constant 0 : i32
      %471 = tpu.memref_slice %arg3[%arg0, %470, %c0_i32_308, %c0_i32_309] : memref<1x22x22x128xf32, #tpu.memory_space<any>> -> memref<1x14x22x128xf32, #tpu.memory_space<any>>
      %472 = tpu.memref_squeeze %471 : memref<1x14x22x128xf32, #tpu.memory_space<any>> -> memref<14x22x128xf32, #tpu.memory_space<any>>
      %c0_i32_310 = arith.constant 0 : i32
      %c0_i32_311 = arith.constant 0 : i32
      %c0_i32_312 = arith.constant 0 : i32
      %473 = tpu.memref_slice %arg6[%469, %c0_i32_310, %c0_i32_311, %c0_i32_312] : memref<2x14x22x128xf32, #tpu.memory_space<vmem>> -> memref<1x14x22x128xf32, #tpu.memory_space<vmem>>
      %474 = tpu.memref_squeeze %473 : memref<1x14x22x128xf32, #tpu.memory_space<vmem>> -> memref<14x22x128xf32, #tpu.memory_space<vmem>>
      %475 = tpu.memref_slice %arg7[%469] : memref<2x!tpu.dma_semaphore, #tpu.memory_space<semaphore_mem>> -> memref<1x!tpu.dma_semaphore, #tpu.memory_space<semaphore_mem>>
      %476 = tpu.memref_squeeze %475 : memref<1x!tpu.dma_semaphore, #tpu.memory_space<semaphore_mem>> -> memref<!tpu.dma_semaphore, #tpu.memory_space<semaphore_mem>>
      tpu.enqueue_dma source(%472 : memref<14x22x128xf32, #tpu.memory_space<any>>) target(%474 : memref<14x22x128xf32, #tpu.memory_space<vmem>>) target_semaphore(%476 : memref<!tpu.dma_semaphore, #tpu.memory_space<semaphore_mem>>)
    } else {
    }
    %c0_i32_9 = arith.constant 0 : i32
    %c0_i32_10 = arith.constant 0 : i32
    %c0_i32_11 = arith.constant 0 : i32
    %19 = tpu.memref_slice %arg3[%arg0, %c0_i32_9, %c0_i32_10, %c0_i32_11] : memref<1x22x22x128xf32, #tpu.memory_space<any>> -> memref<1x14x22x128xf32, #tpu.memory_space<any>>
    %20 = tpu.memref_squeeze %19 : memref<1x14x22x128xf32, #tpu.memory_space<any>> -> memref<14x22x128xf32, #tpu.memory_space<any>>
    %c0_i32_12 = arith.constant 0 : i32
    %c0_i32_13 = arith.constant 0 : i32
    %c0_i32_14 = arith.constant 0 : i32
    %21 = tpu.memref_slice %arg6[%9, %c0_i32_12, %c0_i32_13, %c0_i32_14] : memref<2x14x22x128xf32, #tpu.memory_space<vmem>> -> memref<1x14x22x128xf32, #tpu.memory_space<vmem>>
    %22 = tpu.memref_squeeze %21 : memref<1x14x22x128xf32, #tpu.memory_space<vmem>> -> memref<14x22x128xf32, #tpu.memory_space<vmem>>
    %23 = tpu.memref_slice %arg7[%9] : memref<2x!tpu.dma_semaphore, #tpu.memory_space<semaphore_mem>> -> memref<1x!tpu.dma_semaphore, #tpu.memory_space<semaphore_mem>>
    %24 = tpu.memref_squeeze %23 : memref<1x!tpu.dma_semaphore, #tpu.memory_space<semaphore_mem>> -> memref<!tpu.dma_semaphore, #tpu.memory_space<semaphore_mem>>
    tpu.wait_dma2 semaphore(%24 : memref<!tpu.dma_semaphore, #tpu.memory_space<semaphore_mem>>) src(%20 : memref<14x22x128xf32, #tpu.memory_space<any>>) dst(%22 : memref<14x22x128xf32, #tpu.memory_space<vmem>>)
    %c0 = arith.constant 0 : index
    %c0_15 = arith.constant 0 : index
    %c0_16 = arith.constant 0 : index
    %25 = vector.load %arg4[%c0, %c0_15, %c0_16] : memref<7x7x128xf32, #tpu.memory_space<vmem>>, vector<1x1x128xf32>
    %26 = vector.shape_cast %25 : vector<1x1x128xf32> to vector<128xf32>
    %c0_17 = arith.constant 0 : index
    %c1 = arith.constant 1 : index
    %c0_18 = arith.constant 0 : index
    %27 = vector.load %arg4[%c0_17, %c1, %c0_18] : memref<7x7x128xf32, #tpu.memory_space<vmem>>, vector<1x1x128xf32>
    %28 = vector.shape_cast %27 : vector<1x1x128xf32> to vector<128xf32>
    %c0_19 = arith.constant 0 : index
    %c2 = arith.constant 2 : index
    %c0_20 = arith.constant 0 : index
    %29 = vector.load %arg4[%c0_19, %c2, %c0_20] : memref<7x7x128xf32, #tpu.memory_space<vmem>>, vector<1x1x128xf32>
    %30 = vector.shape_cast %29 : vector<1x1x128xf32> to vector<128xf32>
    %c0_21 = arith.constant 0 : index
    %c3 = arith.constant 3 : index
    %c0_22 = arith.constant 0 : index
    %31 = vector.load %arg4[%c0_21, %c3, %c0_22] : memref<7x7x128xf32, #tpu.memory_space<vmem>>, vector<1x1x128xf32>
    %32 = vector.shape_cast %31 : vector<1x1x128xf32> to vector<128xf32>
    %c0_23 = arith.constant 0 : index
    %c4 = arith.constant 4 : index
    %c0_24 = arith.constant 0 : index
    %33 = vector.load %arg4[%c0_23, %c4, %c0_24] : memref<7x7x128xf32, #tpu.memory_space<vmem>>, vector<1x1x128xf32>
    %34 = vector.shape_cast %33 : vector<1x1x128xf32> to vector<128xf32>
    %c0_25 = arith.constant 0 : index
    %c5 = arith.constant 5 : index
    %c0_26 = arith.constant 0 : index
    %35 = vector.load %arg4[%c0_25, %c5, %c0_26] : memref<7x7x128xf32, #tpu.memory_space<vmem>>, vector<1x1x128xf32>
    %36 = vector.shape_cast %35 : vector<1x1x128xf32> to vector<128xf32>
    %c0_27 = arith.constant 0 : index
    %c6 = arith.constant 6 : index
    %c0_28 = arith.constant 0 : index
    %37 = vector.load %arg4[%c0_27, %c6, %c0_28] : memref<7x7x128xf32, #tpu.memory_space<vmem>>, vector<1x1x128xf32>
    %38 = vector.shape_cast %37 : vector<1x1x128xf32> to vector<128xf32>
    %c1_29 = arith.constant 1 : index
    %c0_30 = arith.constant 0 : index
    %c0_31 = arith.constant 0 : index
    %39 = vector.load %arg4[%c1_29, %c0_30, %c0_31] : memref<7x7x128xf32, #tpu.memory_space<vmem>>, vector<1x1x128xf32>
    %40 = vector.shape_cast %39 : vector<1x1x128xf32> to vector<128xf32>
    %c1_32 = arith.constant 1 : index
    %c1_33 = arith.constant 1 : index
    %c0_34 = arith.constant 0 : index
    %41 = vector.load %arg4[%c1_32, %c1_33, %c0_34] : memref<7x7x128xf32, #tpu.memory_space<vmem>>, vector<1x1x128xf32>
    %42 = vector.shape_cast %41 : vector<1x1x128xf32> to vector<128xf32>
    %c1_35 = arith.constant 1 : index
    %c2_36 = arith.constant 2 : index
    %c0_37 = arith.constant 0 : index
    %43 = vector.load %arg4[%c1_35, %c2_36, %c0_37] : memref<7x7x128xf32, #tpu.memory_space<vmem>>, vector<1x1x128xf32>
    %44 = vector.shape_cast %43 : vector<1x1x128xf32> to vector<128xf32>
    %c1_38 = arith.constant 1 : index
    %c3_39 = arith.constant 3 : index
    %c0_40 = arith.constant 0 : index
    %45 = vector.load %arg4[%c1_38, %c3_39, %c0_40] : memref<7x7x128xf32, #tpu.memory_space<vmem>>, vector<1x1x128xf32>
    %46 = vector.shape_cast %45 : vector<1x1x128xf32> to vector<128xf32>
    %c1_41 = arith.constant 1 : index
    %c4_42 = arith.constant 4 : index
    %c0_43 = arith.constant 0 : index
    %47 = vector.load %arg4[%c1_41, %c4_42, %c0_43] : memref<7x7x128xf32, #tpu.memory_space<vmem>>, vector<1x1x128xf32>
    %48 = vector.shape_cast %47 : vector<1x1x128xf32> to vector<128xf32>
    %c1_44 = arith.constant 1 : index
    %c5_45 = arith.constant 5 : index
    %c0_46 = arith.constant 0 : index
    %49 = vector.load %arg4[%c1_44, %c5_45, %c0_46] : memref<7x7x128xf32, #tpu.memory_space<vmem>>, vector<1x1x128xf32>
    %50 = vector.shape_cast %49 : vector<1x1x128xf32> to vector<128xf32>
    %c1_47 = arith.constant 1 : index
    %c6_48 = arith.constant 6 : index
    %c0_49 = arith.constant 0 : index
    %51 = vector.load %arg4[%c1_47, %c6_48, %c0_49] : memref<7x7x128xf32, #tpu.memory_space<vmem>>, vector<1x1x128xf32>
    %52 = vector.shape_cast %51 : vector<1x1x128xf32> to vector<128xf32>
    %c2_50 = arith.constant 2 : index
    %c0_51 = arith.constant 0 : index
    %c0_52 = arith.constant 0 : index
    %53 = vector.load %arg4[%c2_50, %c0_51, %c0_52] : memref<7x7x128xf32, #tpu.memory_space<vmem>>, vector<1x1x128xf32>
    %54 = vector.shape_cast %53 : vector<1x1x128xf32> to vector<128xf32>
    %c2_53 = arith.constant 2 : index
    %c1_54 = arith.constant 1 : index
    %c0_55 = arith.constant 0 : index
    %55 = vector.load %arg4[%c2_53, %c1_54, %c0_55] : memref<7x7x128xf32, #tpu.memory_space<vmem>>, vector<1x1x128xf32>
    %56 = vector.shape_cast %55 : vector<1x1x128xf32> to vector<128xf32>
    %c2_56 = arith.constant 2 : index
    %c2_57 = arith.constant 2 : index
    %c0_58 = arith.constant 0 : index
    %57 = vector.load %arg4[%c2_56, %c2_57, %c0_58] : memref<7x7x128xf32, #tpu.memory_space<vmem>>, vector<1x1x128xf32>
    %58 = vector.shape_cast %57 : vector<1x1x128xf32> to vector<128xf32>
    %c2_59 = arith.constant 2 : index
    %c3_60 = arith.constant 3 : index
    %c0_61 = arith.constant 0 : index
    %59 = vector.load %arg4[%c2_59, %c3_60, %c0_61] : memref<7x7x128xf32, #tpu.memory_space<vmem>>, vector<1x1x128xf32>
    %60 = vector.shape_cast %59 : vector<1x1x128xf32> to vector<128xf32>
    %c2_62 = arith.constant 2 : index
    %c4_63 = arith.constant 4 : index
    %c0_64 = arith.constant 0 : index
    %61 = vector.load %arg4[%c2_62, %c4_63, %c0_64] : memref<7x7x128xf32, #tpu.memory_space<vmem>>, vector<1x1x128xf32>
    %62 = vector.shape_cast %61 : vector<1x1x128xf32> to vector<128xf32>
    %c2_65 = arith.constant 2 : index
    %c5_66 = arith.constant 5 : index
    %c0_67 = arith.constant 0 : index
    %63 = vector.load %arg4[%c2_65, %c5_66, %c0_67] : memref<7x7x128xf32, #tpu.memory_space<vmem>>, vector<1x1x128xf32>
    %64 = vector.shape_cast %63 : vector<1x1x128xf32> to vector<128xf32>
    %c2_68 = arith.constant 2 : index
    %c6_69 = arith.constant 6 : index
    %c0_70 = arith.constant 0 : index
    %65 = vector.load %arg4[%c2_68, %c6_69, %c0_70] : memref<7x7x128xf32, #tpu.memory_space<vmem>>, vector<1x1x128xf32>
    %66 = vector.shape_cast %65 : vector<1x1x128xf32> to vector<128xf32>
    %c3_71 = arith.constant 3 : index
    %c0_72 = arith.constant 0 : index
    %c0_73 = arith.constant 0 : index
    %67 = vector.load %arg4[%c3_71, %c0_72, %c0_73] : memref<7x7x128xf32, #tpu.memory_space<vmem>>, vector<1x1x128xf32>
    %68 = vector.shape_cast %67 : vector<1x1x128xf32> to vector<128xf32>
    %c3_74 = arith.constant 3 : index
    %c1_75 = arith.constant 1 : index
    %c0_76 = arith.constant 0 : index
    %69 = vector.load %arg4[%c3_74, %c1_75, %c0_76] : memref<7x7x128xf32, #tpu.memory_space<vmem>>, vector<1x1x128xf32>
    %70 = vector.shape_cast %69 : vector<1x1x128xf32> to vector<128xf32>
    %c3_77 = arith.constant 3 : index
    %c2_78 = arith.constant 2 : index
    %c0_79 = arith.constant 0 : index
    %71 = vector.load %arg4[%c3_77, %c2_78, %c0_79] : memref<7x7x128xf32, #tpu.memory_space<vmem>>, vector<1x1x128xf32>
    %72 = vector.shape_cast %71 : vector<1x1x128xf32> to vector<128xf32>
    %c3_80 = arith.constant 3 : index
    %c3_81 = arith.constant 3 : index
    %c0_82 = arith.constant 0 : index
    %73 = vector.load %arg4[%c3_80, %c3_81, %c0_82] : memref<7x7x128xf32, #tpu.memory_space<vmem>>, vector<1x1x128xf32>
    %74 = vector.shape_cast %73 : vector<1x1x128xf32> to vector<128xf32>
    %c3_83 = arith.constant 3 : index
    %c4_84 = arith.constant 4 : index
    %c0_85 = arith.constant 0 : index
    %75 = vector.load %arg4[%c3_83, %c4_84, %c0_85] : memref<7x7x128xf32, #tpu.memory_space<vmem>>, vector<1x1x128xf32>
    %76 = vector.shape_cast %75 : vector<1x1x128xf32> to vector<128xf32>
    %c3_86 = arith.constant 3 : index
    %c5_87 = arith.constant 5 : index
    %c0_88 = arith.constant 0 : index
    %77 = vector.load %arg4[%c3_86, %c5_87, %c0_88] : memref<7x7x128xf32, #tpu.memory_space<vmem>>, vector<1x1x128xf32>
    %78 = vector.shape_cast %77 : vector<1x1x128xf32> to vector<128xf32>
    %c3_89 = arith.constant 3 : index
    %c6_90 = arith.constant 6 : index
    %c0_91 = arith.constant 0 : index
    %79 = vector.load %arg4[%c3_89, %c6_90, %c0_91] : memref<7x7x128xf32, #tpu.memory_space<vmem>>, vector<1x1x128xf32>
    %80 = vector.shape_cast %79 : vector<1x1x128xf32> to vector<128xf32>
    %c4_92 = arith.constant 4 : index
    %c0_93 = arith.constant 0 : index
    %c0_94 = arith.constant 0 : index
    %81 = vector.load %arg4[%c4_92, %c0_93, %c0_94] : memref<7x7x128xf32, #tpu.memory_space<vmem>>, vector<1x1x128xf32>
    %82 = vector.shape_cast %81 : vector<1x1x128xf32> to vector<128xf32>
    %c4_95 = arith.constant 4 : index
    %c1_96 = arith.constant 1 : index
    %c0_97 = arith.constant 0 : index
    %83 = vector.load %arg4[%c4_95, %c1_96, %c0_97] : memref<7x7x128xf32, #tpu.memory_space<vmem>>, vector<1x1x128xf32>
    %84 = vector.shape_cast %83 : vector<1x1x128xf32> to vector<128xf32>
    %c4_98 = arith.constant 4 : index
    %c2_99 = arith.constant 2 : index
    %c0_100 = arith.constant 0 : index
    %85 = vector.load %arg4[%c4_98, %c2_99, %c0_100] : memref<7x7x128xf32, #tpu.memory_space<vmem>>, vector<1x1x128xf32>
    %86 = vector.shape_cast %85 : vector<1x1x128xf32> to vector<128xf32>
    %c4_101 = arith.constant 4 : index
    %c3_102 = arith.constant 3 : index
    %c0_103 = arith.constant 0 : index
    %87 = vector.load %arg4[%c4_101, %c3_102, %c0_103] : memref<7x7x128xf32, #tpu.memory_space<vmem>>, vector<1x1x128xf32>
    %88 = vector.shape_cast %87 : vector<1x1x128xf32> to vector<128xf32>
    %c4_104 = arith.constant 4 : index
    %c4_105 = arith.constant 4 : index
    %c0_106 = arith.constant 0 : index
    %89 = vector.load %arg4[%c4_104, %c4_105, %c0_106] : memref<7x7x128xf32, #tpu.memory_space<vmem>>, vector<1x1x128xf32>
    %90 = vector.shape_cast %89 : vector<1x1x128xf32> to vector<128xf32>
    %c4_107 = arith.constant 4 : index
    %c5_108 = arith.constant 5 : index
    %c0_109 = arith.constant 0 : index
    %91 = vector.load %arg4[%c4_107, %c5_108, %c0_109] : memref<7x7x128xf32, #tpu.memory_space<vmem>>, vector<1x1x128xf32>
    %92 = vector.shape_cast %91 : vector<1x1x128xf32> to vector<128xf32>
    %c4_110 = arith.constant 4 : index
    %c6_111 = arith.constant 6 : index
    %c0_112 = arith.constant 0 : index
    %93 = vector.load %arg4[%c4_110, %c6_111, %c0_112] : memref<7x7x128xf32, #tpu.memory_space<vmem>>, vector<1x1x128xf32>
    %94 = vector.shape_cast %93 : vector<1x1x128xf32> to vector<128xf32>
    %c5_113 = arith.constant 5 : index
    %c0_114 = arith.constant 0 : index
    %c0_115 = arith.constant 0 : index
    %95 = vector.load %arg4[%c5_113, %c0_114, %c0_115] : memref<7x7x128xf32, #tpu.memory_space<vmem>>, vector<1x1x128xf32>
    %96 = vector.shape_cast %95 : vector<1x1x128xf32> to vector<128xf32>
    %c5_116 = arith.constant 5 : index
    %c1_117 = arith.constant 1 : index
    %c0_118 = arith.constant 0 : index
    %97 = vector.load %arg4[%c5_116, %c1_117, %c0_118] : memref<7x7x128xf32, #tpu.memory_space<vmem>>, vector<1x1x128xf32>
    %98 = vector.shape_cast %97 : vector<1x1x128xf32> to vector<128xf32>
    %c5_119 = arith.constant 5 : index
    %c2_120 = arith.constant 2 : index
    %c0_121 = arith.constant 0 : index
    %99 = vector.load %arg4[%c5_119, %c2_120, %c0_121] : memref<7x7x128xf32, #tpu.memory_space<vmem>>, vector<1x1x128xf32>
    %100 = vector.shape_cast %99 : vector<1x1x128xf32> to vector<128xf32>
    %c5_122 = arith.constant 5 : index
    %c3_123 = arith.constant 3 : index
    %c0_124 = arith.constant 0 : index
    %101 = vector.load %arg4[%c5_122, %c3_123, %c0_124] : memref<7x7x128xf32, #tpu.memory_space<vmem>>, vector<1x1x128xf32>
    %102 = vector.shape_cast %101 : vector<1x1x128xf32> to vector<128xf32>
    %c5_125 = arith.constant 5 : index
    %c4_126 = arith.constant 4 : index
    %c0_127 = arith.constant 0 : index
    %103 = vector.load %arg4[%c5_125, %c4_126, %c0_127] : memref<7x7x128xf32, #tpu.memory_space<vmem>>, vector<1x1x128xf32>
    %104 = vector.shape_cast %103 : vector<1x1x128xf32> to vector<128xf32>
    %c5_128 = arith.constant 5 : index
    %c5_129 = arith.constant 5 : index
    %c0_130 = arith.constant 0 : index
    %105 = vector.load %arg4[%c5_128, %c5_129, %c0_130] : memref<7x7x128xf32, #tpu.memory_space<vmem>>, vector<1x1x128xf32>
    %106 = vector.shape_cast %105 : vector<1x1x128xf32> to vector<128xf32>
    %c5_131 = arith.constant 5 : index
    %c6_132 = arith.constant 6 : index
    %c0_133 = arith.constant 0 : index
    %107 = vector.load %arg4[%c5_131, %c6_132, %c0_133] : memref<7x7x128xf32, #tpu.memory_space<vmem>>, vector<1x1x128xf32>
    %108 = vector.shape_cast %107 : vector<1x1x128xf32> to vector<128xf32>
    %c6_134 = arith.constant 6 : index
    %c0_135 = arith.constant 0 : index
    %c0_136 = arith.constant 0 : index
    %109 = vector.load %arg4[%c6_134, %c0_135, %c0_136] : memref<7x7x128xf32, #tpu.memory_space<vmem>>, vector<1x1x128xf32>
    %110 = vector.shape_cast %109 : vector<1x1x128xf32> to vector<128xf32>
    %c6_137 = arith.constant 6 : index
    %c1_138 = arith.constant 1 : index
    %c0_139 = arith.constant 0 : index
    %111 = vector.load %arg4[%c6_137, %c1_138, %c0_139] : memref<7x7x128xf32, #tpu.memory_space<vmem>>, vector<1x1x128xf32>
    %112 = vector.shape_cast %111 : vector<1x1x128xf32> to vector<128xf32>
    %c6_140 = arith.constant 6 : index
    %c2_141 = arith.constant 2 : index
    %c0_142 = arith.constant 0 : index
    %113 = vector.load %arg4[%c6_140, %c2_141, %c0_142] : memref<7x7x128xf32, #tpu.memory_space<vmem>>, vector<1x1x128xf32>
    %114 = vector.shape_cast %113 : vector<1x1x128xf32> to vector<128xf32>
    %c6_143 = arith.constant 6 : index
    %c3_144 = arith.constant 3 : index
    %c0_145 = arith.constant 0 : index
    %115 = vector.load %arg4[%c6_143, %c3_144, %c0_145] : memref<7x7x128xf32, #tpu.memory_space<vmem>>, vector<1x1x128xf32>
    %116 = vector.shape_cast %115 : vector<1x1x128xf32> to vector<128xf32>
    %c6_146 = arith.constant 6 : index
    %c4_147 = arith.constant 4 : index
    %c0_148 = arith.constant 0 : index
    %117 = vector.load %arg4[%c6_146, %c4_147, %c0_148] : memref<7x7x128xf32, #tpu.memory_space<vmem>>, vector<1x1x128xf32>
    %118 = vector.shape_cast %117 : vector<1x1x128xf32> to vector<128xf32>
    %c6_149 = arith.constant 6 : index
    %c5_150 = arith.constant 5 : index
    %c0_151 = arith.constant 0 : index
    %119 = vector.load %arg4[%c6_149, %c5_150, %c0_151] : memref<7x7x128xf32, #tpu.memory_space<vmem>>, vector<1x1x128xf32>
    %120 = vector.shape_cast %119 : vector<1x1x128xf32> to vector<128xf32>
    %c6_152 = arith.constant 6 : index
    %c6_153 = arith.constant 6 : index
    %c0_154 = arith.constant 0 : index
    %121 = vector.load %arg4[%c6_152, %c6_153, %c0_154] : memref<7x7x128xf32, #tpu.memory_space<vmem>>, vector<1x1x128xf32>
    %122 = vector.shape_cast %121 : vector<1x1x128xf32> to vector<128xf32>
    %123 = arith.index_cast %9 : i32 to index
    %c0_155 = arith.constant 0 : index
    %c0_156 = arith.constant 0 : index
    %c0_157 = arith.constant 0 : index
    %124 = vector.load %arg6[%123, %c0_155, %c0_156, %c0_157] : memref<2x14x22x128xf32, #tpu.memory_space<vmem>>, vector<1x8x16x128xf32>
    %125 = vector.shape_cast %124 : vector<1x8x16x128xf32> to vector<8x16x128xf32>
    %126 = vector.shape_cast %26 : vector<128xf32> to vector<1x1x128xf32>
    %127 = vector.broadcast %126 : vector<1x1x128xf32> to vector<8x16x128xf32>
    %128 = arith.mulf %125, %127 : vector<8x16x128xf32>
    %129 = arith.index_cast %9 : i32 to index
    %c0_158 = arith.constant 0 : index
    %c1_159 = arith.constant 1 : index
    %c0_160 = arith.constant 0 : index
    %130 = vector.load %arg6[%129, %c0_158, %c1_159, %c0_160] : memref<2x14x22x128xf32, #tpu.memory_space<vmem>>, vector<1x8x16x128xf32>
    %131 = vector.shape_cast %130 : vector<1x8x16x128xf32> to vector<8x16x128xf32>
    %132 = vector.shape_cast %28 : vector<128xf32> to vector<1x1x128xf32>
    %133 = vector.broadcast %132 : vector<1x1x128xf32> to vector<8x16x128xf32>
    %134 = arith.mulf %131, %133 : vector<8x16x128xf32>
    %135 = arith.addf %128, %134 : vector<8x16x128xf32>
    %136 = arith.index_cast %9 : i32 to index
    %c0_161 = arith.constant 0 : index
    %c2_162 = arith.constant 2 : index
    %c0_163 = arith.constant 0 : index
    %137 = vector.load %arg6[%136, %c0_161, %c2_162, %c0_163] : memref<2x14x22x128xf32, #tpu.memory_space<vmem>>, vector<1x8x16x128xf32>
    %138 = vector.shape_cast %137 : vector<1x8x16x128xf32> to vector<8x16x128xf32>
    %139 = vector.shape_cast %30 : vector<128xf32> to vector<1x1x128xf32>
    %140 = vector.broadcast %139 : vector<1x1x128xf32> to vector<8x16x128xf32>
    %141 = arith.mulf %138, %140 : vector<8x16x128xf32>
    %142 = arith.addf %135, %141 : vector<8x16x128xf32>
    %143 = arith.index_cast %9 : i32 to index
    %c0_164 = arith.constant 0 : index
    %c3_165 = arith.constant 3 : index
    %c0_166 = arith.constant 0 : index
    %144 = vector.load %arg6[%143, %c0_164, %c3_165, %c0_166] : memref<2x14x22x128xf32, #tpu.memory_space<vmem>>, vector<1x8x16x128xf32>
    %145 = vector.shape_cast %144 : vector<1x8x16x128xf32> to vector<8x16x128xf32>
    %146 = vector.shape_cast %32 : vector<128xf32> to vector<1x1x128xf32>
    %147 = vector.broadcast %146 : vector<1x1x128xf32> to vector<8x16x128xf32>
    %148 = arith.mulf %145, %147 : vector<8x16x128xf32>
    %149 = arith.addf %142, %148 : vector<8x16x128xf32>
    %150 = arith.index_cast %9 : i32 to index
    %c0_167 = arith.constant 0 : index
    %c4_168 = arith.constant 4 : index
    %c0_169 = arith.constant 0 : index
    %151 = vector.load %arg6[%150, %c0_167, %c4_168, %c0_169] : memref<2x14x22x128xf32, #tpu.memory_space<vmem>>, vector<1x8x16x128xf32>
    %152 = vector.shape_cast %151 : vector<1x8x16x128xf32> to vector<8x16x128xf32>
    %153 = vector.shape_cast %34 : vector<128xf32> to vector<1x1x128xf32>
    %154 = vector.broadcast %153 : vector<1x1x128xf32> to vector<8x16x128xf32>
    %155 = arith.mulf %152, %154 : vector<8x16x128xf32>
    %156 = arith.addf %149, %155 : vector<8x16x128xf32>
    %157 = arith.index_cast %9 : i32 to index
    %c0_170 = arith.constant 0 : index
    %c5_171 = arith.constant 5 : index
    %c0_172 = arith.constant 0 : index
    %158 = vector.load %arg6[%157, %c0_170, %c5_171, %c0_172] : memref<2x14x22x128xf32, #tpu.memory_space<vmem>>, vector<1x8x16x128xf32>
    %159 = vector.shape_cast %158 : vector<1x8x16x128xf32> to vector<8x16x128xf32>
    %160 = vector.shape_cast %36 : vector<128xf32> to vector<1x1x128xf32>
    %161 = vector.broadcast %160 : vector<1x1x128xf32> to vector<8x16x128xf32>
    %162 = arith.mulf %159, %161 : vector<8x16x128xf32>
    %163 = arith.addf %156, %162 : vector<8x16x128xf32>
    %164 = arith.index_cast %9 : i32 to index
    %c0_173 = arith.constant 0 : index
    %c6_174 = arith.constant 6 : index
    %c0_175 = arith.constant 0 : index
    %165 = vector.load %arg6[%164, %c0_173, %c6_174, %c0_175] : memref<2x14x22x128xf32, #tpu.memory_space<vmem>>, vector<1x8x16x128xf32>
    %166 = vector.shape_cast %165 : vector<1x8x16x128xf32> to vector<8x16x128xf32>
    %167 = vector.shape_cast %38 : vector<128xf32> to vector<1x1x128xf32>
    %168 = vector.broadcast %167 : vector<1x1x128xf32> to vector<8x16x128xf32>
    %169 = arith.mulf %166, %168 : vector<8x16x128xf32>
    %170 = arith.addf %163, %169 : vector<8x16x128xf32>
    %171 = arith.index_cast %9 : i32 to index
    %c1_176 = arith.constant 1 : index
    %c0_177 = arith.constant 0 : index
    %c0_178 = arith.constant 0 : index
    %172 = vector.load %arg6[%171, %c1_176, %c0_177, %c0_178] : memref<2x14x22x128xf32, #tpu.memory_space<vmem>>, vector<1x8x16x128xf32>
    %173 = vector.shape_cast %172 : vector<1x8x16x128xf32> to vector<8x16x128xf32>
    %174 = vector.shape_cast %40 : vector<128xf32> to vector<1x1x128xf32>
    %175 = vector.broadcast %174 : vector<1x1x128xf32> to vector<8x16x128xf32>
    %176 = arith.mulf %173, %175 : vector<8x16x128xf32>
    %177 = arith.addf %170, %176 : vector<8x16x128xf32>
    %178 = arith.index_cast %9 : i32 to index
    %c1_179 = arith.constant 1 : index
    %c1_180 = arith.constant 1 : index
    %c0_181 = arith.constant 0 : index
    %179 = vector.load %arg6[%178, %c1_179, %c1_180, %c0_181] : memref<2x14x22x128xf32, #tpu.memory_space<vmem>>, vector<1x8x16x128xf32>
    %180 = vector.shape_cast %179 : vector<1x8x16x128xf32> to vector<8x16x128xf32>
    %181 = vector.shape_cast %42 : vector<128xf32> to vector<1x1x128xf32>
    %182 = vector.broadcast %181 : vector<1x1x128xf32> to vector<8x16x128xf32>
    %183 = arith.mulf %180, %182 : vector<8x16x128xf32>
    %184 = arith.addf %177, %183 : vector<8x16x128xf32>
    %185 = arith.index_cast %9 : i32 to index
    %c1_182 = arith.constant 1 : index
    %c2_183 = arith.constant 2 : index
    %c0_184 = arith.constant 0 : index
    %186 = vector.load %arg6[%185, %c1_182, %c2_183, %c0_184] : memref<2x14x22x128xf32, #tpu.memory_space<vmem>>, vector<1x8x16x128xf32>
    %187 = vector.shape_cast %186 : vector<1x8x16x128xf32> to vector<8x16x128xf32>
    %188 = vector.shape_cast %44 : vector<128xf32> to vector<1x1x128xf32>
    %189 = vector.broadcast %188 : vector<1x1x128xf32> to vector<8x16x128xf32>
    %190 = arith.mulf %187, %189 : vector<8x16x128xf32>
    %191 = arith.addf %184, %190 : vector<8x16x128xf32>
    %192 = arith.index_cast %9 : i32 to index
    %c1_185 = arith.constant 1 : index
    %c3_186 = arith.constant 3 : index
    %c0_187 = arith.constant 0 : index
    %193 = vector.load %arg6[%192, %c1_185, %c3_186, %c0_187] : memref<2x14x22x128xf32, #tpu.memory_space<vmem>>, vector<1x8x16x128xf32>
    %194 = vector.shape_cast %193 : vector<1x8x16x128xf32> to vector<8x16x128xf32>
    %195 = vector.shape_cast %46 : vector<128xf32> to vector<1x1x128xf32>
    %196 = vector.broadcast %195 : vector<1x1x128xf32> to vector<8x16x128xf32>
    %197 = arith.mulf %194, %196 : vector<8x16x128xf32>
    %198 = arith.addf %191, %197 : vector<8x16x128xf32>
    %199 = arith.index_cast %9 : i32 to index
    %c1_188 = arith.constant 1 : index
    %c4_189 = arith.constant 4 : index
    %c0_190 = arith.constant 0 : index
    %200 = vector.load %arg6[%199, %c1_188, %c4_189, %c0_190] : memref<2x14x22x128xf32, #tpu.memory_space<vmem>>, vector<1x8x16x128xf32>
    %201 = vector.shape_cast %200 : vector<1x8x16x128xf32> to vector<8x16x128xf32>
    %202 = vector.shape_cast %48 : vector<128xf32> to vector<1x1x128xf32>
    %203 = vector.broadcast %202 : vector<1x1x128xf32> to vector<8x16x128xf32>
    %204 = arith.mulf %201, %203 : vector<8x16x128xf32>
    %205 = arith.addf %198, %204 : vector<8x16x128xf32>
    %206 = arith.index_cast %9 : i32 to index
    %c1_191 = arith.constant 1 : index
    %c5_192 = arith.constant 5 : index
    %c0_193 = arith.constant 0 : index
    %207 = vector.load %arg6[%206, %c1_191, %c5_192, %c0_193] : memref<2x14x22x128xf32, #tpu.memory_space<vmem>>, vector<1x8x16x128xf32>
    %208 = vector.shape_cast %207 : vector<1x8x16x128xf32> to vector<8x16x128xf32>
    %209 = vector.shape_cast %50 : vector<128xf32> to vector<1x1x128xf32>
    %210 = vector.broadcast %209 : vector<1x1x128xf32> to vector<8x16x128xf32>
    %211 = arith.mulf %208, %210 : vector<8x16x128xf32>
    %212 = arith.addf %205, %211 : vector<8x16x128xf32>
    %213 = arith.index_cast %9 : i32 to index
    %c1_194 = arith.constant 1 : index
    %c6_195 = arith.constant 6 : index
    %c0_196 = arith.constant 0 : index
    %214 = vector.load %arg6[%213, %c1_194, %c6_195, %c0_196] : memref<2x14x22x128xf32, #tpu.memory_space<vmem>>, vector<1x8x16x128xf32>
    %215 = vector.shape_cast %214 : vector<1x8x16x128xf32> to vector<8x16x128xf32>
    %216 = vector.shape_cast %52 : vector<128xf32> to vector<1x1x128xf32>
    %217 = vector.broadcast %216 : vector<1x1x128xf32> to vector<8x16x128xf32>
    %218 = arith.mulf %215, %217 : vector<8x16x128xf32>
    %219 = arith.addf %212, %218 : vector<8x16x128xf32>
    %220 = arith.index_cast %9 : i32 to index
    %c2_197 = arith.constant 2 : index
    %c0_198 = arith.constant 0 : index
    %c0_199 = arith.constant 0 : index
    %221 = vector.load %arg6[%220, %c2_197, %c0_198, %c0_199] : memref<2x14x22x128xf32, #tpu.memory_space<vmem>>, vector<1x8x16x128xf32>
    %222 = vector.shape_cast %221 : vector<1x8x16x128xf32> to vector<8x16x128xf32>
    %223 = vector.shape_cast %54 : vector<128xf32> to vector<1x1x128xf32>
    %224 = vector.broadcast %223 : vector<1x1x128xf32> to vector<8x16x128xf32>
    %225 = arith.mulf %222, %224 : vector<8x16x128xf32>
    %226 = arith.addf %219, %225 : vector<8x16x128xf32>
    %227 = arith.index_cast %9 : i32 to index
    %c2_200 = arith.constant 2 : index
    %c1_201 = arith.constant 1 : index
    %c0_202 = arith.constant 0 : index
    %228 = vector.load %arg6[%227, %c2_200, %c1_201, %c0_202] : memref<2x14x22x128xf32, #tpu.memory_space<vmem>>, vector<1x8x16x128xf32>
    %229 = vector.shape_cast %228 : vector<1x8x16x128xf32> to vector<8x16x128xf32>
    %230 = vector.shape_cast %56 : vector<128xf32> to vector<1x1x128xf32>
    %231 = vector.broadcast %230 : vector<1x1x128xf32> to vector<8x16x128xf32>
    %232 = arith.mulf %229, %231 : vector<8x16x128xf32>
    %233 = arith.addf %226, %232 : vector<8x16x128xf32>
    %234 = arith.index_cast %9 : i32 to index
    %c2_203 = arith.constant 2 : index
    %c2_204 = arith.constant 2 : index
    %c0_205 = arith.constant 0 : index
    %235 = vector.load %arg6[%234, %c2_203, %c2_204, %c0_205] : memref<2x14x22x128xf32, #tpu.memory_space<vmem>>, vector<1x8x16x128xf32>
    %236 = vector.shape_cast %235 : vector<1x8x16x128xf32> to vector<8x16x128xf32>
    %237 = vector.shape_cast %58 : vector<128xf32> to vector<1x1x128xf32>
    %238 = vector.broadcast %237 : vector<1x1x128xf32> to vector<8x16x128xf32>
    %239 = arith.mulf %236, %238 : vector<8x16x128xf32>
    %240 = arith.addf %233, %239 : vector<8x16x128xf32>
    %241 = arith.index_cast %9 : i32 to index
    %c2_206 = arith.constant 2 : index
    %c3_207 = arith.constant 3 : index
    %c0_208 = arith.constant 0 : index
    %242 = vector.load %arg6[%241, %c2_206, %c3_207, %c0_208] : memref<2x14x22x128xf32, #tpu.memory_space<vmem>>, vector<1x8x16x128xf32>
    %243 = vector.shape_cast %242 : vector<1x8x16x128xf32> to vector<8x16x128xf32>
    %244 = vector.shape_cast %60 : vector<128xf32> to vector<1x1x128xf32>
    %245 = vector.broadcast %244 : vector<1x1x128xf32> to vector<8x16x128xf32>
    %246 = arith.mulf %243, %245 : vector<8x16x128xf32>
    %247 = arith.addf %240, %246 : vector<8x16x128xf32>
    %248 = arith.index_cast %9 : i32 to index
    %c2_209 = arith.constant 2 : index
    %c4_210 = arith.constant 4 : index
    %c0_211 = arith.constant 0 : index
    %249 = vector.load %arg6[%248, %c2_209, %c4_210, %c0_211] : memref<2x14x22x128xf32, #tpu.memory_space<vmem>>, vector<1x8x16x128xf32>
    %250 = vector.shape_cast %249 : vector<1x8x16x128xf32> to vector<8x16x128xf32>
    %251 = vector.shape_cast %62 : vector<128xf32> to vector<1x1x128xf32>
    %252 = vector.broadcast %251 : vector<1x1x128xf32> to vector<8x16x128xf32>
    %253 = arith.mulf %250, %252 : vector<8x16x128xf32>
    %254 = arith.addf %247, %253 : vector<8x16x128xf32>
    %255 = arith.index_cast %9 : i32 to index
    %c2_212 = arith.constant 2 : index
    %c5_213 = arith.constant 5 : index
    %c0_214 = arith.constant 0 : index
    %256 = vector.load %arg6[%255, %c2_212, %c5_213, %c0_214] : memref<2x14x22x128xf32, #tpu.memory_space<vmem>>, vector<1x8x16x128xf32>
    %257 = vector.shape_cast %256 : vector<1x8x16x128xf32> to vector<8x16x128xf32>
    %258 = vector.shape_cast %64 : vector<128xf32> to vector<1x1x128xf32>
    %259 = vector.broadcast %258 : vector<1x1x128xf32> to vector<8x16x128xf32>
    %260 = arith.mulf %257, %259 : vector<8x16x128xf32>
    %261 = arith.addf %254, %260 : vector<8x16x128xf32>
    %262 = arith.index_cast %9 : i32 to index
    %c2_215 = arith.constant 2 : index
    %c6_216 = arith.constant 6 : index
    %c0_217 = arith.constant 0 : index
    %263 = vector.load %arg6[%262, %c2_215, %c6_216, %c0_217] : memref<2x14x22x128xf32, #tpu.memory_space<vmem>>, vector<1x8x16x128xf32>
    %264 = vector.shape_cast %263 : vector<1x8x16x128xf32> to vector<8x16x128xf32>
    %265 = vector.shape_cast %66 : vector<128xf32> to vector<1x1x128xf32>
    %266 = vector.broadcast %265 : vector<1x1x128xf32> to vector<8x16x128xf32>
    %267 = arith.mulf %264, %266 : vector<8x16x128xf32>
    %268 = arith.addf %261, %267 : vector<8x16x128xf32>
    %269 = arith.index_cast %9 : i32 to index
    %c3_218 = arith.constant 3 : index
    %c0_219 = arith.constant 0 : index
    %c0_220 = arith.constant 0 : index
    %270 = vector.load %arg6[%269, %c3_218, %c0_219, %c0_220] : memref<2x14x22x128xf32, #tpu.memory_space<vmem>>, vector<1x8x16x128xf32>
    %271 = vector.shape_cast %270 : vector<1x8x16x128xf32> to vector<8x16x128xf32>
    %272 = vector.shape_cast %68 : vector<128xf32> to vector<1x1x128xf32>
    %273 = vector.broadcast %272 : vector<1x1x128xf32> to vector<8x16x128xf32>
    %274 = arith.mulf %271, %273 : vector<8x16x128xf32>
    %275 = arith.addf %268, %274 : vector<8x16x128xf32>
    %276 = arith.index_cast %9 : i32 to index
    %c3_221 = arith.constant 3 : index
    %c1_222 = arith.constant 1 : index
    %c0_223 = arith.constant 0 : index
    %277 = vector.load %arg6[%276, %c3_221, %c1_222, %c0_223] : memref<2x14x22x128xf32, #tpu.memory_space<vmem>>, vector<1x8x16x128xf32>
    %278 = vector.shape_cast %277 : vector<1x8x16x128xf32> to vector<8x16x128xf32>
    %279 = vector.shape_cast %70 : vector<128xf32> to vector<1x1x128xf32>
    %280 = vector.broadcast %279 : vector<1x1x128xf32> to vector<8x16x128xf32>
    %281 = arith.mulf %278, %280 : vector<8x16x128xf32>
    %282 = arith.addf %275, %281 : vector<8x16x128xf32>
    %283 = arith.index_cast %9 : i32 to index
    %c3_224 = arith.constant 3 : index
    %c2_225 = arith.constant 2 : index
    %c0_226 = arith.constant 0 : index
    %284 = vector.load %arg6[%283, %c3_224, %c2_225, %c0_226] : memref<2x14x22x128xf32, #tpu.memory_space<vmem>>, vector<1x8x16x128xf32>
    %285 = vector.shape_cast %284 : vector<1x8x16x128xf32> to vector<8x16x128xf32>
    %286 = vector.shape_cast %72 : vector<128xf32> to vector<1x1x128xf32>
    %287 = vector.broadcast %286 : vector<1x1x128xf32> to vector<8x16x128xf32>
    %288 = arith.mulf %285, %287 : vector<8x16x128xf32>
    %289 = arith.addf %282, %288 : vector<8x16x128xf32>
    %290 = arith.index_cast %9 : i32 to index
    %c3_227 = arith.constant 3 : index
    %c3_228 = arith.constant 3 : index
    %c0_229 = arith.constant 0 : index
    %291 = vector.load %arg6[%290, %c3_227, %c3_228, %c0_229] : memref<2x14x22x128xf32, #tpu.memory_space<vmem>>, vector<1x8x16x128xf32>
    %292 = vector.shape_cast %291 : vector<1x8x16x128xf32> to vector<8x16x128xf32>
    %293 = vector.shape_cast %74 : vector<128xf32> to vector<1x1x128xf32>
    %294 = vector.broadcast %293 : vector<1x1x128xf32> to vector<8x16x128xf32>
    %295 = arith.mulf %292, %294 : vector<8x16x128xf32>
    %296 = arith.addf %289, %295 : vector<8x16x128xf32>
    %297 = arith.index_cast %9 : i32 to index
    %c3_230 = arith.constant 3 : index
    %c4_231 = arith.constant 4 : index
    %c0_232 = arith.constant 0 : index
    %298 = vector.load %arg6[%297, %c3_230, %c4_231, %c0_232] : memref<2x14x22x128xf32, #tpu.memory_space<vmem>>, vector<1x8x16x128xf32>
    %299 = vector.shape_cast %298 : vector<1x8x16x128xf32> to vector<8x16x128xf32>
    %300 = vector.shape_cast %76 : vector<128xf32> to vector<1x1x128xf32>
    %301 = vector.broadcast %300 : vector<1x1x128xf32> to vector<8x16x128xf32>
    %302 = arith.mulf %299, %301 : vector<8x16x128xf32>
    %303 = arith.addf %296, %302 : vector<8x16x128xf32>
    %304 = arith.index_cast %9 : i32 to index
    %c3_233 = arith.constant 3 : index
    %c5_234 = arith.constant 5 : index
    %c0_235 = arith.constant 0 : index
    %305 = vector.load %arg6[%304, %c3_233, %c5_234, %c0_235] : memref<2x14x22x128xf32, #tpu.memory_space<vmem>>, vector<1x8x16x128xf32>
    %306 = vector.shape_cast %305 : vector<1x8x16x128xf32> to vector<8x16x128xf32>
    %307 = vector.shape_cast %78 : vector<128xf32> to vector<1x1x128xf32>
    %308 = vector.broadcast %307 : vector<1x1x128xf32> to vector<8x16x128xf32>
    %309 = arith.mulf %306, %308 : vector<8x16x128xf32>
    %310 = arith.addf %303, %309 : vector<8x16x128xf32>
    %311 = arith.index_cast %9 : i32 to index
    %c3_236 = arith.constant 3 : index
    %c6_237 = arith.constant 6 : index
    %c0_238 = arith.constant 0 : index
    %312 = vector.load %arg6[%311, %c3_236, %c6_237, %c0_238] : memref<2x14x22x128xf32, #tpu.memory_space<vmem>>, vector<1x8x16x128xf32>
    %313 = vector.shape_cast %312 : vector<1x8x16x128xf32> to vector<8x16x128xf32>
    %314 = vector.shape_cast %80 : vector<128xf32> to vector<1x1x128xf32>
    %315 = vector.broadcast %314 : vector<1x1x128xf32> to vector<8x16x128xf32>
    %316 = arith.mulf %313, %315 : vector<8x16x128xf32>
    %317 = arith.addf %310, %316 : vector<8x16x128xf32>
    %318 = arith.index_cast %9 : i32 to index
    %c4_239 = arith.constant 4 : index
    %c0_240 = arith.constant 0 : index
    %c0_241 = arith.constant 0 : index
    %319 = vector.load %arg6[%318, %c4_239, %c0_240, %c0_241] : memref<2x14x22x128xf32, #tpu.memory_space<vmem>>, vector<1x8x16x128xf32>
    %320 = vector.shape_cast %319 : vector<1x8x16x128xf32> to vector<8x16x128xf32>
    %321 = vector.shape_cast %82 : vector<128xf32> to vector<1x1x128xf32>
    %322 = vector.broadcast %321 : vector<1x1x128xf32> to vector<8x16x128xf32>
    %323 = arith.mulf %320, %322 : vector<8x16x128xf32>
    %324 = arith.addf %317, %323 : vector<8x16x128xf32>
    %325 = arith.index_cast %9 : i32 to index
    %c4_242 = arith.constant 4 : index
    %c1_243 = arith.constant 1 : index
    %c0_244 = arith.constant 0 : index
    %326 = vector.load %arg6[%325, %c4_242, %c1_243, %c0_244] : memref<2x14x22x128xf32, #tpu.memory_space<vmem>>, vector<1x8x16x128xf32>
    %327 = vector.shape_cast %326 : vector<1x8x16x128xf32> to vector<8x16x128xf32>
    %328 = vector.shape_cast %84 : vector<128xf32> to vector<1x1x128xf32>
    %329 = vector.broadcast %328 : vector<1x1x128xf32> to vector<8x16x128xf32>
    %330 = arith.mulf %327, %329 : vector<8x16x128xf32>
    %331 = arith.addf %324, %330 : vector<8x16x128xf32>
    %332 = arith.index_cast %9 : i32 to index
    %c4_245 = arith.constant 4 : index
    %c2_246 = arith.constant 2 : index
    %c0_247 = arith.constant 0 : index
    %333 = vector.load %arg6[%332, %c4_245, %c2_246, %c0_247] : memref<2x14x22x128xf32, #tpu.memory_space<vmem>>, vector<1x8x16x128xf32>
    %334 = vector.shape_cast %333 : vector<1x8x16x128xf32> to vector<8x16x128xf32>
    %335 = vector.shape_cast %86 : vector<128xf32> to vector<1x1x128xf32>
    %336 = vector.broadcast %335 : vector<1x1x128xf32> to vector<8x16x128xf32>
    %337 = arith.mulf %334, %336 : vector<8x16x128xf32>
    %338 = arith.addf %331, %337 : vector<8x16x128xf32>
    %339 = arith.index_cast %9 : i32 to index
    %c4_248 = arith.constant 4 : index
    %c3_249 = arith.constant 3 : index
    %c0_250 = arith.constant 0 : index
    %340 = vector.load %arg6[%339, %c4_248, %c3_249, %c0_250] : memref<2x14x22x128xf32, #tpu.memory_space<vmem>>, vector<1x8x16x128xf32>
    %341 = vector.shape_cast %340 : vector<1x8x16x128xf32> to vector<8x16x128xf32>
    %342 = vector.shape_cast %88 : vector<128xf32> to vector<1x1x128xf32>
    %343 = vector.broadcast %342 : vector<1x1x128xf32> to vector<8x16x128xf32>
    %344 = arith.mulf %341, %343 : vector<8x16x128xf32>
    %345 = arith.addf %338, %344 : vector<8x16x128xf32>
    %346 = arith.index_cast %9 : i32 to index
    %c4_251 = arith.constant 4 : index
    %c4_252 = arith.constant 4 : index
    %c0_253 = arith.constant 0 : index
    %347 = vector.load %arg6[%346, %c4_251, %c4_252, %c0_253] : memref<2x14x22x128xf32, #tpu.memory_space<vmem>>, vector<1x8x16x128xf32>
    %348 = vector.shape_cast %347 : vector<1x8x16x128xf32> to vector<8x16x128xf32>
    %349 = vector.shape_cast %90 : vector<128xf32> to vector<1x1x128xf32>
    %350 = vector.broadcast %349 : vector<1x1x128xf32> to vector<8x16x128xf32>
    %351 = arith.mulf %348, %350 : vector<8x16x128xf32>
    %352 = arith.addf %345, %351 : vector<8x16x128xf32>
    %353 = arith.index_cast %9 : i32 to index
    %c4_254 = arith.constant 4 : index
    %c5_255 = arith.constant 5 : index
    %c0_256 = arith.constant 0 : index
    %354 = vector.load %arg6[%353, %c4_254, %c5_255, %c0_256] : memref<2x14x22x128xf32, #tpu.memory_space<vmem>>, vector<1x8x16x128xf32>
    %355 = vector.shape_cast %354 : vector<1x8x16x128xf32> to vector<8x16x128xf32>
    %356 = vector.shape_cast %92 : vector<128xf32> to vector<1x1x128xf32>
    %357 = vector.broadcast %356 : vector<1x1x128xf32> to vector<8x16x128xf32>
    %358 = arith.mulf %355, %357 : vector<8x16x128xf32>
    %359 = arith.addf %352, %358 : vector<8x16x128xf32>
    %360 = arith.index_cast %9 : i32 to index
    %c4_257 = arith.constant 4 : index
    %c6_258 = arith.constant 6 : index
    %c0_259 = arith.constant 0 : index
    %361 = vector.load %arg6[%360, %c4_257, %c6_258, %c0_259] : memref<2x14x22x128xf32, #tpu.memory_space<vmem>>, vector<1x8x16x128xf32>
    %362 = vector.shape_cast %361 : vector<1x8x16x128xf32> to vector<8x16x128xf32>
    %363 = vector.shape_cast %94 : vector<128xf32> to vector<1x1x128xf32>
    %364 = vector.broadcast %363 : vector<1x1x128xf32> to vector<8x16x128xf32>
    %365 = arith.mulf %362, %364 : vector<8x16x128xf32>
    %366 = arith.addf %359, %365 : vector<8x16x128xf32>
    %367 = arith.index_cast %9 : i32 to index
    %c5_260 = arith.constant 5 : index
    %c0_261 = arith.constant 0 : index
    %c0_262 = arith.constant 0 : index
    %368 = vector.load %arg6[%367, %c5_260, %c0_261, %c0_262] : memref<2x14x22x128xf32, #tpu.memory_space<vmem>>, vector<1x8x16x128xf32>
    %369 = vector.shape_cast %368 : vector<1x8x16x128xf32> to vector<8x16x128xf32>
    %370 = vector.shape_cast %96 : vector<128xf32> to vector<1x1x128xf32>
    %371 = vector.broadcast %370 : vector<1x1x128xf32> to vector<8x16x128xf32>
    %372 = arith.mulf %369, %371 : vector<8x16x128xf32>
    %373 = arith.addf %366, %372 : vector<8x16x128xf32>
    %374 = arith.index_cast %9 : i32 to index
    %c5_263 = arith.constant 5 : index
    %c1_264 = arith.constant 1 : index
    %c0_265 = arith.constant 0 : index
    %375 = vector.load %arg6[%374, %c5_263, %c1_264, %c0_265] : memref<2x14x22x128xf32, #tpu.memory_space<vmem>>, vector<1x8x16x128xf32>
    %376 = vector.shape_cast %375 : vector<1x8x16x128xf32> to vector<8x16x128xf32>
    %377 = vector.shape_cast %98 : vector<128xf32> to vector<1x1x128xf32>
    %378 = vector.broadcast %377 : vector<1x1x128xf32> to vector<8x16x128xf32>
    %379 = arith.mulf %376, %378 : vector<8x16x128xf32>
    %380 = arith.addf %373, %379 : vector<8x16x128xf32>
    %381 = arith.index_cast %9 : i32 to index
    %c5_266 = arith.constant 5 : index
    %c2_267 = arith.constant 2 : index
    %c0_268 = arith.constant 0 : index
    %382 = vector.load %arg6[%381, %c5_266, %c2_267, %c0_268] : memref<2x14x22x128xf32, #tpu.memory_space<vmem>>, vector<1x8x16x128xf32>
    %383 = vector.shape_cast %382 : vector<1x8x16x128xf32> to vector<8x16x128xf32>
    %384 = vector.shape_cast %100 : vector<128xf32> to vector<1x1x128xf32>
    %385 = vector.broadcast %384 : vector<1x1x128xf32> to vector<8x16x128xf32>
    %386 = arith.mulf %383, %385 : vector<8x16x128xf32>
    %387 = arith.addf %380, %386 : vector<8x16x128xf32>
    %388 = arith.index_cast %9 : i32 to index
    %c5_269 = arith.constant 5 : index
    %c3_270 = arith.constant 3 : index
    %c0_271 = arith.constant 0 : index
    %389 = vector.load %arg6[%388, %c5_269, %c3_270, %c0_271] : memref<2x14x22x128xf32, #tpu.memory_space<vmem>>, vector<1x8x16x128xf32>
    %390 = vector.shape_cast %389 : vector<1x8x16x128xf32> to vector<8x16x128xf32>
    %391 = vector.shape_cast %102 : vector<128xf32> to vector<1x1x128xf32>
    %392 = vector.broadcast %391 : vector<1x1x128xf32> to vector<8x16x128xf32>
    %393 = arith.mulf %390, %392 : vector<8x16x128xf32>
    %394 = arith.addf %387, %393 : vector<8x16x128xf32>
    %395 = arith.index_cast %9 : i32 to index
    %c5_272 = arith.constant 5 : index
    %c4_273 = arith.constant 4 : index
    %c0_274 = arith.constant 0 : index
    %396 = vector.load %arg6[%395, %c5_272, %c4_273, %c0_274] : memref<2x14x22x128xf32, #tpu.memory_space<vmem>>, vector<1x8x16x128xf32>
    %397 = vector.shape_cast %396 : vector<1x8x16x128xf32> to vector<8x16x128xf32>
    %398 = vector.shape_cast %104 : vector<128xf32> to vector<1x1x128xf32>
    %399 = vector.broadcast %398 : vector<1x1x128xf32> to vector<8x16x128xf32>
    %400 = arith.mulf %397, %399 : vector<8x16x128xf32>
    %401 = arith.addf %394, %400 : vector<8x16x128xf32>
    %402 = arith.index_cast %9 : i32 to index
    %c5_275 = arith.constant 5 : index
    %c5_276 = arith.constant 5 : index
    %c0_277 = arith.constant 0 : index
    %403 = vector.load %arg6[%402, %c5_275, %c5_276, %c0_277] : memref<2x14x22x128xf32, #tpu.memory_space<vmem>>, vector<1x8x16x128xf32>
    %404 = vector.shape_cast %403 : vector<1x8x16x128xf32> to vector<8x16x128xf32>
    %405 = vector.shape_cast %106 : vector<128xf32> to vector<1x1x128xf32>
    %406 = vector.broadcast %405 : vector<1x1x128xf32> to vector<8x16x128xf32>
    %407 = arith.mulf %404, %406 : vector<8x16x128xf32>
    %408 = arith.addf %401, %407 : vector<8x16x128xf32>
    %409 = arith.index_cast %9 : i32 to index
    %c5_278 = arith.constant 5 : index
    %c6_279 = arith.constant 6 : index
    %c0_280 = arith.constant 0 : index
    %410 = vector.load %arg6[%409, %c5_278, %c6_279, %c0_280] : memref<2x14x22x128xf32, #tpu.memory_space<vmem>>, vector<1x8x16x128xf32>
    %411 = vector.shape_cast %410 : vector<1x8x16x128xf32> to vector<8x16x128xf32>
    %412 = vector.shape_cast %108 : vector<128xf32> to vector<1x1x128xf32>
    %413 = vector.broadcast %412 : vector<1x1x128xf32> to vector<8x16x128xf32>
    %414 = arith.mulf %411, %413 : vector<8x16x128xf32>
    %415 = arith.addf %408, %414 : vector<8x16x128xf32>
    %416 = arith.index_cast %9 : i32 to index
    %c6_281 = arith.constant 6 : index
    %c0_282 = arith.constant 0 : index
    %c0_283 = arith.constant 0 : index
    %417 = vector.load %arg6[%416, %c6_281, %c0_282, %c0_283] : memref<2x14x22x128xf32, #tpu.memory_space<vmem>>, vector<1x8x16x128xf32>
    %418 = vector.shape_cast %417 : vector<1x8x16x128xf32> to vector<8x16x128xf32>
    %419 = vector.shape_cast %110 : vector<128xf32> to vector<1x1x128xf32>
    %420 = vector.broadcast %419 : vector<1x1x128xf32> to vector<8x16x128xf32>
    %421 = arith.mulf %418, %420 : vector<8x16x128xf32>
    %422 = arith.addf %415, %421 : vector<8x16x128xf32>
    %423 = arith.index_cast %9 : i32 to index
    %c6_284 = arith.constant 6 : index
    %c1_285 = arith.constant 1 : index
    %c0_286 = arith.constant 0 : index
    %424 = vector.load %arg6[%423, %c6_284, %c1_285, %c0_286] : memref<2x14x22x128xf32, #tpu.memory_space<vmem>>, vector<1x8x16x128xf32>
    %425 = vector.shape_cast %424 : vector<1x8x16x128xf32> to vector<8x16x128xf32>
    %426 = vector.shape_cast %112 : vector<128xf32> to vector<1x1x128xf32>
    %427 = vector.broadcast %426 : vector<1x1x128xf32> to vector<8x16x128xf32>
    %428 = arith.mulf %425, %427 : vector<8x16x128xf32>
    %429 = arith.addf %422, %428 : vector<8x16x128xf32>
    %430 = arith.index_cast %9 : i32 to index
    %c6_287 = arith.constant 6 : index
    %c2_288 = arith.constant 2 : index
    %c0_289 = arith.constant 0 : index
    %431 = vector.load %arg6[%430, %c6_287, %c2_288, %c0_289] : memref<2x14x22x128xf32, #tpu.memory_space<vmem>>, vector<1x8x16x128xf32>
    %432 = vector.shape_cast %431 : vector<1x8x16x128xf32> to vector<8x16x128xf32>
    %433 = vector.shape_cast %114 : vector<128xf32> to vector<1x1x128xf32>
    %434 = vector.broadcast %433 : vector<1x1x128xf32> to vector<8x16x128xf32>
    %435 = arith.mulf %432, %434 : vector<8x16x128xf32>
    %436 = arith.addf %429, %435 : vector<8x16x128xf32>
    %437 = arith.index_cast %9 : i32 to index
    %c6_290 = arith.constant 6 : index
    %c3_291 = arith.constant 3 : index
    %c0_292 = arith.constant 0 : index
    %438 = vector.load %arg6[%437, %c6_290, %c3_291, %c0_292] : memref<2x14x22x128xf32, #tpu.memory_space<vmem>>, vector<1x8x16x128xf32>
    %439 = vector.shape_cast %438 : vector<1x8x16x128xf32> to vector<8x16x128xf32>
    %440 = vector.shape_cast %116 : vector<128xf32> to vector<1x1x128xf32>
    %441 = vector.broadcast %440 : vector<1x1x128xf32> to vector<8x16x128xf32>
    %442 = arith.mulf %439, %441 : vector<8x16x128xf32>
    %443 = arith.addf %436, %442 : vector<8x16x128xf32>
    %444 = arith.index_cast %9 : i32 to index
    %c6_293 = arith.constant 6 : index
    %c4_294 = arith.constant 4 : index
    %c0_295 = arith.constant 0 : index
    %445 = vector.load %arg6[%444, %c6_293, %c4_294, %c0_295] : memref<2x14x22x128xf32, #tpu.memory_space<vmem>>, vector<1x8x16x128xf32>
    %446 = vector.shape_cast %445 : vector<1x8x16x128xf32> to vector<8x16x128xf32>
    %447 = vector.shape_cast %118 : vector<128xf32> to vector<1x1x128xf32>
    %448 = vector.broadcast %447 : vector<1x1x128xf32> to vector<8x16x128xf32>
    %449 = arith.mulf %446, %448 : vector<8x16x128xf32>
    %450 = arith.addf %443, %449 : vector<8x16x128xf32>
    %451 = arith.index_cast %9 : i32 to index
    %c6_296 = arith.constant 6 : index
    %c5_297 = arith.constant 5 : index
    %c0_298 = arith.constant 0 : index
    %452 = vector.load %arg6[%451, %c6_296, %c5_297, %c0_298] : memref<2x14x22x128xf32, #tpu.memory_space<vmem>>, vector<1x8x16x128xf32>
    %453 = vector.shape_cast %452 : vector<1x8x16x128xf32> to vector<8x16x128xf32>
    %454 = vector.shape_cast %120 : vector<128xf32> to vector<1x1x128xf32>
    %455 = vector.broadcast %454 : vector<1x1x128xf32> to vector<8x16x128xf32>
    %456 = arith.mulf %453, %455 : vector<8x16x128xf32>
    %457 = arith.addf %450, %456 : vector<8x16x128xf32>
    %458 = arith.index_cast %9 : i32 to index
    %c6_299 = arith.constant 6 : index
    %c6_300 = arith.constant 6 : index
    %c0_301 = arith.constant 0 : index
    %459 = vector.load %arg6[%458, %c6_299, %c6_300, %c0_301] : memref<2x14x22x128xf32, #tpu.memory_space<vmem>>, vector<1x8x16x128xf32>
    %460 = vector.shape_cast %459 : vector<1x8x16x128xf32> to vector<8x16x128xf32>
    %461 = vector.shape_cast %122 : vector<128xf32> to vector<1x1x128xf32>
    %462 = vector.broadcast %461 : vector<1x1x128xf32> to vector<8x16x128xf32>
    %463 = arith.mulf %460, %462 : vector<8x16x128xf32>
    %464 = arith.addf %457, %463 : vector<8x16x128xf32>
    %c0_302 = arith.constant 0 : index
    %c0_303 = arith.constant 0 : index
    %c0_304 = arith.constant 0 : index
    %c0_305 = arith.constant 0 : index
    %465 = vector.load %arg5[%c0_302, %c0_303, %c0_304, %c0_305] : memref<1x8x16x128xf32, #tpu.memory_space<vmem>>, vector<1x8x16x128xf32>
    %466 = vector.shape_cast %465 : vector<1x8x16x128xf32> to vector<8x16x128xf32>
    %467 = vector.shape_cast %464 : vector<8x16x128xf32> to vector<1x8x16x128xf32>
    tpu.vector_store %arg5[%c0_302, %c0_303, %c0_304, %c0_305], %467 {strides = array<i32>} : memref<1x8x16x128xf32, #tpu.memory_space<vmem>>, vector<1x8x16x128xf32>,
    return
  }
  func.func @transform_1(%arg0: i32, %arg1: i32, %arg2: i32) -> (i32, i32, i32) {
    %c0_i32 = arith.constant 0 : i32
    %c0_i32_0 = arith.constant 0 : i32
    %c0_i32_1 = arith.constant 0 : i32
    %c0_i32_2 = arith.constant 0 : i32
    return %c0_i32, %c0_i32_0, %c0_i32_1 : i32, i32, i32
  }
  func.func @transform_2(%arg0: i32, %arg1: i32, %arg2: i32) -> (i32, i32, i32, i32) {
    %c1_i32 = arith.constant 1 : i32
    %0 = arith.muli %arg1, %c1_i32 : i32
    %1 = arith.addi %0, %arg2 : i32
    %c0_i32 = arith.constant 0 : i32
    %c0_i32_0 = arith.constant 0 : i32
    %c0_i32_1 = arith.constant 0 : i32
    return %arg0, %1, %c0_i32, %c0_i32_0 : i32, i32, i32, i32
  }
}

</mosaic_0001>

<bundles_post_ra>
// kernel: tpu_custom_call.1
= control target key start
LH: loop header
LB: loop body
LE: loop exit
PB: predicated region body
PF: predicated region fallthrough
CT: control target
= control target key end

     0   :  { %7 = vsyncpa [#allocation5], 0  ;;  %s5766_s0 = inlined_call_operand.vmem [shape: f32[1,22,22,128], index: 0, kind: input, shape index: {}]   ;;  %s5767_s1 = inlined_call_operand.vmem [shape: f32[7,7,128], index: 1, kind: input, shape index: {}]   ;;  %s5768_s2 = inlined_call_operand.hbm [shape: f32[1,16,16,128], index: 2, kind: output, shape index: {}]  }
   0x1   :  { %9 = vsyncpa [#allocation5 + $0x1], 0  ;;  %s4058_s9 = smov 0   ;;  %s4060_s10 = smov 0  }
   0x2   :  { %s4062_s11 = smov 0   ;;  %s4064_s12 = smov 0  }
   0x3   :  { %s4066_s13 = smov 0   ;;  %s4068_s14 = smov 0  }
   0x4 LB: > { %s3009_s15 = sadd.s32 4294967295, %s4039_s14   ;;  %s3010_s16 = sadd.s32 4294967294, %s4039_s14   ;;  %s4039_s14 = sphi %s4068_s14, %s15_s14   ;;  %s4035_s13 = sphi %s4066_s13, %s6510_s13   ;;  %s4031_s12 = sphi %s4064_s12, %s6509_s12   ;;  %s4027_s11 = sphi %s4062_s11, %s6508_s11   ;;  %s4023_s10 = sphi %s4060_s10, %s6507_s10   ;;  %s4019_s9 = sphi %s4058_s9, %s6506_s9  }
   0x5   : > { %s30_s17 = sadd.s32 1, %s4035_s13  ;;  %s66_s18 = sadd.s32 1, %s4027_s11 }
   0x6   : > { %p32_p0 = scmp.ge.s32.totalorder %s30_s17, 2  ;;  %p76_p1 = scmp.ne.s32.totalorder %s4027_s11, %s4023_s10 }
   0x7   : > { %p77_p2 = scmp.eq.s32.totalorder %s3009_s15, 1  ;;  %p82_p3 = scmp.ne.s32.totalorder %s4023_s10, %s4019_s9 }
   0x8   : > { %s6512_s17 = smov (%p32_p0, %s30_s17), 0  ;;  %p83_p5 = scmp.eq.s32.totalorder %s3010_s16, 1 }
   0x9   : > { %p4098_p4 = por %p77_p2, %p76_p1  ;;  %s62_s20 = ssub.s32 %s4035_s13, %s6512_s17 }
   0xa   : > { %p3012_p6 = scmp.ge.s32.totalorder %s4039_s14, 1  ;;  %p64_p7 = scmp.eq.s32.totalorder %s62_s20, 0 }
   0xb   : > { %p4105_p8 = por %p83_p5, %p82_p3  ;;  %p104_p9 = scmp.lt.s32.totalorder %s4039_s14, 3 }
   0xc   : > { %s4111_s22 = scalar_select %p64_p7, %s4027_s11, %s66_s18  }
   0xd   : > { %p105_p10 = pnand %p3012_p6, %p104_p9 }
   0xf   : > { %108 = sbr.rel (%p105_p10) target bundleno = 509 (0x1fd), region = 24 }
  0x14   : > { %s116_s23 = sand.u32 1, %s4023_s10   ;;  %s3015_s24 = smul.u32 192, %s4031_s12 }
  0x15   : > { %s4117_s25 = sshll.u32 %s116_s23, 7 }
  0x16   : > { %s4122_s28 = scalar_lea.vmem %s5766_s0, %s3015_s24  ;;  %s4167_s29 = scalar_lea.vmem [#allocation4], %s4117_s25 }
  0x17   : > { %v158_v0 = vld [vmem:[%s4122_s28] sm:$0xff]  ;;  %v160_v1 = vld [vmem:[%s4122_s28 + $0x8] sm:$0xff]  ;;  %v162_v2 = vld [vmem:[%s4122_s28 + $0x18] sm:$0xff] }
  0x18   : > { %159 = vst [vmem:[#allocation2] sm:$0xff] %v158_v0  ;;  %v164_v3 = vld [vmem:[%s4122_s28 + $0x20] sm:$0xff]  ;;  %v166_v4 = vld [vmem:[%s4122_s28 + $0x30] sm:$0xff]  ;;  %v168_v5 = vld [vmem:[%s4122_s28 + $0x38] sm:$0xff] }
  0x19   : > { %161 = vst [vmem:[#allocation2 + $0x8] sm:$0xff] %v160_v1  ;;  %v170_v6 = vld [vmem:[%s4122_s28 + $0x48] sm:$0xff]  ;;  %v172_v7 = vld [vmem:[%s4122_s28 + $0x50] sm:$0xff]  ;;  %v174_v8 = vld [vmem:[%s4122_s28 + $0x60] sm:$0xff] }
  0x1a   : > { %163 = vst [vmem:[#allocation2 + $0x18] sm:$0xff] %v162_v2  ;;  %v176_v9 = vld [vmem:[%s4122_s28 + $0x68] sm:$0xff]  ;;  %v178_v10 = vld [vmem:[%s4122_s28 + $0x78] sm:$0xff]  ;;  %v180_v11 = vld [vmem:[%s4122_s28 + $0x80] sm:$0xff] }
  0x1b   : > { %165 = vst [vmem:[#allocation2 + $0x20] sm:$0xff] %v164_v3  ;;  %v182_v12 = vld [vmem:[%s4122_s28 + $0x90] sm:$0xff]  ;;  %v184_v13 = vld [vmem:[%s4122_s28 + $0x98] sm:$0xff]  ;;  %v186_v14 = vld [vmem:[%s4122_s28 + $0xa8] sm:$0xff] }
  0x1c   : > { %167 = vst [vmem:[#allocation2 + $0x30] sm:$0xff] %v166_v4  ;;  %v188_v15 = vld [vmem:[%s4122_s28 + $0xb0] sm:$0xff]  ;;  %v190_v16 = vld [vmem:[%s4122_s28 + $0xc0] sm:$0xff]  ;;  %v192_v17 = vld [vmem:[%s4122_s28 + $0xc8] sm:$0xff] }
  0x1d   : > { %169 = vst [vmem:[#allocation2 + $0x38] sm:$0xff] %v168_v5  ;;  %v194_v18 = vld [vmem:[%s4122_s28 + $0xd8] sm:$0xff]  ;;  %v196_v19 = vld [vmem:[%s4122_s28 + $0xe0] sm:$0xff]  ;;  %v198_v20 = vld [vmem:[%s4122_s28 + $0xf0] sm:$0xff] }
  0x1e   : > { %171 = vst [vmem:[#allocation2 + $0x48] sm:$0xff] %v170_v6  ;;  %v200_v21 = vld [vmem:[%s4122_s28 + $0xf8] sm:$0xff]  ;;  %v202_v22 = vld [vmem:[%s4122_s28 + $0x108] sm:$0xff]  ;;  %v204_v23 = vld [vmem:[%s4122_s28 + $0x110] sm:$0xff] }
  0x1f   : > { %173 = vst [vmem:[#allocation2 + $0x50] sm:$0xff] %v172_v7  ;;  %v206_v24 = vld [vmem:[%s4122_s28 + $0x120] sm:$0xff]  ;;  %v208_v25 = vld [vmem:[%s4122_s28 + $0x128] sm:$0xff]  ;;  %v210_v26 = vld [vmem:[%s4122_s28 + $0x138] sm:$0xff] }
  0x20   : > { %175 = vst [vmem:[#allocation2 + $0x60] sm:$0xff] %v174_v8  ;;  %v212_v27 = vld [vmem:[%s4122_s28 + $0x140] sm:$0xff]  ;;  %v3016_v28 = vld [vmem:[%s4122_s28 + $0x10] sm:$0x3f]  ;;  %v3018_v29 = vld [vmem:[%s4122_s28 + $0x28] sm:$0x3f] }
  0x21   : > { %177 = vst [vmem:[#allocation2 + $0x68] sm:$0xff] %v176_v9  ;;  %v3020_v30 = vld [vmem:[%s4122_s28 + $0x40] sm:$0x3f]  ;;  %v3022_v31 = vld [vmem:[%s4122_s28 + $0x58] sm:$0x3f] }
  0x22   : > { %179 = vst [vmem:[#allocation2 + $0x78] sm:$0xff] %v178_v10  ;;  %v3024_v32 = vld [vmem:[%s4122_s28 + $0x70] sm:$0x3f]  ;;  %v3026_v33 = vld [vmem:[%s4122_s28 + $0x88] sm:$0x3f] }
  0x23   : > { %181 = vst [vmem:[#allocation2 + $0x80] sm:$0xff] %v180_v11  ;;  %v3028_v34 = vld [vmem:[%s4122_s28 + $0xa0] sm:$0x3f]  ;;  %v3030_v35 = vld [vmem:[%s4122_s28 + $0xb8] sm:$0x3f] }
  0x24   : > { %183 = vst [vmem:[#allocation2 + $0x90] sm:$0xff] %v182_v12  ;;  %v3032_v36 = vld [vmem:[%s4122_s28 + $0xd0] sm:$0x3f]  ;;  %v3034_v37 = vld [vmem:[%s4122_s28 + $0xe8] sm:$0x3f] }
  0x25   : > { %185 = vst [vmem:[#allocation2 + $0x98] sm:$0xff] %v184_v13  ;;  %v3036_v38 = vld [vmem:[%s4122_s28 + $0x100] sm:$0x3f]  ;;  %v3038_v39 = vld [vmem:[%s4122_s28 + $0x118] sm:$0x3f] }
  0x26   : > { %187 = vst [vmem:[#allocation2 + $0xa8] sm:$0xff] %v186_v14  ;;  %v3040_v40 = vld [vmem:[%s4122_s28 + $0x130] sm:$0x3f]  ;;  %v3042_v41 = vld [vmem:[%s4122_s28 + $0x148] sm:$0x3f] }
  0x27   : > { %189 = vst [vmem:[#allocation2 + $0xb0] sm:$0xff] %v188_v15 }
  0x28   : > { %191 = vst [vmem:[#allocation2 + $0xc0] sm:$0xff] %v190_v16 }
  0x29   : > { %193 = vst [vmem:[#allocation2 + $0xc8] sm:$0xff] %v192_v17 }
  0x2a   : > { %195 = vst [vmem:[#allocation2 + $0xd8] sm:$0xff] %v194_v18 }
  0x2b   : > { %197 = vst [vmem:[#allocation2 + $0xe0] sm:$0xff] %v196_v19 }
  0x2c   : > { %199 = vst [vmem:[#allocation2 + $0xf0] sm:$0xff] %v198_v20 }
  0x2d   : > { %201 = vst [vmem:[#allocation2 + $0xf8] sm:$0xff] %v200_v21 }
  0x2e   : > { %203 = vst [vmem:[#allocation2 + $0x108] sm:$0xff] %v202_v22 }
  0x2f   : > { %205 = vst [vmem:[#allocation2 + $0x110] sm:$0xff] %v204_v23 }
  0x30   : > { %207 = vst [vmem:[#allocation2 + $0x120] sm:$0xff] %v206_v24 }
  0x31   : > { %209 = vst [vmem:[#allocation2 + $0x128] sm:$0xff] %v208_v25 }
  0x32   : > { %211 = vst [vmem:[#allocation2 + $0x138] sm:$0xff] %v210_v26 }
  0x33   : > { %213 = vst [vmem:[#allocation2 + $0x140] sm:$0xff] %v212_v27 }
  0x34   : > { %3017 = vst [vmem:[#allocation2 + $0x10] sm:$0x3f] %v3016_v28 }
  0x35   : > { %3019 = vst [vmem:[#allocation2 + $0x28] sm:$0x3f] %v3018_v29 }
  0x36   : > { %3021 = vst [vmem:[#allocation2 + $0x40] sm:$0x3f] %v3020_v30 }
  0x37   : > { %3023 = vst [vmem:[#allocation2 + $0x58] sm:$0x3f] %v3022_v31 }
  0x38   : > { %3025 = vst [vmem:[#allocation2 + $0x70] sm:$0x3f] %v3024_v32 }
  0x39   : > { %3027 = vst [vmem:[#allocation2 + $0x88] sm:$0x3f] %v3026_v33 }
  0x3a   : > { %3029 = vst [vmem:[#allocation2 + $0xa0] sm:$0x3f] %v3028_v34 }
  0x3b   : > { %3031 = vst [vmem:[#allocation2 + $0xb8] sm:$0x3f] %v3030_v35 }
  0x3c   : > { %3033 = vst [vmem:[#allocation2 + $0xd0] sm:$0x3f] %v3032_v36 }
  0x3d   : > { %3035 = vst [vmem:[#allocation2 + $0xe8] sm:$0x3f] %v3034_v37 }
  0x3e   : > { %3037 = vst [vmem:[#allocation2 + $0x100] sm:$0x3f] %v3036_v38 }
  0x3f   : > { %3039 = vst [vmem:[#allocation2 + $0x118] sm:$0x3f] %v3038_v39 }
  0x40   : > { %3041 = vst [vmem:[#allocation2 + $0x130] sm:$0x3f] %v3040_v40 }
  0x41   : > { %3043 = vst [vmem:[#allocation2 + $0x148] sm:$0x3f] %v3042_v41 }
  0x42   : > { %255 = vsyncadd [#allocation3], 4928 }
  0x43   : > { %4011 = dma.done.wait [#allocation3], 4928 }
  0x44   : > { %4012 = vsyncadd [#allocation3], 4294962368  ;;  %v443_v42 = vld [vmem:[#allocation2] sm:$0xff]  ;;  %v444_v43 = vld [vmem:[#allocation2 + $0x8] sm:$0xff]  ;;  %s3852_s4 = sshll.u32 %s4031_s12, 7  ;;  %s2873_s7 = sshll.u32 %s4167_s29, 4  ;;  %s2874_s7 = int_to_ptr.vmem [resolvable:$true] %s2873_s7 }
  0x45   : > { %v4169_v44 = vld [vmem:[#allocation2 + $0x18] sm:$0xff]  ;;  %v4171_v45 = vld [vmem:[#allocation2 + $0x20] sm:$0xff]  ;;  %v4173_v46 = vld [vmem:[#allocation2 + $0x30] sm:$0xff]  ;;  %s2872_s6 = scalar_lea.hbm %s5768_s2, %s3852_s4  ;;  %s2857_s15 = scalar_lea.sflag [#allocation5], %s116_s23 }
  0x46   : > { %v4175_v47 = vld [vmem:[#allocation2 + $0x38] sm:$0xff]  ;;  %v4177_v48 = vld [vmem:[#allocation2 + $0x48] sm:$0xff]  ;;  %v4179_v49 = vld [vmem:[#allocation2 + $0x50] sm:$0xff]  ;;  %s2875_s8 = sshll.u32 %s2872_s6, 4  ;;  %s3979_s25 = scalar_lea.hbm %s5768_s2, 256  ;;  %s2876_s8 = int_to_ptr.hbm [resolvable:$true] %s2875_s8 }
  0x47   : > { %v3910_v50 = vld [vmem:[%s5767_s1] ss:$0 sm:$0xff]  ;;  %v4186_v52 = vld [vmem:[#allocation2 + $0x68] sm:$0xff]  ;;  %v4188_v53 = vld [vmem:[#allocation2 + $0x78] sm:$0xff]  ;;  %s3973_s16 = sshra.s32 %s2876_s8, 4  ;;  %s3974_s16 = int_to_ptr.hbm [resolvable:$true] %s3973_s16 }
  0x48   : > { %v4184_v51 = vld [vmem:[#allocation2 + $0x60] sm:$0xff]  ;;  %v4192_v55 = vld [vmem:[#allocation2 + $0x90] sm:$0xff]  ;;  %v4194_v56 = vld [vmem:[#allocation2 + $0x98] sm:$0xff]  ;;  %v460_v61 = vmul.f32 %v3910_v50, %v443_v42  ;;  %v461_v62 = vmul.f32 %v3910_v50, %v444_v43  ;;  %v462_v63 = vmul.f32 %v3910_v50, %v4169_v44  ;;  %v463_v0 = vmul.f32 %v3910_v50, %v4171_v45  ;;  %s3975_s18 = scalar_lea.hbm %s3974_s16, 128  ;;  %p3980_p0 = scmp.lt.s32.totalorder %s3974_s16, %s5768_s2 }
  0x49   : > { %v4190_v54 = vld [vmem:[#allocation2 + $0x80] sm:$0xff]  ;;  %v4196_v57 = vld [vmem:[#allocation2 + $0xa8] sm:$0xff]  ;;  %v4198_v58 = vld [vmem:[#allocation2 + $0xb0] sm:$0xff]  ;;  %v464_v4 = vmul.f32 %v3910_v50, %v4173_v46  ;;  %v465_v5 = vmul.f32 %v3910_v50, %v4175_v47  ;;  %v466_v6 = vmul.f32 %v3910_v50, %v4177_v48  ;;  %v467_v7 = vmul.f32 %v3910_v50, %v4179_v49  ;;  %p3976_p11 = scmp.ne.s32.totalorder %s3974_s16, %s3975_s18  ;;  %p3981_p1 = scmp.lt.s32.totalorder %s3979_s25, %s3975_s18 }
  0x4a   : > { %v476_v59 = vld [vmem:[#allocation2 + $0x1] sm:$0xff]  ;;  %v477_v60 = vld [vmem:[#allocation2 + $0x9] sm:$0xff]  ;;  %v4202_v1 = vld [vmem:[#allocation2 + $0x19] sm:$0xff]  ;;  %v468_v11 = vmul.f32 %v3910_v50, %v4184_v51  ;;  %v469_v12 = vmul.f32 %v3910_v50, %v4186_v52  ;;  %v470_v13 = vmul.f32 %v3910_v50, %v4188_v53  ;;  %v471_v14 = vmul.f32 %v3910_v50, %v4190_v54 }
  0x4b   : > { %6016 = vst [vmem:[#allocation10_spill] sm:$0xff] %v4202_v1  ;;  %v4204_v2 = vld [vmem:[#allocation2 + $0x21] sm:$0xff]  ;;  %v4213_v8 = vld [vmem:[#allocation2 + $0x31] sm:$0xff]  ;;  %v4215_v9 = vld [vmem:[#allocation2 + $0x39] sm:$0xff]  ;;  %v472_v18 = vmul.f32 %v3910_v50, %v4192_v55  ;;  %v473_v19 = vmul.f32 %v3910_v50, %v4194_v56  ;;  %v474_v20 = vmul.f32 %v3910_v50, %v4196_v57  ;;  %v475_v21 = vmul.f32 %v3910_v50, %v4198_v58  ;;  %p3977_p12 = pnand %p3976_p11, %p4098_p4  ;;  %p3982_p2 = por %p3981_p1, %p3980_p0 }
  0x4c   : > { %6017 = vst [vmem:[#allocation11_spill] sm:$0xff] %v4204_v2  ;;  %v3911_v3 = vld [vmem:[%s5767_s1 + $0x1] ss:$0 sm:$0xff]  ;;  %v4217_v10 = vld [vmem:[#allocation2 + $0x49] sm:$0xff]  ;;  %v4223_v15 = vld [vmem:[#allocation2 + $0x51] sm:$0xff] }
  0x4d   : > { %6018 = vst [vmem:[#allocation12_spill] sm:$0xff] %v4213_v8  ;;  %v4225_v16 = vld [vmem:[#allocation2 + $0x61] sm:$0xff]  ;;  %v4227_v17 = vld [vmem:[#allocation2 + $0x69] sm:$0xff]  ;;  %v4233_v22 = vld [vmem:[#allocation2 + $0x79] sm:$0xff]  ;;  %v493_v28 = vmul.f32 %v3911_v3, %v476_v59  ;;  %v494_v29 = vmul.f32 %v3911_v3, %v477_v60  ;;  %v495_v30 = vmul.f32 %v3911_v3, %v4202_v1  ;;  %v496_v31 = vmul.f32 %v3911_v3, %v4204_v2  ;;  %p3978_p13 = pneg %p3977_p12 }
  0x4e   : > { %6019 = vst [vmem:[#allocation13_spill] sm:$0xff] %v4215_v9  ;;  %v4235_v23 = vld [vmem:[#allocation2 + $0x81] sm:$0xff]  ;;  %v4237_v24 = vld [vmem:[#allocation2 + $0x91] sm:$0xff]  ;;  %v4239_v25 = vld [vmem:[#allocation2 + $0x99] sm:$0xff]  ;;  %v497_v32 = vmul.f32 %v3911_v3, %v4213_v8  ;;  %v498_v33 = vmul.f32 %v3911_v3, %v4215_v9  ;;  %v499_v34 = vmul.f32 %v3911_v3, %v4217_v10  ;;  %v500_v35 = vmul.f32 %v3911_v3, %v4223_v15 }
  0x4f   : > { %6020 = vst [vmem:[#allocation14_spill] sm:$0xff] %v4217_v10  ;;  %v4241_v26 = vld [vmem:[#allocation2 + $0xa9] sm:$0xff]  ;;  %v4243_v27 = vld [vmem:[#allocation2 + $0xb1] sm:$0xff]  ;;  %v501_v36 = vmul.f32 %v3911_v3, %v4225_v16  ;;  %v502_v37 = vmul.f32 %v3911_v3, %v4227_v17  ;;  %v503_v38 = vmul.f32 %v3911_v3, %v4233_v22  ;;  %v504_v39 = vmul.f32 %v3911_v3, %v4235_v23  ;;  %v4259_v9 = vld [vmem:[#allocation2 + $0x1a] sm:$0xff]  ;;  %p3983_p3 = pnand %p3982_p2, %p3978_p13 }
  0x50   : > { %6021 = vst [vmem:[#allocation15_spill] sm:$0xff] %v4223_v15  ;;  %v505_v40 = vmul.f32 %v3911_v3, %v4237_v24  ;;  %v506_v41 = vmul.f32 %v3911_v3, %v4239_v25  ;;  %v507_v42 = vmul.f32 %v3911_v3, %v4241_v26  ;;  %v508_v43 = vmul.f32 %v3911_v3, %v4243_v27  ;;  %v525_v50 = vld [vmem:[#allocation2 + $0x2] sm:$0xff]  ;;  %v526_v59 = vld [vmem:[#allocation2 + $0xa] sm:$0xff]  ;;  %v4266_v8 = vld [vmem:[#allocation2 + $0x32] sm:$0xff] }
  0x51   : > { %6022 = vst [vmem:[#allocation16_spill] sm:$0xff] %v4225_v16  ;;  %v509_v60 = vadd.f32 %v493_v28, %v460_v61  ;;  %v510_v15 = vadd.f32 %v494_v29, %v461_v62  ;;  %v511_v10 = vadd.f32 %v495_v30, %v462_v63  ;;  %v512_v16 = vadd.f32 %v496_v31, %v463_v0  ;;  %v4268_v3 = vld [vmem:[#allocation2 + $0x3a] sm:$0xff]  ;;  %v4270_v61 = vld [vmem:[#allocation2 + $0x4a] sm:$0xff]  ;;  %v4272_v29 = vld [vmem:[#allocation2 + $0x52] sm:$0xff] }
  0x52   : > { %6023 = vst [vmem:[#allocation17_spill] sm:$0xff] %v4227_v17  ;;  %v4261_v17 = vld [vmem:[#allocation2 + $0x22] sm:$0xff]  ;;  %v517_v62 = vadd.f32 %v501_v36, %v468_v11  ;;  %v518_v63 = vadd.f32 %v502_v37, %v469_v12  ;;  %v519_v0 = vadd.f32 %v503_v38, %v470_v13  ;;  %v520_v28 = vadd.f32 %v504_v39, %v471_v14  ;;  %v4276_v31 = vld [vmem:[#allocation2 + $0x6a] sm:$0xff]  ;;  %v4284_v11 = vld [vmem:[#allocation2 + $0x9a] sm:$0xff] }
  0x53   : > { %6024 = vst [vmem:[#allocation18_spill] sm:$0xff] %v4233_v22  ;;  %v515_v22 = vadd.f32 %v499_v34, %v466_v6  ;;  %v4274_v30 = vld [vmem:[#allocation2 + $0x62] sm:$0xff]  ;;  %v523_v6 = vadd.f32 %v507_v42, %v474_v20  ;;  %v4282_v34 = vld [vmem:[#allocation2 + $0x92] sm:$0xff]  ;;  %v4286_v12 = vld [vmem:[#allocation2 + $0xaa] sm:$0xff] }
  0x54   : > { %6025 = vst [vmem:[#allocation19_spill] sm:$0xff] %v4235_v23  ;;  %v513_v23 = vadd.f32 %v497_v32, %v464_v4  ;;  %v521_v4 = vadd.f32 %v505_v40, %v472_v18  ;;  %v4278_v32 = vld [vmem:[#allocation2 + $0x7a] sm:$0xff]  ;;  %v4288_v13 = vld [vmem:[#allocation2 + $0xb2] sm:$0xff] }
  0x55   : > { %6026 = vst [vmem:[#allocation20_spill] sm:$0xff] %v4237_v24  ;;  %v3912_v24 = vld [vmem:[%s5767_s1 + $0x2] ss:$0 sm:$0xff] }
  0x56   : > { %6027 = vst [vmem:[#allocation21_spill] sm:$0xff] %v4239_v25  ;;  %v514_v25 = vadd.f32 %v498_v33, %v465_v5  ;;  %v522_v5 = vadd.f32 %v506_v41, %v473_v19  ;;  %v4280_v33 = vld [vmem:[#allocation2 + $0x82] sm:$0xff]  ;;  %v542_v14 = vmul.f32 %v3912_v24, %v525_v50  ;;  %v544_v36 = vmul.f32 %v3912_v24, %v4259_v9 }
  0x57   : > { %6028 = vst [vmem:[#allocation22_spill] sm:$0xff] %v4241_v26  ;;  %v516_v26 = vadd.f32 %v500_v35, %v467_v7  ;;  %v524_v7 = vadd.f32 %v508_v43, %v475_v21  ;;  %v543_v35 = vmul.f32 %v3912_v24, %v526_v59  ;;  %v545_v18 = vmul.f32 %v3912_v24, %v4261_v17 }
  0x58   : > { %6029 = vst [vmem:[#allocation23_spill] sm:$0xff] %v4243_v27  ;;  %v546_v19 = vmul.f32 %v3912_v24, %v4266_v8  ;;  %v547_v20 = vmul.f32 %v3912_v24, %v4268_v3  ;;  %v548_v21 = vmul.f32 %v3912_v24, %v4270_v61  ;;  %v549_v37 = vmul.f32 %v3912_v24, %v4272_v29  ;;  %v4311_v27 = vld [vmem:[#allocation2 + $0x33] sm:$0xff] }
  0x59   : > { %6030 = vst [vmem:[#allocation24_spill] sm:$0xff] %v4259_v9  ;;  %v550_v38 = vmul.f32 %v3912_v24, %v4274_v30  ;;  %v551_v39 = vmul.f32 %v3912_v24, %v4276_v31  ;;  %v552_v40 = vmul.f32 %v3912_v24, %v4278_v32  ;;  %v553_v41 = vmul.f32 %v3912_v24, %v4280_v33  ;;  %v4304_v9 = vld [vmem:[#allocation2 + $0x1b] sm:$0xff] }
  0x5a   : > { %6031 = vst [vmem:[#allocation25_spill] sm:$0xff] %v4261_v17  ;;  %v554_v42 = vmul.f32 %v3912_v24, %v4282_v34  ;;  %v555_v43 = vmul.f32 %v3912_v24, %v4284_v11  ;;  %v556_v50 = vmul.f32 %v3912_v24, %v4286_v12  ;;  %v557_v59 = vmul.f32 %v3912_v24, %v4288_v13  ;;  %v4313_v24 = vld [vmem:[#allocation2 + $0x3b] sm:$0xff] }
  0x5b   : > { %6032 = vst [vmem:[#allocation26_spill] sm:$0xff] %v4266_v8  ;;  %v558_v8 = vadd.f32 %v542_v14, %v509_v60  ;;  %v560_v17 = vadd.f32 %v544_v36, %v511_v10  ;;  %v4315_v60 = vld [vmem:[#allocation2 + $0x4b] sm:$0xff]  ;;  %v566_v10 = vadd.f32 %v550_v38, %v517_v62  ;;  %v569_v14 = vadd.f32 %v553_v41, %v520_v28  ;;  %v4319_v36 = vld [vmem:[#allocation2 + $0x63] sm:$0xff]  ;;  %v4329_v62 = vld [vmem:[#allocation2 + $0x9b] sm:$0xff] }
  0x5c   : > { %6033 = vst [vmem:[#allocation27_spill] sm:$0xff] %v4268_v3  ;;  %v574_v3 = vld [vmem:[#allocation2 + $0x3] sm:$0xff] }
  0x5d   : > { %6034 = vst [vmem:[#allocation28_spill] sm:$0xff] %v4270_v61  ;;  %v575_v61 = vld [vmem:[#allocation2 + $0xb] sm:$0xff] }
  0x5e   : > { %6035 = vst [vmem:[#allocation29_spill] sm:$0xff] %v4272_v29  ;;  %v559_v29 = vadd.f32 %v543_v35, %v510_v15  ;;  %v567_v15 = vadd.f32 %v551_v39, %v518_v63  ;;  %v4317_v35 = vld [vmem:[#allocation2 + $0x53] sm:$0xff]  ;;  %v4331_v63 = vld [vmem:[#allocation2 + $0xab] sm:$0xff] }
  0x5f   : > { %6036 = vst [vmem:[#allocation30_spill] sm:$0xff] %v4274_v30  ;;  %v561_v30 = vadd.f32 %v545_v18, %v512_v16  ;;  %v568_v16 = vadd.f32 %v552_v40, %v519_v0  ;;  %v4321_v18 = vld [vmem:[#allocation2 + $0x6b] sm:$0xff]  ;;  %v4333_v0 = vld [vmem:[#allocation2 + $0xb3] sm:$0xff] }
  0x60   : > { %6037 = vst [vmem:[#allocation31_spill] sm:$0xff] %v4276_v31  ;;  %v4306_v31 = vld [vmem:[#allocation2 + $0x23] sm:$0xff] }
  0x61   : > { %6038 = vst [vmem:[#allocation32_spill] sm:$0xff] %v4278_v32  ;;  %v564_v32 = vadd.f32 %v548_v21, %v515_v22  ;;  %v572_v22 = vadd.f32 %v556_v50, %v523_v6  ;;  %v4327_v21 = vld [vmem:[#allocation2 + $0x93] sm:$0xff] }
  0x62   : > { %6039 = vst [vmem:[#allocation33_spill] sm:$0xff] %v4280_v33  ;;  %v562_v33 = vadd.f32 %v546_v19, %v513_v23  ;;  %v570_v23 = vadd.f32 %v554_v42, %v521_v4  ;;  %v4323_v19 = vld [vmem:[#allocation2 + $0x7b] sm:$0xff] }
  0x63   : > { %6040 = vst [vmem:[#allocation34_spill] sm:$0xff] %v4282_v34  ;;  %v3913_v34 = vld [vmem:[%s5767_s1 + $0x3] ss:$0 sm:$0xff] }
  0x64   : > { %6041 = vst [vmem:[#allocation35_spill] sm:$0xff] %v4284_v11  ;;  %v563_v11 = vadd.f32 %v547_v20, %v514_v25  ;;  %v571_v25 = vadd.f32 %v555_v43, %v522_v5  ;;  %v4325_v20 = vld [vmem:[#allocation2 + $0x83] sm:$0xff]  ;;  %v591_v28 = vmul.f32 %v3913_v34, %v574_v3  ;;  %v593_v38 = vmul.f32 %v3913_v34, %v4304_v9 }
  0x65   : > { %6042 = vst [vmem:[#allocation36_spill] sm:$0xff] %v4286_v12  ;;  %v565_v12 = vadd.f32 %v549_v37, %v516_v26  ;;  %v573_v26 = vadd.f32 %v557_v59, %v524_v7  ;;  %v592_v37 = vmul.f32 %v3913_v34, %v575_v61  ;;  %v594_v4 = vmul.f32 %v3913_v34, %v4306_v31 }
  0x66   : > { %6043 = vst [vmem:[#allocation37_spill] sm:$0xff] %v4288_v13  ;;  %v595_v5 = vmul.f32 %v3913_v34, %v4311_v27  ;;  %v596_v6 = vmul.f32 %v3913_v34, %v4313_v24  ;;  %v597_v7 = vmul.f32 %v3913_v34, %v4315_v60  ;;  %v598_v39 = vmul.f32 %v3913_v34, %v4317_v35  ;;  %v4356_v13 = vld [vmem:[#allocation2 + $0x34] sm:$0xff] }
  0x67   : > { %6044 = vst [vmem:[#allocation38_spill] sm:$0xff] %v4304_v9  ;;  %v599_v40 = vmul.f32 %v3913_v34, %v4319_v36  ;;  %v600_v41 = vmul.f32 %v3913_v34, %v4321_v18  ;;  %v601_v42 = vmul.f32 %v3913_v34, %v4323_v19  ;;  %v602_v3 = vmul.f32 %v3913_v34, %v4325_v20  ;;  %v4349_v9 = vld [vmem:[#allocation2 + $0x1c] sm:$0xff] }
  0x68   : > { %6045 = vst [vmem:[#allocation39_spill] sm:$0xff] %v4306_v31  ;;  %v603_v61 = vmul.f32 %v3913_v34, %v4327_v21  ;;  %v604_v43 = vmul.f32 %v3913_v34, %v4329_v62  ;;  %v605_v50 = vmul.f32 %v3913_v34, %v4331_v63  ;;  %v606_v59 = vmul.f32 %v3913_v34, %v4333_v0  ;;  %v4358_v34 = vld [vmem:[#allocation2 + $0x3c] sm:$0xff] }
  0x69   : > { %6046 = vst [vmem:[#allocation40_spill] sm:$0xff] %v4311_v27  ;;  %v607_v27 = vadd.f32 %v591_v28, %v558_v8  ;;  %v609_v31 = vadd.f32 %v593_v38, %v560_v17  ;;  %v4360_v8 = vld [vmem:[#allocation2 + $0x4c] sm:$0xff]  ;;  %v615_v17 = vadd.f32 %v599_v40, %v566_v10  ;;  %v618_v28 = vadd.f32 %v602_v3, %v569_v14  ;;  %v4364_v38 = vld [vmem:[#allocation2 + $0x64] sm:$0xff]  ;;  %v4374_v10 = vld [vmem:[#allocation2 + $0x9c] sm:$0xff] }
  0x6a   : > { %6047 = vst [vmem:[#allocation41_spill] sm:$0xff] %v4313_v24  ;;  %v623_v24 = vld [vmem:[#allocation2 + $0x4] sm:$0xff] }
  0x6b   : > { %6048 = vst [vmem:[#allocation42_spill] sm:$0xff] %v4315_v60  ;;  %v624_v60 = vld [vmem:[#allocation2 + $0xc] sm:$0xff] }
  0x6c   : > { %6049 = vst [vmem:[#allocation43_spill] sm:$0xff] %v4317_v35  ;;  %v608_v35 = vadd.f32 %v592_v37, %v559_v29  ;;  %v616_v29 = vadd.f32 %v600_v41, %v567_v15  ;;  %v4362_v37 = vld [vmem:[#allocation2 + $0x54] sm:$0xff]  ;;  %v4376_v15 = vld [vmem:[#allocation2 + $0xac] sm:$0xff] }
  0x6d   : > { %6050 = vst [vmem:[#allocation44_spill] sm:$0xff] %v4319_v36  ;;  %v610_v36 = vadd.f32 %v594_v4, %v561_v30  ;;  %v617_v30 = vadd.f32 %v601_v42, %v568_v16  ;;  %v4366_v4 = vld [vmem:[#allocation2 + $0x6c] sm:$0xff]  ;;  %v4378_v16 = vld [vmem:[#allocation2 + $0xb4] sm:$0xff] }
  0x6e   : > { %6051 = vst [vmem:[#allocation45_spill] sm:$0xff] %v4321_v18  ;;  %v4351_v18 = vld [vmem:[#allocation2 + $0x24] sm:$0xff] }
  0x6f   : > { %6052 = vst [vmem:[#allocation46_spill] sm:$0xff] %v4323_v19  ;;  %v613_v19 = vadd.f32 %v597_v7, %v564_v32  ;;  %v621_v32 = vadd.f32 %v605_v50, %v572_v22  ;;  %v4372_v7 = vld [vmem:[#allocation2 + $0x94] sm:$0xff] }
  0x70   : > { %6053 = vst [vmem:[#allocation47_spill] sm:$0xff] %v4325_v20  ;;  %v611_v20 = vadd.f32 %v595_v5, %v562_v33  ;;  %v619_v33 = vadd.f32 %v603_v61, %v570_v23  ;;  %v4368_v5 = vld [vmem:[#allocation2 + $0x7c] sm:$0xff] }
  0x71   : > { %6054 = vst [vmem:[#allocation48_spill] sm:$0xff] %v4327_v21  ;;  %v3914_v21 = vld [vmem:[%s5767_s1 + $0x4] ss:$0 sm:$0xff] }
  0x72   : > { %6055 = vst [vmem:[#allocation49_spill] sm:$0xff] %v4329_v62  ;;  %v612_v62 = vadd.f32 %v596_v6, %v563_v11  ;;  %v620_v11 = vadd.f32 %v604_v43, %v571_v25  ;;  %v4370_v6 = vld [vmem:[#allocation2 + $0x84] sm:$0xff]  ;;  %v640_v14 = vmul.f32 %v3914_v21, %v623_v24  ;;  %v642_v40 = vmul.f32 %v3914_v21, %v4349_v9 }
  0x73   : > { %6056 = vst [vmem:[#allocation50_spill] sm:$0xff] %v4331_v63  ;;  %v614_v63 = vadd.f32 %v598_v39, %v565_v12  ;;  %v622_v12 = vadd.f32 %v606_v59, %v573_v26  ;;  %v641_v39 = vmul.f32 %v3914_v21, %v624_v60  ;;  %v643_v23 = vmul.f32 %v3914_v21, %v4351_v18 }
  0x74   : > { %6057 = vst [vmem:[#allocation51_spill] sm:$0xff] %v4333_v0  ;;  %v644_v25 = vmul.f32 %v3914_v21, %v4356_v13  ;;  %v645_v22 = vmul.f32 %v3914_v21, %v4358_v34  ;;  %v646_v26 = vmul.f32 %v3914_v21, %v4360_v8  ;;  %v647_v41 = vmul.f32 %v3914_v21, %v4362_v37  ;;  %v4401_v0 = vld [vmem:[#allocation2 + $0x35] sm:$0xff] }
  0x75   : > { %6058 = vst [vmem:[#allocation52_spill] sm:$0xff] %v4349_v9  ;;  %v648_v42 = vmul.f32 %v3914_v21, %v4364_v38  ;;  %v649_v3 = vmul.f32 %v3914_v21, %v4366_v4  ;;  %v650_v61 = vmul.f32 %v3914_v21, %v4368_v5  ;;  %v651_v24 = vmul.f32 %v3914_v21, %v4370_v6  ;;  %v4394_v9 = vld [vmem:[#allocation2 + $0x1d] sm:$0xff] }
  0x76   : > { %6059 = vst [vmem:[#allocation53_spill] sm:$0xff] %v4351_v18  ;;  %v652_v60 = vmul.f32 %v3914_v21, %v4372_v7  ;;  %v653_v43 = vmul.f32 %v3914_v21, %v4374_v10  ;;  %v654_v50 = vmul.f32 %v3914_v21, %v4376_v15  ;;  %v655_v59 = vmul.f32 %v3914_v21, %v4378_v16  ;;  %v4403_v21 = vld [vmem:[#allocation2 + $0x3d] sm:$0xff] }
  0x77   : > { %6060 = vst [vmem:[#allocation54_spill] sm:$0xff] %v4356_v13  ;;  %v656_v13 = vadd.f32 %v640_v14, %v607_v27  ;;  %v658_v18 = vadd.f32 %v642_v40, %v609_v31  ;;  %v4405_v27 = vld [vmem:[#allocation2 + $0x4d] sm:$0xff]  ;;  %v664_v31 = vadd.f32 %v648_v42, %v615_v17  ;;  %v667_v14 = vadd.f32 %v651_v24, %v618_v28  ;;  %v4409_v40 = vld [vmem:[#allocation2 + $0x65] sm:$0xff]  ;;  %v4419_v17 = vld [vmem:[#allocation2 + $0x9d] sm:$0xff] }
  0x78   : > { %6061 = vst [vmem:[#allocation55_spill] sm:$0xff] %v4358_v34  ;;  %v672_v34 = vld [vmem:[#allocation2 + $0x5] sm:$0xff] }
  0x79   : > { %6062 = vst [vmem:[#allocation56_spill] sm:$0xff] %v4360_v8  ;;  %v673_v8 = vld [vmem:[#allocation2 + $0xd] sm:$0xff] }
  0x7a   : > { %6063 = vst [vmem:[#allocation57_spill] sm:$0xff] %v4362_v37  ;;  %v657_v37 = vadd.f32 %v641_v39, %v608_v35  ;;  %v665_v35 = vadd.f32 %v649_v3, %v616_v29  ;;  %v4407_v39 = vld [vmem:[#allocation2 + $0x55] sm:$0xff]  ;;  %v4421_v29 = vld [vmem:[#allocation2 + $0xad] sm:$0xff] }
  0x7b   : > { %6064 = vst [vmem:[#allocation58_spill] sm:$0xff] %v4364_v38  ;;  %v659_v38 = vadd.f32 %v643_v23, %v610_v36  ;;  %v666_v36 = vadd.f32 %v650_v61, %v617_v30  ;;  %v4411_v23 = vld [vmem:[#allocation2 + $0x6d] sm:$0xff]  ;;  %v4423_v30 = vld [vmem:[#allocation2 + $0xb5] sm:$0xff] }
  0x7c   : > { %6065 = vst [vmem:[#allocation59_spill] sm:$0xff] %v4366_v4  ;;  %v4396_v4 = vld [vmem:[#allocation2 + $0x25] sm:$0xff] }
  0x7d   : > { %6066 = vst [vmem:[#allocation60_spill] sm:$0xff] %v4368_v5  ;;  %v662_v5 = vadd.f32 %v646_v26, %v613_v19  ;;  %v670_v19 = vadd.f32 %v654_v50, %v621_v32  ;;  %v4417_v26 = vld [vmem:[#allocation2 + $0x95] sm:$0xff] }
  0x7e   : > { %6067 = vst [vmem:[#allocation61_spill] sm:$0xff] %v4370_v6  ;;  %v660_v6 = vadd.f32 %v644_v25, %v611_v20  ;;  %v668_v20 = vadd.f32 %v652_v60, %v619_v33  ;;  %v4413_v25 = vld [vmem:[#allocation2 + $0x7d] sm:$0xff] }
  0x7f   : > { %6068 = vst [vmem:[#allocation62_spill] sm:$0xff] %v4372_v7  ;;  %v3915_v7 = vld [vmem:[%s5767_s1 + $0x5] ss:$0 sm:$0xff] }
  0x80   : > { %6069 = vst [vmem:[#allocation63_spill] sm:$0xff] %v4374_v10  ;;  %v661_v10 = vadd.f32 %v645_v22, %v612_v62  ;;  %v669_v62 = vadd.f32 %v653_v43, %v620_v11  ;;  %v4415_v22 = vld [vmem:[#allocation2 + $0x85] sm:$0xff]  ;;  %v689_v28 = vmul.f32 %v3915_v7, %v672_v34  ;;  %v691_v42 = vmul.f32 %v3915_v7, %v4394_v9 }
  0x81   : > { %6070 = vst [vmem:[#allocation64_spill] sm:$0xff] %v4376_v15  ;;  %v663_v15 = vadd.f32 %v647_v41, %v614_v63  ;;  %v671_v63 = vadd.f32 %v655_v59, %v622_v12  ;;  %v690_v41 = vmul.f32 %v3915_v7, %v673_v8  ;;  %v692_v33 = vmul.f32 %v3915_v7, %v4396_v4 }
  0x82   : > { %6071 = vst [vmem:[#allocation65_spill] sm:$0xff] %v4378_v16  ;;  %v693_v11 = vmul.f32 %v3915_v7, %v4401_v0  ;;  %v694_v32 = vmul.f32 %v3915_v7, %v4403_v21  ;;  %v695_v12 = vmul.f32 %v3915_v7, %v4405_v27  ;;  %v696_v3 = vmul.f32 %v3915_v7, %v4407_v39  ;;  %v4446_v16 = vld [vmem:[#allocation2 + $0x36] sm:$0xff] }
  0x83   : > { %6072 = vst [vmem:[#allocation66_spill] sm:$0xff] %v4394_v9  ;;  %v697_v61 = vmul.f32 %v3915_v7, %v4409_v40  ;;  %v698_v24 = vmul.f32 %v3915_v7, %v4411_v23  ;;  %v699_v60 = vmul.f32 %v3915_v7, %v4413_v25  ;;  %v700_v34 = vmul.f32 %v3915_v7, %v4415_v22  ;;  %v4439_v9 = vld [vmem:[#allocation2 + $0x1e] sm:$0xff] }
  0x84   : > { %6073 = vst [vmem:[#allocation67_spill] sm:$0xff] %v4396_v4  ;;  %v701_v8 = vmul.f32 %v3915_v7, %v4417_v26  ;;  %v702_v43 = vmul.f32 %v3915_v7, %v4419_v17  ;;  %v703_v50 = vmul.f32 %v3915_v7, %v4421_v29  ;;  %v704_v59 = vmul.f32 %v3915_v7, %v4423_v30  ;;  %v4448_v7 = vld [vmem:[#allocation2 + $0x3e] sm:$0xff] }
  0x85   : > { %6074 = vst [vmem:[#allocation68_spill] sm:$0xff] %v4401_v0  ;;  %v705_v0 = vadd.f32 %v689_v28, %v656_v13  ;;  %v707_v4 = vadd.f32 %v691_v42, %v658_v18  ;;  %v4450_v13 = vld [vmem:[#allocation2 + $0x4e] sm:$0xff]  ;;  %v713_v18 = vadd.f32 %v697_v61, %v664_v31  ;;  %v716_v28 = vadd.f32 %v700_v34, %v667_v14  ;;  %v4454_v42 = vld [vmem:[#allocation2 + $0x66] sm:$0xff]  ;;  %v4464_v31 = vld [vmem:[#allocation2 + $0x9e] sm:$0xff] }
  0x86   : > { %6075 = vst [vmem:[#allocation69_spill] sm:$0xff] %v4403_v21  ;;  %v721_v21 = vld [vmem:[#allocation2 + $0x6] sm:$0xff] }
  0x87   : > { %6076 = vst [vmem:[#allocation70_spill] sm:$0xff] %v4405_v27  ;;  %v722_v27 = vld [vmem:[#allocation2 + $0xe] sm:$0xff] }
  0x88   : > { %6077 = vst [vmem:[#allocation71_spill] sm:$0xff] %v4407_v39  ;;  %v706_v39 = vadd.f32 %v690_v41, %v657_v37  ;;  %v714_v37 = vadd.f32 %v698_v24, %v665_v35  ;;  %v4452_v41 = vld [vmem:[#allocation2 + $0x56] sm:$0xff]  ;;  %v4466_v35 = vld [vmem:[#allocation2 + $0xae] sm:$0xff] }
  0x89   : > { %6078 = vst [vmem:[#allocation72_spill] sm:$0xff] %v4409_v40  ;;  %v708_v40 = vadd.f32 %v692_v33, %v659_v38  ;;  %v715_v38 = vadd.f32 %v699_v60, %v666_v36  ;;  %v4456_v33 = vld [vmem:[#allocation2 + $0x6e] sm:$0xff]  ;;  %v4468_v36 = vld [vmem:[#allocation2 + $0xb6] sm:$0xff] }
  0x8a   : > { %6079 = vst [vmem:[#allocation73_spill] sm:$0xff] %v4411_v23  ;;  %v4441_v23 = vld [vmem:[#allocation2 + $0x26] sm:$0xff] }
  0x8b   : > { %6080 = vst [vmem:[#allocation74_spill] sm:$0xff] %v4413_v25  ;;  %v711_v25 = vadd.f32 %v695_v12, %v662_v5  ;;  %v719_v5 = vadd.f32 %v703_v50, %v670_v19  ;;  %v4462_v12 = vld [vmem:[#allocation2 + $0x96] sm:$0xff] }
  0x8c   : > { %6081 = vst [vmem:[#allocation75_spill] sm:$0xff] %v4415_v22  ;;  %v709_v22 = vadd.f32 %v693_v11, %v660_v6  ;;  %v717_v6 = vadd.f32 %v701_v8, %v668_v20  ;;  %v4458_v11 = vld [vmem:[#allocation2 + $0x7e] sm:$0xff] }
  0x8d   : > { %6082 = vst [vmem:[#allocation76_spill] sm:$0xff] %v4417_v26  ;;  %v3916_v26 = vld [vmem:[%s5767_s1 + $0x6] ss:$0 sm:$0xff] }
  0x8e   : > { %6083 = vst [vmem:[#allocation77_spill] sm:$0xff] %v4419_v17  ;;  %v710_v17 = vadd.f32 %v694_v32, %v661_v10  ;;  %v718_v10 = vadd.f32 %v702_v43, %v669_v62  ;;  %v4460_v32 = vld [vmem:[#allocation2 + $0x86] sm:$0xff]  ;;  %v738_v14 = vmul.f32 %v3916_v26, %v721_v21  ;;  %v740_v61 = vmul.f32 %v3916_v26, %v4439_v9 }
  0x8f   : > { %6084 = vst [vmem:[#allocation78_spill] sm:$0xff] %v4421_v29  ;;  %v712_v29 = vadd.f32 %v696_v3, %v663_v15  ;;  %v720_v15 = vadd.f32 %v704_v59, %v671_v63  ;;  %v739_v3 = vmul.f32 %v3916_v26, %v722_v27  ;;  %v741_v20 = vmul.f32 %v3916_v26, %v4441_v23 }
  0x90   : > { %6085 = vst [vmem:[#allocation79_spill] sm:$0xff] %v4423_v30  ;;  %v742_v62 = vmul.f32 %v3916_v26, %v4446_v16  ;;  %v743_v19 = vmul.f32 %v3916_v26, %v4448_v7  ;;  %v744_v63 = vmul.f32 %v3916_v26, %v4450_v13  ;;  %v745_v24 = vmul.f32 %v3916_v26, %v4452_v41 }
  0x91   : > { %6086 = vst [vmem:[#allocation80_spill] sm:$0xff] %v4439_v9  ;;  %v746_v60 = vmul.f32 %v3916_v26, %v4454_v42  ;;  %v747_v34 = vmul.f32 %v3916_v26, %v4456_v33  ;;  %v748_v8 = vmul.f32 %v3916_v26, %v4458_v11  ;;  %v749_v21 = vmul.f32 %v3916_v26, %v4460_v32 }
  0x92   : > { %6087 = vst [vmem:[#allocation81_spill] sm:$0xff] %v4441_v23  ;;  %v750_v27 = vmul.f32 %v3916_v26, %v4462_v12  ;;  %v751_v43 = vmul.f32 %v3916_v26, %v4464_v31  ;;  %v752_v50 = vmul.f32 %v3916_v26, %v4466_v35  ;;  %v753_v59 = vmul.f32 %v3916_v26, %v4468_v36 }
  0x93   : > { %6088 = vst [vmem:[#allocation82_spill] sm:$0xff] %v4446_v16  ;;  %v756_v16 = vadd.f32 %v740_v61, %v707_v4  ;;  %v760_v23 = vadd.f32 %v744_v63, %v711_v25  ;;  %v762_v9 = vadd.f32 %v746_v60, %v713_v18  ;;  %v764_v30 = vadd.f32 %v748_v8, %v715_v38  ;;  %v4489_v4 = vld [vmem:[#allocation2 + $0xc8] sm:$0xff] }
  0x94   : > { %6089 = vst [vmem:[#allocation83_spill] sm:$0xff] %v4448_v7  ;;  %v754_v7 = vadd.f32 %v738_v14, %v705_v0  ;;  %v766_v2 = vadd.f32 %v750_v27, %v717_v6  ;;  %v768_v1 = vadd.f32 %v752_v50, %v719_v5  ;;  %v769_v26 = vadd.f32 %v753_v59, %v720_v15  ;;  %v4487_v0 = vld [vmem:[#allocation2 + $0xc0] sm:$0xff] }
  0x95   : > { %6090 = vst [vmem:[#allocation84_spill] sm:$0xff] %v4450_v13  ;;  %v755_v13 = vadd.f32 %v739_v3, %v706_v39  ;;  %v6111_v59 = vld [vmem:[#allocation22_spill] sm:$0xff] }
  0x96   : > { %6091 = vst [vmem:[#allocation85_spill] sm:$0xff] %v4452_v41  ;;  %v757_v41 = vadd.f32 %v741_v20, %v708_v40 }
  0x97   : > { %6092 = vst [vmem:[#allocation86_spill] sm:$0xff] %v4454_v42  ;;  %v758_v42 = vadd.f32 %v742_v62, %v709_v22  ;;  %v6100_v62 = vld [vmem:[#allocation11_spill] sm:$0xff] }
  0x98   : > { %6093 = vst [vmem:[#allocation87_spill] sm:$0xff] %v4456_v33  ;;  %v3917_v33 = vld [vmem:[%s5767_s1 + $0x8] ss:$0 sm:$0xff] }
  0x99   : > { %6094 = vst [vmem:[#allocation88_spill] sm:$0xff] %v4458_v11  ;;  %v759_v11 = vadd.f32 %v743_v19, %v710_v17  ;;  %v789_v39 = vmul.f32 %v3917_v33, %v4169_v44  ;;  %v790_v40 = vmul.f32 %v3917_v33, %v4171_v45  ;;  %v791_v22 = vmul.f32 %v3917_v33, %v4173_v46 }
  0x9a   : > { %6095 = vst [vmem:[#allocation89_spill] sm:$0xff] %v4460_v32  ;;  %v761_v32 = vadd.f32 %v745_v24, %v712_v29  ;;  %v792_v25 = vmul.f32 %v3917_v33, %v4175_v47  ;;  %v793_v17 = vmul.f32 %v3917_v33, %v4177_v48  ;;  %v794_v29 = vmul.f32 %v3917_v33, %v4179_v49  ;;  %v6107_v24 = vld [vmem:[#allocation18_spill] sm:$0xff] }
  0x9b   : > { %6096 = vst [vmem:[#allocation90_spill] sm:$0xff] %v4462_v12  ;;  %v763_v12 = vadd.f32 %v747_v34, %v714_v37  ;;  %v795_v18 = vmul.f32 %v3917_v33, %v4184_v51  ;;  %v796_v37 = vmul.f32 %v3917_v33, %v4186_v52  ;;  %v797_v38 = vmul.f32 %v3917_v33, %v4188_v53  ;;  %v3918_v53 = vld [vmem:[%s5767_s1 + $0x9] ss:$0 sm:$0xff] }
  0x9c   : > { %6097 = vst [vmem:[#allocation91_spill] sm:$0xff] %v4464_v31  ;;  %v765_v31 = vadd.f32 %v749_v21, %v716_v28  ;;  %v798_v28 = vmul.f32 %v3917_v33, %v4190_v54  ;;  %v799_v44 = vmul.f32 %v3917_v33, %v4192_v55  ;;  %v800_v45 = vmul.f32 %v3917_v33, %v4194_v56  ;;  %v6108_v34 = vld [vmem:[#allocation19_spill] sm:$0xff]  ;;  %v6109_v21 = vld [vmem:[#allocation20_spill] sm:$0xff] }
  0x9d   : > { %6098 = vst [vmem:[#allocation92_spill] sm:$0xff] %v4466_v35  ;;  %v767_v35 = vadd.f32 %v751_v43, %v718_v10  ;;  %v801_v46 = vmul.f32 %v3917_v33, %v4196_v57  ;;  %v802_v47 = vmul.f32 %v3917_v33, %v4198_v58  ;;  %v803_v48 = vmul.f32 %v3917_v33, %v4487_v0  ;;  %v6110_v43 = vld [vmem:[#allocation21_spill] sm:$0xff] }
  0x9e   : > { %v804_v49 = vmul.f32 %v3917_v33, %v4489_v4  ;;  %v805_v6 = vadd.f32 %v789_v39, %v754_v7  ;;  %v806_v51 = vadd.f32 %v790_v40, %v755_v13  ;;  %v807_v10 = vadd.f32 %v791_v22, %v756_v16  ;;  %v4510_v7 = vld [vmem:[#allocation2 + $0xc1] sm:$0xff]  ;;  %v4512_v16 = vld [vmem:[#allocation2 + $0xc9] sm:$0xff] }
  0x9f   : > { %v808_v52 = vadd.f32 %v792_v25, %v757_v41  ;;  %v809_v54 = vadd.f32 %v793_v17, %v758_v42  ;;  %v810_v55 = vadd.f32 %v794_v29, %v759_v11  ;;  %v811_v5 = vadd.f32 %v795_v18, %v760_v23  ;;  %v6099_v13 = vld [vmem:[#allocation10_spill] sm:$0xff]  ;;  %v6101_v42 = vld [vmem:[#allocation12_spill] sm:$0xff]  ;;  %v6102_v23 = vld [vmem:[#allocation13_spill] sm:$0xff] }
  0xa0   : > { %v812_v56 = vadd.f32 %v796_v37, %v761_v32  ;;  %v813_v15 = vadd.f32 %v797_v38, %v762_v9  ;;  %v814_v57 = vadd.f32 %v798_v28, %v763_v12  ;;  %v815_v14 = vadd.f32 %v799_v44, %v764_v30  ;;  %v6103_v9 = vld [vmem:[#allocation14_spill] sm:$0xff]  ;;  %v6104_v30 = vld [vmem:[#allocation15_spill] sm:$0xff] }
  0xa1   : > { %v816_v58 = vadd.f32 %v800_v45, %v765_v31  ;;  %v817_v3 = vadd.f32 %v801_v46, %v766_v2  ;;  %v818_v61 = vadd.f32 %v802_v47, %v767_v35  ;;  %v819_v20 = vadd.f32 %v803_v48, %v768_v1  ;;  %v6105_v2 = vld [vmem:[#allocation16_spill] sm:$0xff]  ;;  %v6106_v1 = vld [vmem:[#allocation17_spill] sm:$0xff]  ;;  %v6112_v39 = vld [vmem:[#allocation23_spill] sm:$0xff] }
  0xa2   : > { %v820_v33 = vadd.f32 %v804_v49, %v769_v26  ;;  %v838_v41 = vmul.f32 %v3918_v53, %v6099_v13  ;;  %v839_v19 = vmul.f32 %v3918_v53, %v6100_v62  ;;  %v840_v11 = vmul.f32 %v3918_v53, %v6101_v42  ;;  %v3919_v38 = vld [vmem:[%s5767_s1 + $0xa] ss:$0 sm:$0xff] }
  0xa3   : > { %v841_v32 = vmul.f32 %v3918_v53, %v6102_v23  ;;  %v842_v12 = vmul.f32 %v3918_v53, %v6103_v9  ;;  %v843_v31 = vmul.f32 %v3918_v53, %v6104_v30  ;;  %v844_v35 = vmul.f32 %v3918_v53, %v6105_v2  ;;  %v6122_v9 = vld [vmem:[#allocation33_spill] sm:$0xff]  ;;  %v6123_v30 = vld [vmem:[#allocation34_spill] sm:$0xff]  ;;  %v6124_v2 = vld [vmem:[#allocation35_spill] sm:$0xff] }
  0xa4   : > { %v845_v63 = vmul.f32 %v3918_v53, %v6106_v1  ;;  %v846_v60 = vmul.f32 %v3918_v53, %v6107_v24  ;;  %v847_v8 = vmul.f32 %v3918_v53, %v6108_v34  ;;  %v848_v27 = vmul.f32 %v3918_v53, %v6109_v21  ;;  %v6125_v1 = vld [vmem:[#allocation36_spill] sm:$0xff]  ;;  %v6126_v24 = vld [vmem:[#allocation37_spill] sm:$0xff] }
  0xa5   : > { %v849_v50 = vmul.f32 %v3918_v53, %v6110_v43  ;;  %v850_v26 = vmul.f32 %v3918_v53, %v6111_v59  ;;  %v851_v40 = vmul.f32 %v3918_v53, %v6112_v39  ;;  %v852_v22 = vmul.f32 %v3918_v53, %v4510_v7  ;;  %v3920_v59 = vld [vmem:[%s5767_s1 + $0xb] ss:$0 sm:$0xff] }
  0xa6   : > { %v853_v25 = vmul.f32 %v3918_v53, %v4512_v16  ;;  %v854_v17 = vadd.f32 %v838_v41, %v805_v6  ;;  %v855_v29 = vadd.f32 %v839_v19, %v806_v51  ;;  %v856_v18 = vadd.f32 %v840_v11, %v807_v10  ;;  %v4533_v6 = vld [vmem:[#allocation2 + $0xc2] sm:$0xff]  ;;  %v4535_v51 = vld [vmem:[#allocation2 + $0xca] sm:$0xff]  ;;  %v6114_v41 = vld [vmem:[#allocation25_spill] sm:$0xff] }
  0xa7   : > { %v857_v37 = vadd.f32 %v841_v32, %v808_v52  ;;  %v858_v28 = vadd.f32 %v842_v12, %v809_v54  ;;  %v859_v44 = vadd.f32 %v843_v31, %v810_v55  ;;  %v860_v45 = vadd.f32 %v844_v35, %v811_v5  ;;  %v6113_v10 = vld [vmem:[#allocation24_spill] sm:$0xff]  ;;  %v6115_v54 = vld [vmem:[#allocation26_spill] sm:$0xff]  ;;  %v6116_v5 = vld [vmem:[#allocation27_spill] sm:$0xff] }
  0xa8   : > { %v861_v46 = vadd.f32 %v845_v63, %v812_v56  ;;  %v862_v47 = vadd.f32 %v846_v60, %v813_v15  ;;  %v863_v48 = vadd.f32 %v847_v8, %v814_v57  ;;  %v864_v49 = vadd.f32 %v848_v27, %v815_v14  ;;  %v6117_v15 = vld [vmem:[#allocation28_spill] sm:$0xff]  ;;  %v6118_v14 = vld [vmem:[#allocation29_spill] sm:$0xff] }
  0xa9   : > { %v865_v13 = vadd.f32 %v849_v50, %v816_v58  ;;  %v866_v62 = vadd.f32 %v850_v26, %v817_v3  ;;  %v867_v42 = vadd.f32 %v851_v40, %v818_v61  ;;  %v868_v23 = vadd.f32 %v852_v22, %v819_v20  ;;  %v6119_v3 = vld [vmem:[#allocation30_spill] sm:$0xff]  ;;  %v6120_v20 = vld [vmem:[#allocation31_spill] sm:$0xff]  ;;  %v6121_v11 = vld [vmem:[#allocation32_spill] sm:$0xff] }
  0xaa   : > { %v869_v53 = vadd.f32 %v853_v25, %v820_v33  ;;  %v887_v52 = vmul.f32 %v3919_v38, %v6113_v10  ;;  %v888_v19 = vmul.f32 %v3919_v38, %v6114_v41  ;;  %v889_v55 = vmul.f32 %v3919_v38, %v6115_v54 }
  0xab   : > { %v890_v56 = vmul.f32 %v3919_v38, %v6116_v5  ;;  %v891_v57 = vmul.f32 %v3919_v38, %v6117_v15  ;;  %v892_v58 = vmul.f32 %v3919_v38, %v6118_v14  ;;  %v893_v61 = vmul.f32 %v3919_v38, %v6119_v3  ;;  %v6137_v3 = vld [vmem:[#allocation48_spill] sm:$0xff] }
  0xac   : > { %v894_v33 = vmul.f32 %v3919_v38, %v6120_v20  ;;  %v895_v32 = vmul.f32 %v3919_v38, %v6121_v11  ;;  %v896_v12 = vmul.f32 %v3919_v38, %v6122_v9  ;;  %v897_v31 = vmul.f32 %v3919_v38, %v6123_v30  ;;  %v6138_v20 = vld [vmem:[#allocation49_spill] sm:$0xff]  ;;  %v6139_v11 = vld [vmem:[#allocation50_spill] sm:$0xff]  ;;  %v6140_v9 = vld [vmem:[#allocation51_spill] sm:$0xff] }
  0xad   : > { %v898_v35 = vmul.f32 %v3919_v38, %v6124_v2  ;;  %v899_v63 = vmul.f32 %v3919_v38, %v6125_v1  ;;  %v900_v60 = vmul.f32 %v3919_v38, %v6126_v24  ;;  %v901_v34 = vmul.f32 %v3919_v38, %v4533_v6  ;;  %v3921_v24 = vld [vmem:[%s5767_s1 + $0xc] ss:$0 sm:$0xff] }
  0xae   : > { %v902_v8 = vmul.f32 %v3919_v38, %v4535_v51  ;;  %v903_v21 = vadd.f32 %v887_v52, %v854_v17  ;;  %v904_v27 = vadd.f32 %v888_v19, %v855_v29  ;;  %v905_v43 = vadd.f32 %v889_v55, %v856_v18  ;;  %v4556_v17 = vld [vmem:[#allocation2 + $0xc3] sm:$0xff]  ;;  %v4558_v29 = vld [vmem:[#allocation2 + $0xcb] sm:$0xff] }
  0xaf   : > { %v906_v50 = vadd.f32 %v890_v56, %v857_v37  ;;  %v907_v26 = vadd.f32 %v891_v57, %v858_v28  ;;  %v908_v39 = vadd.f32 %v892_v58, %v859_v44  ;;  %v909_v40 = vadd.f32 %v893_v61, %v860_v45  ;;  %v6127_v18 = vld [vmem:[#allocation38_spill] sm:$0xff]  ;;  %v6128_v52 = vld [vmem:[#allocation39_spill] sm:$0xff]  ;;  %v6129_v28 = vld [vmem:[#allocation40_spill] sm:$0xff] }
  0xb0   : > { %v910_v22 = vadd.f32 %v894_v33, %v861_v46  ;;  %v911_v25 = vadd.f32 %v895_v32, %v862_v47  ;;  %v912_v10 = vadd.f32 %v896_v12, %v863_v48  ;;  %v913_v41 = vadd.f32 %v897_v31, %v864_v49  ;;  %v6130_v45 = vld [vmem:[#allocation41_spill] sm:$0xff]  ;;  %v6131_v47 = vld [vmem:[#allocation42_spill] sm:$0xff]  ;;  %v6132_v49 = vld [vmem:[#allocation43_spill] sm:$0xff] }
  0xb1   : > { %v914_v54 = vadd.f32 %v898_v35, %v865_v13  ;;  %v915_v5 = vadd.f32 %v899_v63, %v866_v62  ;;  %v916_v15 = vadd.f32 %v900_v60, %v867_v42  ;;  %v917_v14 = vadd.f32 %v901_v34, %v868_v23  ;;  %v6133_v62 = vld [vmem:[#allocation44_spill] sm:$0xff]  ;;  %v6134_v23 = vld [vmem:[#allocation45_spill] sm:$0xff]  ;;  %v6135_v55 = vld [vmem:[#allocation46_spill] sm:$0xff] }
  0xb2   : > { %v918_v38 = vadd.f32 %v902_v8, %v869_v53  ;;  %v936_v37 = vmul.f32 %v3920_v59, %v6127_v18  ;;  %v937_v19 = vmul.f32 %v3920_v59, %v6128_v52  ;;  %v938_v44 = vmul.f32 %v3920_v59, %v6129_v28  ;;  %v6136_v57 = vld [vmem:[#allocation47_spill] sm:$0xff] }
  0xb3   : > { %v939_v46 = vmul.f32 %v3920_v59, %v6130_v45  ;;  %v940_v48 = vmul.f32 %v3920_v59, %v6131_v47  ;;  %v941_v13 = vmul.f32 %v3920_v59, %v6132_v49  ;;  %v942_v42 = vmul.f32 %v3920_v59, %v6133_v62 }
  0xb4   : > { %v943_v53 = vmul.f32 %v3920_v59, %v6134_v23  ;;  %v944_v56 = vmul.f32 %v3920_v59, %v6135_v55  ;;  %v945_v58 = vmul.f32 %v3920_v59, %v6136_v57  ;;  %v946_v61 = vmul.f32 %v3920_v59, %v6137_v3  ;;  %v6152_v55 = vld [vmem:[#allocation63_spill] sm:$0xff]  ;;  %v6153_v57 = vld [vmem:[#allocation64_spill] sm:$0xff]  ;;  %v6154_v3 = vld [vmem:[#allocation65_spill] sm:$0xff] }
  0xb5   : > { %v947_v33 = vmul.f32 %v3920_v59, %v6138_v20  ;;  %v948_v32 = vmul.f32 %v3920_v59, %v6139_v11  ;;  %v949_v12 = vmul.f32 %v3920_v59, %v6140_v9  ;;  %v950_v30 = vmul.f32 %v3920_v59, %v4556_v17 }
  0xb6   : > { %v951_v31 = vmul.f32 %v3920_v59, %v4558_v29  ;;  %v952_v2 = vadd.f32 %v936_v37, %v903_v21  ;;  %v953_v35 = vadd.f32 %v937_v19, %v904_v27  ;;  %v954_v1 = vadd.f32 %v938_v44, %v905_v43  ;;  %v4579_v21 = vld [vmem:[#allocation2 + $0xc4] sm:$0xff]  ;;  %v4581_v27 = vld [vmem:[#allocation2 + $0xcc] sm:$0xff]  ;;  %v6142_v37 = vld [vmem:[#allocation53_spill] sm:$0xff] }
  0xb7   : > { %v955_v63 = vadd.f32 %v939_v46, %v906_v50  ;;  %v956_v60 = vadd.f32 %v940_v48, %v907_v26  ;;  %v957_v34 = vadd.f32 %v941_v13, %v908_v39  ;;  %v958_v8 = vadd.f32 %v942_v42, %v909_v40  ;;  %v6141_v43 = vld [vmem:[#allocation52_spill] sm:$0xff]  ;;  %v6143_v26 = vld [vmem:[#allocation54_spill] sm:$0xff]  ;;  %v6144_v40 = vld [vmem:[#allocation55_spill] sm:$0xff] }
  0xb8   : > { %v959_v18 = vadd.f32 %v943_v53, %v910_v22  ;;  %v960_v52 = vadd.f32 %v944_v56, %v911_v25  ;;  %v961_v28 = vadd.f32 %v945_v58, %v912_v10  ;;  %v962_v45 = vadd.f32 %v946_v61, %v913_v41  ;;  %v6145_v25 = vld [vmem:[#allocation56_spill] sm:$0xff]  ;;  %v6146_v41 = vld [vmem:[#allocation57_spill] sm:$0xff]  ;;  %v6151_v42 = vld [vmem:[#allocation62_spill] sm:$0xff] }
  0xb9   : > { %v963_v47 = vadd.f32 %v947_v33, %v914_v54  ;;  %v964_v49 = vadd.f32 %v948_v32, %v915_v5  ;;  %v965_v62 = vadd.f32 %v949_v12, %v916_v15  ;;  %v966_v23 = vadd.f32 %v950_v30, %v917_v14  ;;  %v6147_v5 = vld [vmem:[#allocation58_spill] sm:$0xff]  ;;  %v6148_v14 = vld [vmem:[#allocation59_spill] sm:$0xff]  ;;  %v6149_v44 = vld [vmem:[#allocation60_spill] sm:$0xff] }
  0xba   : > { %v967_v59 = vadd.f32 %v951_v31, %v918_v38  ;;  %v985_v50 = vmul.f32 %v3921_v24, %v6141_v43  ;;  %v986_v19 = vmul.f32 %v3921_v24, %v6142_v37  ;;  %v987_v39 = vmul.f32 %v3921_v24, %v6143_v26  ;;  %v6150_v48 = vld [vmem:[#allocation61_spill] sm:$0xff]  ;;  %v3922_v30 = vld [vmem:[%s5767_s1 + $0xd] ss:$0 sm:$0xff] }
  0xbb   : > { %v988_v22 = vmul.f32 %v3921_v24, %v6144_v40  ;;  %v989_v10 = vmul.f32 %v3921_v24, %v6145_v25  ;;  %v990_v54 = vmul.f32 %v3921_v24, %v6146_v41  ;;  %v991_v15 = vmul.f32 %v3921_v24, %v6147_v5 }
  0xbc   : > { %v992_v38 = vmul.f32 %v3921_v24, %v6148_v14  ;;  %v993_v46 = vmul.f32 %v3921_v24, %v6149_v44  ;;  %v994_v13 = vmul.f32 %v3921_v24, %v6150_v48  ;;  %v995_v53 = vmul.f32 %v3921_v24, %v6151_v42  ;;  %v6167_v42 = vld [vmem:[#allocation78_spill] sm:$0xff] }
  0xbd   : > { %v996_v56 = vmul.f32 %v3921_v24, %v6152_v55  ;;  %v997_v58 = vmul.f32 %v3921_v24, %v6153_v57  ;;  %v998_v61 = vmul.f32 %v3921_v24, %v6154_v3  ;;  %v999_v20 = vmul.f32 %v3921_v24, %v4579_v21  ;;  %v6168_v55 = vld [vmem:[#allocation79_spill] sm:$0xff] }
  0xbe   : > { %v1000_v33 = vmul.f32 %v3921_v24, %v4581_v27  ;;  %v1001_v11 = vadd.f32 %v985_v50, %v952_v2  ;;  %v1002_v32 = vadd.f32 %v986_v19, %v953_v35  ;;  %v1003_v9 = vadd.f32 %v987_v39, %v954_v1  ;;  %v4602_v2 = vld [vmem:[#allocation2 + $0xc5] sm:$0xff]  ;;  %v4604_v35 = vld [vmem:[#allocation2 + $0xcd] sm:$0xff] }
  0xbf   : > { %v1004_v12 = vadd.f32 %v988_v22, %v955_v63  ;;  %v1005_v31 = vadd.f32 %v989_v10, %v956_v60  ;;  %v1006_v43 = vadd.f32 %v990_v54, %v957_v34  ;;  %v1007_v37 = vadd.f32 %v991_v15, %v958_v8  ;;  %v6155_v1 = vld [vmem:[#allocation66_spill] sm:$0xff]  ;;  %v6156_v50 = vld [vmem:[#allocation67_spill] sm:$0xff]  ;;  %v6157_v60 = vld [vmem:[#allocation68_spill] sm:$0xff] }
  0xc0   : > { %v1008_v26 = vadd.f32 %v992_v38, %v959_v18  ;;  %v1009_v40 = vadd.f32 %v993_v46, %v960_v52  ;;  %v1010_v25 = vadd.f32 %v994_v13, %v961_v28  ;;  %v1011_v41 = vadd.f32 %v995_v53, %v962_v45  ;;  %v6158_v8 = vld [vmem:[#allocation69_spill] sm:$0xff]  ;;  %v6159_v52 = vld [vmem:[#allocation70_spill] sm:$0xff]  ;;  %v6160_v45 = vld [vmem:[#allocation71_spill] sm:$0xff] }
  0xc1   : > { %v1012_v5 = vadd.f32 %v996_v56, %v963_v47  ;;  %v1013_v14 = vadd.f32 %v997_v58, %v964_v49  ;;  %v1014_v44 = vadd.f32 %v998_v61, %v965_v62  ;;  %v1015_v48 = vadd.f32 %v999_v20, %v966_v23  ;;  %v6161_v49 = vld [vmem:[#allocation72_spill] sm:$0xff]  ;;  %v6162_v23 = vld [vmem:[#allocation73_spill] sm:$0xff]  ;;  %v6163_v39 = vld [vmem:[#allocation74_spill] sm:$0xff] }
  0xc2   : > { %v1016_v24 = vadd.f32 %v1000_v33, %v967_v59  ;;  %v1034_v63 = vmul.f32 %v3922_v30, %v6155_v1  ;;  %v1035_v19 = vmul.f32 %v3922_v30, %v6156_v50  ;;  %v1036_v34 = vmul.f32 %v3922_v30, %v6157_v60  ;;  %v6164_v10 = vld [vmem:[#allocation75_spill] sm:$0xff]  ;;  %v6165_v15 = vld [vmem:[#allocation76_spill] sm:$0xff]  ;;  %v6166_v46 = vld [vmem:[#allocation77_spill] sm:$0xff] }
  0xc3   : > { %v1037_v18 = vmul.f32 %v3922_v30, %v6158_v8  ;;  %v1038_v28 = vmul.f32 %v3922_v30, %v6159_v52  ;;  %v1039_v47 = vmul.f32 %v3922_v30, %v6160_v45  ;;  %v1040_v62 = vmul.f32 %v3922_v30, %v6161_v49  ;;  %v3923_v1 = vld [vmem:[%s5767_s1 + $0xe] ss:$0 sm:$0xff] }
  0xc4   : > { %v1041_v59 = vmul.f32 %v3922_v30, %v6162_v23  ;;  %v1042_v22 = vmul.f32 %v3922_v30, %v6163_v39  ;;  %v1043_v54 = vmul.f32 %v3922_v30, %v6164_v10  ;;  %v1044_v38 = vmul.f32 %v3922_v30, %v6165_v15 }
  0xc5   : > { %v1045_v13 = vmul.f32 %v3922_v30, %v6166_v46  ;;  %v1046_v53 = vmul.f32 %v3922_v30, %v6167_v42  ;;  %v1047_v56 = vmul.f32 %v3922_v30, %v6168_v55  ;;  %v1048_v57 = vmul.f32 %v3922_v30, %v4602_v2 }
  0xc6   : > { %v1049_v58 = vmul.f32 %v3922_v30, %v4604_v35  ;;  %v1050_v3 = vadd.f32 %v1034_v63, %v1001_v11  ;;  %v1051_v61 = vadd.f32 %v1035_v19, %v1002_v32  ;;  %v1052_v20 = vadd.f32 %v1036_v34, %v1003_v9  ;;  %v4625_v11 = vld [vmem:[#allocation2 + $0xc6] sm:$0xff]  ;;  %v4627_v32 = vld [vmem:[#allocation2 + $0xce] sm:$0xff]  ;;  %v6170_v63 = vld [vmem:[#allocation81_spill] sm:$0xff] }
  0xc7   : > { %v1053_v33 = vadd.f32 %v1037_v18, %v1004_v12  ;;  %v1054_v50 = vadd.f32 %v1038_v28, %v1005_v31  ;;  %v1055_v60 = vadd.f32 %v1039_v47, %v1006_v43  ;;  %v1056_v8 = vadd.f32 %v1040_v62, %v1007_v37  ;;  %v6169_v9 = vld [vmem:[#allocation80_spill] sm:$0xff]  ;;  %v6171_v31 = vld [vmem:[#allocation82_spill] sm:$0xff]  ;;  %v6172_v37 = vld [vmem:[#allocation83_spill] sm:$0xff] }
  0xc8   : > { %v1057_v52 = vadd.f32 %v1041_v59, %v1008_v26  ;;  %v1058_v45 = vadd.f32 %v1042_v22, %v1009_v40  ;;  %v1059_v49 = vadd.f32 %v1043_v54, %v1010_v25  ;;  %v1060_v23 = vadd.f32 %v1044_v38, %v1011_v41  ;;  %v6173_v40 = vld [vmem:[#allocation84_spill] sm:$0xff]  ;;  %v6174_v41 = vld [vmem:[#allocation85_spill] sm:$0xff]  ;;  %v6179_v62 = vld [vmem:[#allocation90_spill] sm:$0xff] }
  0xc9   : > { %v1061_v39 = vadd.f32 %v1045_v13, %v1012_v5  ;;  %v1062_v10 = vadd.f32 %v1046_v53, %v1013_v14  ;;  %v1063_v15 = vadd.f32 %v1047_v56, %v1014_v44  ;;  %v1064_v46 = vadd.f32 %v1048_v57, %v1015_v48  ;;  %v6175_v14 = vld [vmem:[#allocation86_spill] sm:$0xff]  ;;  %v6176_v48 = vld [vmem:[#allocation87_spill] sm:$0xff]  ;;  %v6177_v34 = vld [vmem:[#allocation88_spill] sm:$0xff] }
  0xca   : > { %v1065_v30 = vadd.f32 %v1049_v58, %v1016_v24  ;;  %v1083_v12 = vmul.f32 %v3923_v1, %v6169_v9  ;;  %v1084_v19 = vmul.f32 %v3923_v1, %v6170_v63  ;;  %v1085_v43 = vmul.f32 %v3923_v1, %v6171_v31  ;;  %v6178_v28 = vld [vmem:[#allocation89_spill] sm:$0xff]  ;;  %v6180_v22 = vld [vmem:[#allocation91_spill] sm:$0xff]  ;;  %v6181_v38 = vld [vmem:[#allocation92_spill] sm:$0xff] }
  0xcb   : > { %v1086_v26 = vmul.f32 %v3923_v1, %v6172_v37  ;;  %v1087_v25 = vmul.f32 %v3923_v1, %v6173_v40  ;;  %v1088_v5 = vmul.f32 %v3923_v1, %v6174_v41  ;;  %v1089_v44 = vmul.f32 %v3923_v1, %v6175_v14  ;;  %v3924_v56 = vld [vmem:[%s5767_s1 + $0x10] ss:$0 sm:$0xff]  ;;  %v3284_v37 = vld [vmem:[#allocation2 + $0x38] sm:$0xff]  ;;  %v4648_v40 = vld [vmem:[#allocation2 + $0x48] sm:$0xff] }
  0xcc   : > { %v1090_v24 = vmul.f32 %v3923_v1, %v6176_v48  ;;  %v1091_v18 = vmul.f32 %v3923_v1, %v6177_v34  ;;  %v1092_v47 = vmul.f32 %v3923_v1, %v6178_v28  ;;  %v1093_v59 = vmul.f32 %v3923_v1, %v6179_v62  ;;  %v3283_v31 = vld [vmem:[#allocation2 + $0x30] sm:$0xff]  ;;  %v4652_v28 = vld [vmem:[#allocation2 + $0x60] sm:$0xff] }
  0xcd   : > { %v1094_v54 = vmul.f32 %v3923_v1, %v6180_v22  ;;  %v1095_v13 = vmul.f32 %v3923_v1, %v6181_v38  ;;  %v1096_v42 = vmul.f32 %v3923_v1, %v4468_v36  ;;  %v1097_v53 = vmul.f32 %v3923_v1, %v4625_v11  ;;  %v4650_v34 = vld [vmem:[#allocation2 + $0x50] sm:$0xff] }
  0xce   : > { %v1098_v55 = vmul.f32 %v3923_v1, %v4627_v32  ;;  %v1099_v57 = vadd.f32 %v1083_v12, %v1050_v3  ;;  %v1100_v58 = vadd.f32 %v1084_v19, %v1051_v61  ;;  %v1101_v9 = vadd.f32 %v1085_v43, %v1052_v20  ;;  %v4654_v1 = vld [vmem:[#allocation2 + $0x68] sm:$0xff]  ;;  %v4656_v20 = vld [vmem:[#allocation2 + $0x78] sm:$0xff]  ;;  %v4660_v12 = vld [vmem:[#allocation2 + $0x90] sm:$0xff] }
  0xcf   : > { %v1102_v63 = vadd.f32 %v1086_v26, %v1053_v33  ;;  %v1103_v41 = vadd.f32 %v1087_v25, %v1054_v50  ;;  %v1104_v14 = vadd.f32 %v1088_v5, %v1055_v60  ;;  %v1105_v48 = vadd.f32 %v1089_v44, %v1056_v8  ;;  %6182 = vst [vmem:[#allocation10_spill] sm:$0xff] %v4654_v1  ;;  %v4658_v33 = vld [vmem:[#allocation2 + $0x80] sm:$0xff]  ;;  %v4662_v19 = vld [vmem:[#allocation2 + $0x98] sm:$0xff]  ;;  %v4664_v43 = vld [vmem:[#allocation2 + $0xa8] sm:$0xff] }
  0xd0   : > { %v1106_v36 = vadd.f32 %v1090_v24, %v1057_v52  ;;  %v1107_v62 = vadd.f32 %v1091_v18, %v1058_v45  ;;  %v1108_v22 = vadd.f32 %v1092_v47, %v1059_v49  ;;  %v1109_v3 = vadd.f32 %v1093_v59, %v1060_v23  ;;  %6183 = vst [vmem:[#allocation11_spill] sm:$0xff] %v4656_v20  ;;  %v4666_v26 = vld [vmem:[#allocation2 + $0xb0] sm:$0xff]  ;;  %v4668_v45 = vld [vmem:[#allocation2 + $0xd8] sm:$0xff]  ;;  %v4670_v49 = vld [vmem:[#allocation2 + $0xe0] sm:$0xff] }
  0xd1   : > { %v1110_v61 = vadd.f32 %v1094_v54, %v1061_v39  ;;  %6184 = vst [vmem:[#allocation12_spill] sm:$0xff] %v4658_v33  ;;  %v1111_v50 = vadd.f32 %v1095_v13, %v1062_v10  ;;  %v1112_v60 = vadd.f32 %v1096_v42, %v1063_v15  ;;  %v1113_v8 = vadd.f32 %v1097_v53, %v1064_v46  ;;  %v3925_v42 = vld [vmem:[%s5767_s1 + $0x11] ss:$0 sm:$0xff] }
  0xd2   : > { %6185 = vst [vmem:[#allocation13_spill] sm:$0xff] %v4660_v12  ;;  %v1114_v52 = vadd.f32 %v1098_v55, %v1065_v30  ;;  %v1134_v23 = vmul.f32 %v3924_v56, %v3283_v31  ;;  %v1135_v39 = vmul.f32 %v3924_v56, %v3284_v37  ;;  %v1136_v25 = vmul.f32 %v3924_v56, %v4648_v40 }
  0xd3   : > { %6186 = vst [vmem:[#allocation14_spill] sm:$0xff] %v4662_v19  ;;  %v1137_v5 = vmul.f32 %v3924_v56, %v4650_v34  ;;  %v1138_v10 = vmul.f32 %v3924_v56, %v4652_v28  ;;  %v1139_v15 = vmul.f32 %v3924_v56, %v4654_v1  ;;  %v1140_v46 = vmul.f32 %v3924_v56, %v4656_v20  ;;  %v4691_v20 = vld [vmem:[#allocation2 + $0x51] sm:$0xff] }
  0xd4   : > { %6187 = vst [vmem:[#allocation15_spill] sm:$0xff] %v4664_v43  ;;  %v1141_v30 = vmul.f32 %v3924_v56, %v4658_v33  ;;  %v1142_v44 = vmul.f32 %v3924_v56, %v4660_v12  ;;  %v1143_v24 = vmul.f32 %v3924_v56, %v4662_v19  ;;  %v1144_v18 = vmul.f32 %v3924_v56, %v4664_v43  ;;  %v3299_v19 = vld [vmem:[#allocation2 + $0x31] sm:$0xff]  ;;  %v3300_v43 = vld [vmem:[#allocation2 + $0x39] sm:$0xff]  ;;  %v4689_v12 = vld [vmem:[#allocation2 + $0x49] sm:$0xff] }
  0xd5   : > { %6188 = vst [vmem:[#allocation16_spill] sm:$0xff] %v4666_v26  ;;  %v1145_v47 = vmul.f32 %v3924_v56, %v4666_v26  ;;  %v1146_v59 = vmul.f32 %v3924_v56, %v4487_v0  ;;  %v1147_v54 = vmul.f32 %v3924_v56, %v4489_v4  ;;  %v1148_v38 = vmul.f32 %v3924_v56, %v4668_v45 }
  0xd6   : > { %6189 = vst [vmem:[#allocation17_spill] sm:$0xff] %v4668_v45  ;;  %v1149_v13 = vmul.f32 %v3924_v56, %v4670_v49  ;;  %v1150_v53 = vadd.f32 %v1134_v23, %v1099_v57  ;;  %v1151_v55 = vadd.f32 %v1135_v39, %v1100_v58  ;;  %v1152_v31 = vadd.f32 %v1136_v25, %v1101_v9  ;;  %v4693_v45 = vld [vmem:[#allocation2 + $0x61] sm:$0xff]  ;;  %v4695_v56 = vld [vmem:[#allocation2 + $0x69] sm:$0xff]  ;;  %v4697_v9 = vld [vmem:[#allocation2 + $0x79] sm:$0xff] }
  0xd7   : > { %6190 = vst [vmem:[#allocation18_spill] sm:$0xff] %v4670_v49  ;;  %v1153_v37 = vadd.f32 %v1137_v5, %v1102_v63  ;;  %v1154_v26 = vadd.f32 %v1138_v10, %v1103_v41  ;;  %v1155_v0 = vadd.f32 %v1139_v15, %v1104_v14  ;;  %v1156_v33 = vadd.f32 %v1140_v46, %v1105_v48  ;;  %v4699_v63 = vld [vmem:[#allocation2 + $0x81] sm:$0xff]  ;;  %v4701_v23 = vld [vmem:[#allocation2 + $0x91] sm:$0xff]  ;;  %v4703_v39 = vld [vmem:[#allocation2 + $0x99] sm:$0xff] }
  0xd8   : > { %v1157_v4 = vadd.f32 %v1141_v30, %v1106_v36  ;;  %6191 = vst [vmem:[#allocation19_spill] sm:$0xff] %v4693_v45  ;;  %v1158_v49 = vadd.f32 %v1142_v44, %v1107_v62  ;;  %v1159_v1 = vadd.f32 %v1143_v24, %v1108_v22  ;;  %v1160_v57 = vadd.f32 %v1144_v18, %v1109_v3  ;;  %v4705_v25 = vld [vmem:[#allocation2 + $0xa9] sm:$0xff]  ;;  %v4707_v5 = vld [vmem:[#allocation2 + $0xb1] sm:$0xff]  ;;  %v4709_v62 = vld [vmem:[#allocation2 + $0xd9] sm:$0xff] }
  0xd9   : > { %6192 = vst [vmem:[#allocation20_spill] sm:$0xff] %v4695_v56  ;;  %v1161_v58 = vadd.f32 %v1145_v47, %v1110_v61  ;;  %v1162_v41 = vadd.f32 %v1146_v59, %v1111_v50  ;;  %v1163_v14 = vadd.f32 %v1147_v54, %v1112_v60  ;;  %v1164_v48 = vadd.f32 %v1148_v38, %v1113_v8  ;;  %v4711_v22 = vld [vmem:[#allocation2 + $0xe1] sm:$0xff]  ;;  %v3926_v59 = vld [vmem:[%s5767_s1 + $0x12] ss:$0 sm:$0xff] }
  0xda   : > { %6193 = vst [vmem:[#allocation21_spill] sm:$0xff] %v4697_v9  ;;  %v1165_v36 = vadd.f32 %v1149_v13, %v1114_v52  ;;  %v1183_v3 = vmul.f32 %v3925_v42, %v3299_v19  ;;  %v1184_v61 = vmul.f32 %v3925_v42, %v3300_v43  ;;  %v1185_v10 = vmul.f32 %v3925_v42, %v4689_v12 }
  0xdb   : > { %6194 = vst [vmem:[#allocation22_spill] sm:$0xff] %v4699_v63  ;;  %v1186_v15 = vmul.f32 %v3925_v42, %v4691_v20  ;;  %v1187_v50 = vmul.f32 %v3925_v42, %v4693_v45  ;;  %v1188_v60 = vmul.f32 %v3925_v42, %v4695_v56  ;;  %v1189_v8 = vmul.f32 %v3925_v42, %v4697_v9  ;;  %v4732_v56 = vld [vmem:[#allocation2 + $0x52] sm:$0xff] }
  0xdc   : > { %6195 = vst [vmem:[#allocation23_spill] sm:$0xff] %v4701_v23  ;;  %v1190_v52 = vmul.f32 %v3925_v42, %v4699_v63  ;;  %v1191_v46 = vmul.f32 %v3925_v42, %v4701_v23  ;;  %v1192_v30 = vmul.f32 %v3925_v42, %v4703_v39  ;;  %v1193_v44 = vmul.f32 %v3925_v42, %v4705_v25  ;;  %v3315_v23 = vld [vmem:[#allocation2 + $0x32] sm:$0xff]  ;;  %v4730_v63 = vld [vmem:[#allocation2 + $0x4a] sm:$0xff] }
  0xdd   : > { %6196 = vst [vmem:[#allocation24_spill] sm:$0xff] %v4703_v39  ;;  %v1194_v19 = vmul.f32 %v3925_v42, %v4707_v5  ;;  %v1195_v43 = vmul.f32 %v3925_v42, %v4510_v7  ;;  %v1196_v24 = vmul.f32 %v3925_v42, %v4512_v16  ;;  %v1197_v18 = vmul.f32 %v3925_v42, %v4709_v62 }
  0xde   : > { %6197 = vst [vmem:[#allocation25_spill] sm:$0xff] %v4705_v25  ;;  %v1198_v47 = vmul.f32 %v3925_v42, %v4711_v22  ;;  %v1199_v54 = vadd.f32 %v1183_v3, %v1150_v53  ;;  %v1200_v38 = vadd.f32 %v1184_v61, %v1151_v55  ;;  %v1201_v13 = vadd.f32 %v1185_v10, %v1152_v31  ;;  %v3316_v25 = vld [vmem:[#allocation2 + $0x3a] sm:$0xff]  ;;  %v4736_v42 = vld [vmem:[#allocation2 + $0x6a] sm:$0xff]  ;;  %v4742_v3 = vld [vmem:[#allocation2 + $0x92] sm:$0xff] }
  0xdf   : > { %6198 = vst [vmem:[#allocation26_spill] sm:$0xff] %v4707_v5  ;;  %v1202_v39 = vadd.f32 %v1186_v15, %v1153_v37  ;;  %v1203_v5 = vadd.f32 %v1187_v50, %v1154_v26  ;;  %v1204_v7 = vadd.f32 %v1188_v60, %v1155_v0  ;;  %v1205_v9 = vadd.f32 %v1189_v8, %v1156_v33  ;;  %v4738_v31 = vld [vmem:[#allocation2 + $0x7a] sm:$0xff]  ;;  %v4740_v37 = vld [vmem:[#allocation2 + $0x82] sm:$0xff]  ;;  %v4746_v10 = vld [vmem:[#allocation2 + $0xaa] sm:$0xff] }
  0xe0   : > { %6199 = vst [vmem:[#allocation27_spill] sm:$0xff] %v4709_v62  ;;  %v1206_v16 = vadd.f32 %v1190_v52, %v1157_v4  ;;  %v4734_v62 = vld [vmem:[#allocation2 + $0x62] sm:$0xff]  ;;  %v1208_v45 = vadd.f32 %v1192_v30, %v1159_v1  ;;  %v1209_v53 = vadd.f32 %v1193_v44, %v1160_v57  ;;  %v1210_v55 = vadd.f32 %v1194_v19, %v1161_v58  ;;  %v4744_v61 = vld [vmem:[#allocation2 + $0x9a] sm:$0xff]  ;;  %v4748_v15 = vld [vmem:[#allocation2 + $0xb2] sm:$0xff] }
  0xe1   : > { %6200 = vst [vmem:[#allocation28_spill] sm:$0xff] %v4711_v22  ;;  %v1207_v22 = vadd.f32 %v1191_v46, %v1158_v49  ;;  %v1211_v26 = vadd.f32 %v1195_v43, %v1162_v41  ;;  %v1212_v0 = vadd.f32 %v1196_v24, %v1163_v14  ;;  %v1213_v33 = vadd.f32 %v1197_v18, %v1164_v48  ;;  %v4750_v49 = vld [vmem:[#allocation2 + $0xda] sm:$0xff]  ;;  %v4752_v1 = vld [vmem:[#allocation2 + $0xe2] sm:$0xff]  ;;  %v3927_v43 = vld [vmem:[%s5767_s1 + $0x13] ss:$0 sm:$0xff] }
  0xe2   : > { %6201 = vst [vmem:[#allocation29_spill] sm:$0xff] %v4734_v62  ;;  %v1214_v4 = vadd.f32 %v1198_v47, %v1165_v36  ;;  %v1232_v57 = vmul.f32 %v3926_v59, %v3315_v23  ;;  %v1233_v58 = vmul.f32 %v3926_v59, %v3316_v25  ;;  %v1234_v50 = vmul.f32 %v3926_v59, %v4730_v63 }
  0xe3   : > { %6202 = vst [vmem:[#allocation30_spill] sm:$0xff] %v4736_v42  ;;  %v1235_v60 = vmul.f32 %v3926_v59, %v4732_v56  ;;  %v1236_v41 = vmul.f32 %v3926_v59, %v4734_v62  ;;  %v1237_v14 = vmul.f32 %v3926_v59, %v4736_v42  ;;  %v1238_v48 = vmul.f32 %v3926_v59, %v4738_v31  ;;  %v4773_v42 = vld [vmem:[#allocation2 + $0x53] sm:$0xff] }
  0xe4   : > { %6203 = vst [vmem:[#allocation31_spill] sm:$0xff] %v4738_v31  ;;  %v1239_v36 = vmul.f32 %v3926_v59, %v4740_v37  ;;  %v1240_v8 = vmul.f32 %v3926_v59, %v4742_v3  ;;  %v1241_v52 = vmul.f32 %v3926_v59, %v4744_v61  ;;  %v1242_v46 = vmul.f32 %v3926_v59, %v4746_v10 }
  0xe5   : > { %6204 = vst [vmem:[#allocation32_spill] sm:$0xff] %v4740_v37  ;;  %v1243_v23 = vmul.f32 %v3926_v59, %v4748_v15  ;;  %v1244_v25 = vmul.f32 %v3926_v59, %v4533_v6  ;;  %v1245_v30 = vmul.f32 %v3926_v59, %v4535_v51  ;;  %v1246_v44 = vmul.f32 %v3926_v59, %v4750_v49  ;;  %v4771_v37 = vld [vmem:[#allocation2 + $0x4b] sm:$0xff] }
  0xe6   : > { %6205 = vst [vmem:[#allocation33_spill] sm:$0xff] %v4742_v3  ;;  %v1247_v19 = vmul.f32 %v3926_v59, %v4752_v1  ;;  %v1248_v24 = vadd.f32 %v1232_v57, %v1199_v54  ;;  %v1249_v18 = vadd.f32 %v1233_v58, %v1200_v38  ;;  %v1250_v47 = vadd.f32 %v1234_v50, %v1201_v13  ;;  %v3331_v3 = vld [vmem:[#allocation2 + $0x33] sm:$0xff]  ;;  %v4777_v59 = vld [vmem:[#allocation2 + $0x6b] sm:$0xff]  ;;  %v4779_v13 = vld [vmem:[#allocation2 + $0x7b] sm:$0xff] }
  0xe7   : > { %6206 = vst [vmem:[#allocation34_spill] sm:$0xff] %v4744_v61  ;;  %v1251_v61 = vadd.f32 %v1235_v60, %v1202_v39  ;;  %v1253_v6 = vadd.f32 %v1237_v14, %v1204_v7  ;;  %v1254_v31 = vadd.f32 %v1238_v48, %v1205_v9  ;;  %v1255_v51 = vadd.f32 %v1239_v36, %v1206_v16  ;;  %v4781_v39 = vld [vmem:[#allocation2 + $0x83] sm:$0xff]  ;;  %v4783_v57 = vld [vmem:[#allocation2 + $0x93] sm:$0xff]  ;;  %v4785_v58 = vld [vmem:[#allocation2 + $0x9b] sm:$0xff] }
  0xe8   : > { %6207 = vst [vmem:[#allocation35_spill] sm:$0xff] %v4746_v10  ;;  %v3332_v10 = vld [vmem:[#allocation2 + $0x3b] sm:$0xff]  ;;  %v1257_v62 = vadd.f32 %v1241_v52, %v1208_v45  ;;  %v1258_v54 = vadd.f32 %v1242_v46, %v1209_v53  ;;  %v1259_v38 = vadd.f32 %v1243_v23, %v1210_v55  ;;  %v1261_v7 = vadd.f32 %v1245_v30, %v1212_v0  ;;  %v4787_v50 = vld [vmem:[#allocation2 + $0xab] sm:$0xff]  ;;  %v4789_v60 = vld [vmem:[#allocation2 + $0xb3] sm:$0xff] }
  0xe9   : > { %6208 = vst [vmem:[#allocation36_spill] sm:$0xff] %v4748_v15  ;;  %v1252_v15 = vadd.f32 %v1236_v41, %v1203_v5  ;;  %v1260_v5 = vadd.f32 %v1244_v25, %v1211_v26  ;;  %v1262_v9 = vadd.f32 %v1246_v44, %v1213_v33  ;;  %v1263_v16 = vadd.f32 %v1247_v19, %v1214_v4  ;;  %v4793_v45 = vld [vmem:[#allocation2 + $0xe3] sm:$0xff]  ;;  %v3928_v25 = vld [vmem:[%s5767_s1 + $0x14] ss:$0 sm:$0xff] }
  0xea   : > { %6209 = vst [vmem:[#allocation37_spill] sm:$0xff] %v4750_v49  ;;  %v4775_v49 = vld [vmem:[#allocation2 + $0x63] sm:$0xff]  ;;  %v1281_v53 = vmul.f32 %v3927_v43, %v3331_v3  ;;  %v1282_v55 = vmul.f32 %v3927_v43, %v3332_v10  ;;  %v1283_v41 = vmul.f32 %v3927_v43, %v4771_v37  ;;  %v1284_v14 = vmul.f32 %v3927_v43, %v4773_v42 }
  0xeb   : > { %6210 = vst [vmem:[#allocation38_spill] sm:$0xff] %v4752_v1  ;;  %v1256_v1 = vadd.f32 %v1240_v8, %v1207_v22  ;;  %v4791_v22 = vld [vmem:[#allocation2 + $0xdb] sm:$0xff]  ;;  %v1285_v26 = vmul.f32 %v3927_v43, %v4775_v49  ;;  %v1286_v0 = vmul.f32 %v3927_v43, %v4777_v59  ;;  %v1287_v33 = vmul.f32 %v3927_v43, %v4779_v13 }
  0xec   : > { %6211 = vst [vmem:[#allocation39_spill] sm:$0xff] %v4775_v49  ;;  %v1288_v4 = vmul.f32 %v3927_v43, %v4781_v39  ;;  %v1289_v48 = vmul.f32 %v3927_v43, %v4783_v57  ;;  %v1290_v36 = vmul.f32 %v3927_v43, %v4785_v58  ;;  %v1291_v8 = vmul.f32 %v3927_v43, %v4787_v50 }
  0xed   : > { %6212 = vst [vmem:[#allocation40_spill] sm:$0xff] %v4777_v59  ;;  %v1292_v3 = vmul.f32 %v3927_v43, %v4789_v60  ;;  %v1293_v10 = vmul.f32 %v3927_v43, %v4556_v17  ;;  %v1294_v52 = vmul.f32 %v3927_v43, %v4558_v29  ;;  %v1295_v46 = vmul.f32 %v3927_v43, %v4791_v22  ;;  %v4814_v59 = vld [vmem:[#allocation2 + $0x54] sm:$0xff] }
  0xee   : > { %6213 = vst [vmem:[#allocation41_spill] sm:$0xff] %v4779_v13  ;;  %v1296_v23 = vmul.f32 %v3927_v43, %v4793_v45  ;;  %v1297_v30 = vadd.f32 %v1281_v53, %v1248_v24  ;;  %v1298_v44 = vadd.f32 %v1282_v55, %v1249_v18  ;;  %v1299_v19 = vadd.f32 %v1283_v41, %v1250_v47  ;;  %v4818_v43 = vld [vmem:[#allocation2 + $0x6c] sm:$0xff]  ;;  %v4820_v47 = vld [vmem:[#allocation2 + $0x7c] sm:$0xff]  ;;  %v4824_v53 = vld [vmem:[#allocation2 + $0x94] sm:$0xff] }
  0xef   : > { %6214 = vst [vmem:[#allocation42_spill] sm:$0xff] %v4781_v39  ;;  %v4812_v39 = vld [vmem:[#allocation2 + $0x4c] sm:$0xff]  ;;  %v1302_v17 = vadd.f32 %v1286_v0, %v1253_v6  ;;  %v1303_v13 = vadd.f32 %v1287_v33, %v1254_v31  ;;  %v1304_v29 = vadd.f32 %v1288_v4, %v1255_v51  ;;  %v1306_v49 = vadd.f32 %v1290_v36, %v1257_v62  ;;  %v4826_v55 = vld [vmem:[#allocation2 + $0x9c] sm:$0xff]  ;;  %v4834_v62 = vld [vmem:[#allocation2 + $0xe4] sm:$0xff] }
  0xf0   : > { %6215 = vst [vmem:[#allocation43_spill] sm:$0xff] %v4783_v57  ;;  %v3347_v57 = vld [vmem:[#allocation2 + $0x34] sm:$0xff]  ;;  %v1307_v24 = vadd.f32 %v1291_v8, %v1258_v54  ;;  %v1308_v18 = vadd.f32 %v1292_v3, %v1259_v38  ;;  %v1310_v6 = vadd.f32 %v1294_v52, %v1261_v7  ;;  %v1311_v31 = vadd.f32 %v1295_v46, %v1262_v9  ;;  %v4828_v41 = vld [vmem:[#allocation2 + $0xac] sm:$0xff] }
  0xf1   : > { %6216 = vst [vmem:[#allocation44_spill] sm:$0xff] %v4785_v58  ;;  %v1300_v58 = vadd.f32 %v1284_v14, %v1251_v61  ;;  %v4822_v61 = vld [vmem:[#allocation2 + $0x84] sm:$0xff]  ;;  %v1312_v51 = vadd.f32 %v1296_v23, %v1263_v16  ;;  %v4830_v14 = vld [vmem:[#allocation2 + $0xb4] sm:$0xff]  ;;  %v1330_v54 = vmul.f32 %v3928_v25, %v3347_v57  ;;  %v1333_v0 = vmul.f32 %v3928_v25, %v4814_v59 }
  0xf2   : > { %6217 = vst [vmem:[#allocation45_spill] sm:$0xff] %v4787_v50  ;;  %v3348_v50 = vld [vmem:[#allocation2 + $0x3c] sm:$0xff]  ;;  %v1335_v7 = vmul.f32 %v3928_v25, %v4818_v43  ;;  %v1336_v9 = vmul.f32 %v3928_v25, %v4820_v47  ;;  %v1337_v16 = vmul.f32 %v3928_v25, %v4822_v61  ;;  %v1338_v33 = vmul.f32 %v3928_v25, %v4824_v53 }
  0xf3   : > { %6218 = vst [vmem:[#allocation46_spill] sm:$0xff] %v4789_v60  ;;  %v1301_v60 = vadd.f32 %v1285_v26, %v1252_v15  ;;  %v1309_v15 = vadd.f32 %v1293_v10, %v1260_v5  ;;  %v1331_v38 = vmul.f32 %v3928_v25, %v3348_v50  ;;  %v1332_v26 = vmul.f32 %v3928_v25, %v4812_v39  ;;  %v3929_v10 = vld [vmem:[%s5767_s1 + $0x15] ss:$0 sm:$0xff] }
  0xf4   : > { %6219 = vst [vmem:[#allocation47_spill] sm:$0xff] %v4791_v22  ;;  %v4816_v22 = vld [vmem:[#allocation2 + $0x64] sm:$0xff]  ;;  %v1339_v4 = vmul.f32 %v3928_v25, %v4826_v55  ;;  %v1341_v57 = vmul.f32 %v3928_v25, %v4830_v14  ;;  %v1342_v50 = vmul.f32 %v3928_v25, %v4579_v21  ;;  %v1343_v36 = vmul.f32 %v3928_v25, %v4581_v27 }
  0xf5   : > { %6220 = vst [vmem:[#allocation48_spill] sm:$0xff] %v4793_v45  ;;  %v1305_v45 = vadd.f32 %v1289_v48, %v1256_v1  ;;  %v4832_v1 = vld [vmem:[#allocation2 + $0xdc] sm:$0xff]  ;;  %v1334_v5 = vmul.f32 %v3928_v25, %v4816_v22  ;;  %v1340_v48 = vmul.f32 %v3928_v25, %v4828_v41  ;;  %v1345_v3 = vmul.f32 %v3928_v25, %v4834_v62 }
  0xf6   : > { %6221 = vst [vmem:[#allocation49_spill] sm:$0xff] %v4816_v22  ;;  %v1344_v8 = vmul.f32 %v3928_v25, %v4832_v1  ;;  %v1346_v52 = vadd.f32 %v1330_v54, %v1297_v30  ;;  %v1347_v46 = vadd.f32 %v1331_v38, %v1298_v44  ;;  %v1348_v23 = vadd.f32 %v1332_v26, %v1299_v19  ;;  %v4859_v25 = vld [vmem:[#allocation2 + $0x6d] sm:$0xff]  ;;  %v4861_v19 = vld [vmem:[#allocation2 + $0x7d] sm:$0xff]  ;;  %v4865_v54 = vld [vmem:[#allocation2 + $0x95] sm:$0xff] }
  0xf7   : > { %6222 = vst [vmem:[#allocation50_spill] sm:$0xff] %v4818_v43  ;;  %v1351_v21 = vadd.f32 %v1335_v7, %v1302_v17  ;;  %v1353_v27 = vadd.f32 %v1337_v16, %v1304_v29  ;;  %v4855_v43 = vld [vmem:[#allocation2 + $0x55] sm:$0xff]  ;;  %v1355_v22 = vadd.f32 %v1339_v4, %v1306_v49  ;;  %v1356_v30 = vadd.f32 %v1340_v48, %v1307_v24  ;;  %v4867_v38 = vld [vmem:[#allocation2 + $0x9d] sm:$0xff]  ;;  %v4869_v26 = vld [vmem:[#allocation2 + $0xad] sm:$0xff] }
  0xf8   : > { %6223 = vst [vmem:[#allocation51_spill] sm:$0xff] %v4820_v47  ;;  %v1352_v47 = vadd.f32 %v1336_v9, %v1303_v13  ;;  %v1357_v44 = vadd.f32 %v1341_v57, %v1308_v18  ;;  %v1359_v17 = vadd.f32 %v1343_v36, %v1310_v6  ;;  %v1360_v13 = vadd.f32 %v1344_v8, %v1311_v31  ;;  %v4875_v49 = vld [vmem:[#allocation2 + $0xe5] sm:$0xff] }
  0xf9   : > { %6224 = vst [vmem:[#allocation52_spill] sm:$0xff] %v4822_v61  ;;  %v4853_v61 = vld [vmem:[#allocation2 + $0x4d] sm:$0xff]  ;;  %v1361_v29 = vadd.f32 %v1345_v3, %v1312_v51  ;;  %v1382_v7 = vmul.f32 %v3929_v10, %v4855_v43  ;;  %v1384_v6 = vmul.f32 %v3929_v10, %v4859_v25  ;;  %v1385_v31 = vmul.f32 %v3929_v10, %v4861_v19 }
  0xfa   : > { %6225 = vst [vmem:[#allocation53_spill] sm:$0xff] %v4824_v53  ;;  %v3363_v53 = vld [vmem:[#allocation2 + $0x35] sm:$0xff]  ;;  %v1387_v9 = vmul.f32 %v3929_v10, %v4865_v54  ;;  %v1388_v16 = vmul.f32 %v3929_v10, %v4867_v38  ;;  %v1392_v4 = vmul.f32 %v3929_v10, %v4604_v35  ;;  %v1394_v57 = vmul.f32 %v3929_v10, %v4875_v49 }
  0xfb   : > { %6226 = vst [vmem:[#allocation54_spill] sm:$0xff] %v4826_v55  ;;  %v1349_v55 = vadd.f32 %v1333_v0, %v1300_v58  ;;  %v4863_v58 = vld [vmem:[#allocation2 + $0x85] sm:$0xff]  ;;  %v4871_v0 = vld [vmem:[#allocation2 + $0xb5] sm:$0xff]  ;;  %v1379_v24 = vmul.f32 %v3929_v10, %v3363_v53 }
  0xfc   : > { %6227 = vst [vmem:[#allocation55_spill] sm:$0xff] %v4828_v41  ;;  %v3364_v41 = vld [vmem:[#allocation2 + $0x3d] sm:$0xff]  ;;  %v1386_v51 = vmul.f32 %v3929_v10, %v4863_v58  ;;  %v1390_v53 = vmul.f32 %v3929_v10, %v4871_v0 }
  0xfd   : > { %6228 = vst [vmem:[#allocation56_spill] sm:$0xff] %v4830_v14  ;;  %v1350_v14 = vadd.f32 %v1334_v5, %v1301_v60  ;;  %v1358_v60 = vadd.f32 %v1342_v50, %v1309_v15  ;;  %v1380_v18 = vmul.f32 %v3929_v10, %v3364_v41  ;;  %v1381_v5 = vmul.f32 %v3929_v10, %v4853_v61  ;;  %v3930_v50 = vld [vmem:[%s5767_s1 + $0x16] ss:$0 sm:$0xff] }
  0xfe   : > { %6229 = vst [vmem:[#allocation57_spill] sm:$0xff] %v4832_v1  ;;  %v4857_v1 = vld [vmem:[#allocation2 + $0x65] sm:$0xff]  ;;  %v1391_v41 = vmul.f32 %v3929_v10, %v4602_v2  ;;  %v1395_v36 = vadd.f32 %v1379_v24, %v1346_v52  ;;  %v1400_v2 = vadd.f32 %v1384_v6, %v1351_v21  ;;  %v1402_v35 = vadd.f32 %v1386_v51, %v1353_v27  ;;  %v4906_v24 = vld [vmem:[#allocation2 + $0x96] sm:$0xff] }
  0xff   : > { %6230 = vst [vmem:[#allocation58_spill] sm:$0xff] %v4834_v62  ;;  %v1354_v62 = vadd.f32 %v1338_v33, %v1305_v45  ;;  %v4873_v45 = vld [vmem:[#allocation2 + $0xdd] sm:$0xff]  ;;  %v1383_v15 = vmul.f32 %v3929_v10, %v4857_v1  ;;  %v1389_v33 = vmul.f32 %v3929_v10, %v4869_v26  ;;  %v1396_v8 = vadd.f32 %v1380_v18, %v1347_v46 }
 0x100   : > { %6231 = vst [vmem:[#allocation59_spill] sm:$0xff] %v4857_v1  ;;  %v1393_v48 = vmul.f32 %v3929_v10, %v4873_v45  ;;  %v1397_v3 = vadd.f32 %v1381_v5, %v1348_v23  ;;  %v4900_v10 = vld [vmem:[#allocation2 + $0x6e] sm:$0xff]  ;;  %v1404_v1 = vadd.f32 %v1388_v16, %v1355_v22  ;;  %v1406_v46 = vadd.f32 %v1390_v53, %v1357_v44  ;;  %v4902_v23 = vld [vmem:[#allocation2 + $0x7e] sm:$0xff]  ;;  %v4916_v22 = vld [vmem:[#allocation2 + $0xe6] sm:$0xff] }
 0x101   : > { %6232 = vst [vmem:[#allocation60_spill] sm:$0xff] %v4859_v25  ;;  %v4896_v25 = vld [vmem:[#allocation2 + $0x56] sm:$0xff]  ;;  %v1405_v52 = vadd.f32 %v1389_v33, %v1356_v30  ;;  %v1408_v21 = vadd.f32 %v1392_v4, %v1359_v17  ;;  %v1410_v27 = vadd.f32 %v1394_v57, %v1361_v29  ;;  %v4908_v18 = vld [vmem:[#allocation2 + $0x9e] sm:$0xff]  ;;  %v4910_v5 = vld [vmem:[#allocation2 + $0xae] sm:$0xff]  ;;  %v1433_v17 = vmul.f32 %v3930_v50, %v4900_v10 }
 0x102   : > { %6233 = vst [vmem:[#allocation61_spill] sm:$0xff] %v4861_v19  ;;  %v1401_v19 = vadd.f32 %v1385_v31, %v1352_v47  ;;  %v1409_v47 = vadd.f32 %v1393_v48, %v1360_v13  ;;  %v1431_v6 = vmul.f32 %v3930_v50, %v4896_v25  ;;  %v1434_v13 = vmul.f32 %v3930_v50, %v4902_v23 }
 0x103   : > { %6234 = vst [vmem:[#allocation62_spill] sm:$0xff] %v4863_v58  ;;  %v4894_v58 = vld [vmem:[#allocation2 + $0x4e] sm:$0xff]  ;;  %v1436_v31 = vmul.f32 %v3930_v50, %v4906_v24  ;;  %v1437_v51 = vmul.f32 %v3930_v50, %v4908_v18  ;;  %v1441_v16 = vmul.f32 %v3930_v50, %v4627_v32  ;;  %v1443_v53 = vmul.f32 %v3930_v50, %v4916_v22 }
 0x104   : > { %6235 = vst [vmem:[#allocation63_spill] sm:$0xff] %v4865_v54  ;;  %v3379_v54 = vld [vmem:[#allocation2 + $0x36] sm:$0xff] }
 0x105   : > { %6236 = vst [vmem:[#allocation64_spill] sm:$0xff] %v4867_v38  ;;  %v1398_v38 = vadd.f32 %v1382_v7, %v1349_v55  ;;  %v4904_v55 = vld [vmem:[#allocation2 + $0x86] sm:$0xff]  ;;  %v4912_v7 = vld [vmem:[#allocation2 + $0xb6] sm:$0xff]  ;;  %v1428_v30 = vmul.f32 %v3930_v50, %v3379_v54 }
 0x106   : > { %6237 = vst [vmem:[#allocation65_spill] sm:$0xff] %v4869_v26  ;;  %v3380_v26 = vld [vmem:[#allocation2 + $0x3e] sm:$0xff]  ;;  %v1435_v29 = vmul.f32 %v3930_v50, %v4904_v55  ;;  %v1439_v54 = vmul.f32 %v3930_v50, %v4912_v7 }
 0x107   : > { %6238 = vst [vmem:[#allocation66_spill] sm:$0xff] %v4871_v0  ;;  %v1399_v0 = vadd.f32 %v1383_v15, %v1350_v14  ;;  %v1407_v14 = vadd.f32 %v1391_v41, %v1358_v60  ;;  %v1429_v44 = vmul.f32 %v3930_v50, %v3380_v26  ;;  %v1430_v15 = vmul.f32 %v3930_v50, %v4894_v58 }
 0x108   : > { %6239 = vst [vmem:[#allocation67_spill] sm:$0xff] %v4873_v45  ;;  %v4898_v45 = vld [vmem:[#allocation2 + $0x66] sm:$0xff]  ;;  %v1440_v26 = vmul.f32 %v3930_v50, %v4625_v11  ;;  %v1444_v41 = vadd.f32 %v1428_v30, %v1395_v36  ;;  %v1447_v57 = vadd.f32 %v1431_v6, %v1398_v38  ;;  %v1453_v11 = vadd.f32 %v1437_v51, %v1404_v1  ;;  %v4939_v38 = vld [vmem:[#allocation2 + $0xf0] sm:$0xff] }
 0x109   : > { %6240 = vst [vmem:[#allocation68_spill] sm:$0xff] %v4875_v49  ;;  %v1403_v49 = vadd.f32 %v1387_v9, %v1354_v62  ;;  %v4914_v62 = vld [vmem:[#allocation2 + $0xde] sm:$0xff]  ;;  %v1432_v60 = vmul.f32 %v3930_v50, %v4898_v45  ;;  %v1438_v9 = vmul.f32 %v3930_v50, %v4910_v5  ;;  %v1445_v4 = vadd.f32 %v1429_v44, %v1396_v8  ;;  %v4937_v8 = vld [vmem:[#allocation2 + $0xc8] sm:$0xff]  ;;  %v6258_v6 = vld [vmem:[#allocation16_spill] sm:$0xff] }
 0x10a   : > { %6241 = vst [vmem:[#allocation69_spill] sm:$0xff] %v4896_v25  ;;  %v1442_v33 = vmul.f32 %v3930_v50, %v4914_v62  ;;  %v1446_v48 = vadd.f32 %v1430_v15, %v1397_v3  ;;  %v1455_v32 = vadd.f32 %v1439_v54, %v1406_v46  ;;  %v1459_v50 = vadd.f32 %v1443_v53, %v1410_v27  ;;  %v4935_v36 = vld [vmem:[#allocation2 + $0xc0] sm:$0xff]  ;;  %v4941_v3 = vld [vmem:[#allocation2 + $0xf8] sm:$0xff]  ;;  %v6254_v46 = vld [vmem:[#allocation12_spill] sm:$0xff] }
 0x10b   : > { %6242 = vst [vmem:[#allocation70_spill] sm:$0xff] %v4898_v45  ;;  %v1456_v45 = vadd.f32 %v1440_v26, %v1407_v14  ;;  %v6256_v27 = vld [vmem:[#allocation14_spill] sm:$0xff]  ;;  %v6257_v44 = vld [vmem:[#allocation15_spill] sm:$0xff] }
 0x10c   : > { %6243 = vst [vmem:[#allocation71_spill] sm:$0xff] %v4900_v10  ;;  %v1454_v10 = vadd.f32 %v1438_v9, %v1405_v52  ;;  %v1458_v25 = vadd.f32 %v1442_v33, %v1409_v47  ;;  %v3932_v33 = vld [vmem:[%s5767_s1 + $0x19] ss:$0 sm:$0xff] }
 0x10d   : > { %6244 = vst [vmem:[#allocation72_spill] sm:$0xff] %v4902_v23  ;;  %v1452_v23 = vadd.f32 %v1436_v31, %v1403_v49  ;;  %v6252_v49 = vld [vmem:[#allocation10_spill] sm:$0xff] }
 0x10e   : > { %6245 = vst [vmem:[#allocation73_spill] sm:$0xff] %v4904_v55  ;;  %v1450_v55 = vadd.f32 %v1434_v13, %v1401_v19  ;;  %v6260_v13 = vld [vmem:[#allocation18_spill] sm:$0xff] }
 0x10f   : > { %6246 = vst [vmem:[#allocation74_spill] sm:$0xff] %v4906_v24  ;;  %v1448_v24 = vadd.f32 %v1432_v60, %v1399_v0 }
 0x110   : > { %6247 = vst [vmem:[#allocation75_spill] sm:$0xff] %v4908_v18  ;;  %v3931_v18 = vld [vmem:[%s5767_s1 + $0x18] ss:$0 sm:$0xff] }
 0x111   : > { %6248 = vst [vmem:[#allocation76_spill] sm:$0xff] %v4910_v5  ;;  %v1449_v5 = vadd.f32 %v1433_v17, %v1400_v2  ;;  %v1479_v0 = vmul.f32 %v3931_v18, %v4648_v40  ;;  %v1480_v19 = vmul.f32 %v3931_v18, %v4650_v34  ;;  %v1481_v1 = vmul.f32 %v3931_v18, %v4652_v28  ;;  %v6259_v17 = vld [vmem:[#allocation17_spill] sm:$0xff] }
 0x112   : > { %6249 = vst [vmem:[#allocation77_spill] sm:$0xff] %v4912_v7  ;;  %v1451_v7 = vadd.f32 %v1435_v29, %v1402_v35  ;;  %v1482_v2 = vmul.f32 %v3931_v18, %v6252_v49  ;;  %v6253_v35 = vld [vmem:[#allocation11_spill] sm:$0xff]  ;;  %v1484_v14 = vmul.f32 %v3931_v18, %v6254_v46  ;;  %v1486_v30 = vmul.f32 %v3931_v18, %v6256_v27 }
 0x113   : > { %6250 = vst [vmem:[#allocation78_spill] sm:$0xff] %v4914_v62  ;;  %v1457_v62 = vadd.f32 %v1441_v16, %v1408_v21  ;;  %v1483_v52 = vmul.f32 %v3931_v18, %v6253_v35  ;;  %v6255_v21 = vld [vmem:[#allocation13_spill] sm:$0xff]  ;;  %v1487_v15 = vmul.f32 %v3931_v18, %v6257_v44  ;;  %v1488_v60 = vmul.f32 %v3931_v18, %v6258_v6 }
 0x114   : > { %6251 = vst [vmem:[#allocation79_spill] sm:$0xff] %v4939_v38  ;;  %v1485_v47 = vmul.f32 %v3931_v18, %v6255_v21  ;;  %v1489_v40 = vmul.f32 %v3931_v18, %v4935_v36  ;;  %v1490_v34 = vmul.f32 %v3931_v18, %v4937_v8  ;;  %v1491_v28 = vmul.f32 %v3931_v18, %v6259_v17 }
 0x115   : > { %v1492_v29 = vmul.f32 %v3931_v18, %v6260_v13  ;;  %v1493_v31 = vmul.f32 %v3931_v18, %v4939_v38  ;;  %v1494_v51 = vmul.f32 %v3931_v18, %v4941_v3  ;;  %v1495_v9 = vadd.f32 %v1479_v0, %v1444_v41  ;;  %v4962_v41 = vld [vmem:[#allocation2 + $0xc1] sm:$0xff]  ;;  %v6268_v0 = vld [vmem:[#allocation24_spill] sm:$0xff] }
 0x116   : > { %v1496_v54 = vadd.f32 %v1480_v19, %v1445_v4  ;;  %v1497_v26 = vadd.f32 %v1481_v1, %v1446_v48  ;;  %v1498_v16 = vadd.f32 %v1482_v2, %v1447_v57  ;;  %v1499_v53 = vadd.f32 %v1483_v52, %v1448_v24  ;;  %v4964_v4 = vld [vmem:[#allocation2 + $0xc9] sm:$0xff]  ;;  %v4966_v48 = vld [vmem:[#allocation2 + $0xf1] sm:$0xff]  ;;  %v4968_v57 = vld [vmem:[#allocation2 + $0xf9] sm:$0xff] }
 0x117   : > { %v1500_v49 = vadd.f32 %v1484_v14, %v1449_v5  ;;  %v1501_v35 = vadd.f32 %v1485_v47, %v1450_v55  ;;  %v1502_v46 = vadd.f32 %v1486_v30, %v1451_v7  ;;  %v1503_v21 = vadd.f32 %v1487_v15, %v1452_v23  ;;  %6261 = vst [vmem:[#allocation80_spill] sm:$0xff] %v4964_v4  ;;  %v6263_v23 = vld [vmem:[#allocation19_spill] sm:$0xff]  ;;  %v6269_v1 = vld [vmem:[#allocation25_spill] sm:$0xff]  ;;  %v6270_v52 = vld [vmem:[#allocation26_spill] sm:$0xff] }
 0x118   : > { %v1504_v27 = vadd.f32 %v1488_v60, %v1453_v11  ;;  %v1505_v44 = vadd.f32 %v1489_v40, %v1454_v10  ;;  %v1506_v6 = vadd.f32 %v1490_v34, %v1455_v32  ;;  %v1507_v17 = vadd.f32 %v1491_v28, %v1456_v45  ;;  %6262 = vst [vmem:[#allocation81_spill] sm:$0xff] %v4966_v48  ;;  %v6264_v10 = vld [vmem:[#allocation20_spill] sm:$0xff]  ;;  %v6265_v45 = vld [vmem:[#allocation21_spill] sm:$0xff]  ;;  %v6267_v32 = vld [vmem:[#allocation23_spill] sm:$0xff] }
 0x119   : > { %v1508_v13 = vadd.f32 %v1492_v29, %v1457_v62  ;;  %v1509_v38 = vadd.f32 %v1493_v31, %v1458_v25  ;;  %v1510_v18 = vadd.f32 %v1494_v51, %v1459_v50  ;;  %v1528_v24 = vmul.f32 %v3932_v33, %v4689_v12  ;;  %v6266_v25 = vld [vmem:[#allocation22_spill] sm:$0xff]  ;;  %v6271_v47 = vld [vmem:[#allocation27_spill] sm:$0xff]  ;;  %v6272_v15 = vld [vmem:[#allocation28_spill] sm:$0xff] }
 0x11a   : > { %v1529_v55 = vmul.f32 %v3932_v33, %v4691_v20  ;;  %v1530_v5 = vmul.f32 %v3932_v33, %v6263_v23  ;;  %v1531_v7 = vmul.f32 %v3932_v33, %v6264_v10  ;;  %v1532_v62 = vmul.f32 %v3932_v33, %v6265_v45  ;;  %v3933_v23 = vld [vmem:[%s5767_s1 + $0x1a] ss:$0 sm:$0xff] }
 0x11b   : > { %v1533_v11 = vmul.f32 %v3932_v33, %v6266_v25  ;;  %v1534_v50 = vmul.f32 %v3932_v33, %v6267_v32  ;;  %v1535_v19 = vmul.f32 %v3932_v33, %v6268_v0  ;;  %v1536_v2 = vmul.f32 %v3932_v33, %v6269_v1 }
 0x11c   : > { %v1537_v14 = vmul.f32 %v3932_v33, %v6270_v52  ;;  %v1538_v12 = vmul.f32 %v3932_v33, %v4962_v41  ;;  %v1539_v20 = vmul.f32 %v3932_v33, %v4964_v4  ;;  %v1540_v30 = vmul.f32 %v3932_v33, %v6271_v47 }
 0x11d   : > { %v1541_v60 = vmul.f32 %v3932_v33, %v6272_v15  ;;  %v1542_v40 = vmul.f32 %v3932_v33, %v4966_v48  ;;  %v1543_v34 = vmul.f32 %v3932_v33, %v4968_v57  ;;  %v1544_v28 = vadd.f32 %v1528_v24, %v1495_v9  ;;  %v4989_v9 = vld [vmem:[#allocation2 + $0xc2] sm:$0xff] }
 0x11e   : > { %v1545_v29 = vadd.f32 %v1529_v55, %v1496_v54  ;;  %v1546_v31 = vadd.f32 %v1530_v5, %v1497_v26  ;;  %v1547_v51 = vadd.f32 %v1531_v7, %v1498_v16  ;;  %v1548_v10 = vadd.f32 %v1532_v62, %v1499_v53  ;;  %v4991_v54 = vld [vmem:[#allocation2 + $0xca] sm:$0xff]  ;;  %v4993_v26 = vld [vmem:[#allocation2 + $0xf2] sm:$0xff]  ;;  %v4995_v16 = vld [vmem:[#allocation2 + $0xfa] sm:$0xff] }
 0x11f   : > { %v1549_v45 = vadd.f32 %v1533_v11, %v1500_v49  ;;  %v1550_v25 = vadd.f32 %v1534_v50, %v1501_v35  ;;  %v1551_v32 = vadd.f32 %v1535_v19, %v1502_v46  ;;  %v1552_v0 = vadd.f32 %v1536_v2, %v1503_v21  ;;  %6273 = vst [vmem:[#allocation82_spill] sm:$0xff] %v4991_v54  ;;  %v6275_v35 = vld [vmem:[#allocation29_spill] sm:$0xff]  ;;  %v6276_v21 = vld [vmem:[#allocation30_spill] sm:$0xff]  ;;  %v6281_v5 = vld [vmem:[#allocation35_spill] sm:$0xff] }
 0x120   : > { %v1553_v1 = vadd.f32 %v1537_v14, %v1504_v27  ;;  %v1554_v52 = vadd.f32 %v1538_v12, %v1505_v44  ;;  %v1555_v47 = vadd.f32 %v1539_v20, %v1506_v6  ;;  %v1556_v15 = vadd.f32 %v1540_v30, %v1507_v17  ;;  %6274 = vst [vmem:[#allocation83_spill] sm:$0xff] %v4993_v26  ;;  %v6277_v44 = vld [vmem:[#allocation31_spill] sm:$0xff]  ;;  %v6280_v24 = vld [vmem:[#allocation34_spill] sm:$0xff]  ;;  %v6282_v62 = vld [vmem:[#allocation36_spill] sm:$0xff] }
 0x121   : > { %v1557_v48 = vadd.f32 %v1541_v60, %v1508_v13  ;;  %v1558_v4 = vadd.f32 %v1542_v40, %v1509_v38  ;;  %v1559_v33 = vadd.f32 %v1543_v34, %v1510_v18  ;;  %v1577_v53 = vmul.f32 %v3933_v23, %v4730_v63  ;;  %v6278_v38 = vld [vmem:[#allocation32_spill] sm:$0xff]  ;;  %v6279_v13 = vld [vmem:[#allocation33_spill] sm:$0xff]  ;;  %v6284_v2 = vld [vmem:[#allocation38_spill] sm:$0xff] }
 0x122   : > { %v1578_v49 = vmul.f32 %v3933_v23, %v4732_v56  ;;  %v1579_v46 = vmul.f32 %v3933_v23, %v6275_v35  ;;  %v1580_v27 = vmul.f32 %v3933_v23, %v6276_v21  ;;  %v1581_v6 = vmul.f32 %v3933_v23, %v6277_v44  ;;  %v6283_v50 = vld [vmem:[#allocation37_spill] sm:$0xff] }
 0x123   : > { %v1582_v17 = vmul.f32 %v3933_v23, %v6278_v38  ;;  %v1583_v18 = vmul.f32 %v3933_v23, %v6279_v13  ;;  %v1584_v55 = vmul.f32 %v3933_v23, %v6280_v24  ;;  %v1585_v7 = vmul.f32 %v3933_v23, %v6281_v5  ;;  %v3934_v35 = vld [vmem:[%s5767_s1 + $0x1b] ss:$0 sm:$0xff] }
 0x124   : > { %v1586_v11 = vmul.f32 %v3933_v23, %v6282_v62  ;;  %v1587_v63 = vmul.f32 %v3933_v23, %v4989_v9  ;;  %v1588_v56 = vmul.f32 %v3933_v23, %v4991_v54  ;;  %v1589_v19 = vmul.f32 %v3933_v23, %v6283_v50 }
 0x125   : > { %v1590_v14 = vmul.f32 %v3933_v23, %v6284_v2  ;;  %v1591_v12 = vmul.f32 %v3933_v23, %v4993_v26  ;;  %v1592_v20 = vmul.f32 %v3933_v23, %v4995_v16  ;;  %v1593_v30 = vadd.f32 %v1577_v53, %v1544_v28  ;;  %v5016_v28 = vld [vmem:[#allocation2 + $0xc3] sm:$0xff]  ;;  %v6292_v53 = vld [vmem:[#allocation44_spill] sm:$0xff] }
 0x126   : > { %v1594_v60 = vadd.f32 %v1578_v49, %v1545_v29  ;;  %v1595_v40 = vadd.f32 %v1579_v46, %v1546_v31  ;;  %v1596_v34 = vadd.f32 %v1580_v27, %v1547_v51  ;;  %v1597_v21 = vadd.f32 %v1581_v6, %v1548_v10  ;;  %v5018_v29 = vld [vmem:[#allocation2 + $0xcb] sm:$0xff]  ;;  %v5020_v31 = vld [vmem:[#allocation2 + $0xf3] sm:$0xff]  ;;  %v5022_v51 = vld [vmem:[#allocation2 + $0xfb] sm:$0xff] }
 0x127   : > { %v1598_v44 = vadd.f32 %v1582_v17, %v1549_v45  ;;  %v1599_v38 = vadd.f32 %v1583_v18, %v1550_v25  ;;  %v1600_v13 = vadd.f32 %v1584_v55, %v1551_v32  ;;  %v1601_v24 = vadd.f32 %v1585_v7, %v1552_v0  ;;  %6285 = vst [vmem:[#allocation84_spill] sm:$0xff] %v5018_v29  ;;  %v6287_v25 = vld [vmem:[#allocation39_spill] sm:$0xff]  ;;  %v6288_v0 = vld [vmem:[#allocation40_spill] sm:$0xff]  ;;  %v6293_v46 = vld [vmem:[#allocation45_spill] sm:$0xff] }
 0x128   : > { %v1602_v5 = vadd.f32 %v1586_v11, %v1553_v1  ;;  %v1603_v62 = vadd.f32 %v1587_v63, %v1554_v52  ;;  %v1604_v50 = vadd.f32 %v1588_v56, %v1555_v47  ;;  %v1605_v2 = vadd.f32 %v1589_v19, %v1556_v15  ;;  %6286 = vst [vmem:[#allocation85_spill] sm:$0xff] %v5020_v31  ;;  %v6289_v52 = vld [vmem:[#allocation41_spill] sm:$0xff]  ;;  %v6291_v15 = vld [vmem:[#allocation43_spill] sm:$0xff]  ;;  %v6294_v6 = vld [vmem:[#allocation46_spill] sm:$0xff] }
 0x129   : > { %v1606_v26 = vadd.f32 %v1590_v14, %v1557_v48  ;;  %v1607_v54 = vadd.f32 %v1591_v12, %v1558_v4  ;;  %v1608_v23 = vadd.f32 %v1592_v20, %v1559_v33  ;;  %v1626_v10 = vmul.f32 %v3934_v35, %v4771_v37  ;;  %v6290_v4 = vld [vmem:[#allocation42_spill] sm:$0xff]  ;;  %v6295_v18 = vld [vmem:[#allocation47_spill] sm:$0xff]  ;;  %v6296_v7 = vld [vmem:[#allocation48_spill] sm:$0xff] }
 0x12a   : > { %v1627_v45 = vmul.f32 %v3934_v35, %v4773_v42  ;;  %v1628_v32 = vmul.f32 %v3934_v35, %v6287_v25  ;;  %v1629_v1 = vmul.f32 %v3934_v35, %v6288_v0  ;;  %v1630_v48 = vmul.f32 %v3934_v35, %v6289_v52  ;;  %v3935_v25 = vld [vmem:[%s5767_s1 + $0x1c] ss:$0 sm:$0xff] }
 0x12b   : > { %v1631_v47 = vmul.f32 %v3934_v35, %v6290_v4  ;;  %v1632_v33 = vmul.f32 %v3934_v35, %v6291_v15  ;;  %v1633_v49 = vmul.f32 %v3934_v35, %v6292_v53  ;;  %v1634_v27 = vmul.f32 %v3934_v35, %v6293_v46 }
 0x12c   : > { %v1635_v17 = vmul.f32 %v3934_v35, %v6294_v6  ;;  %v1636_v37 = vmul.f32 %v3934_v35, %v5016_v28  ;;  %v1637_v42 = vmul.f32 %v3934_v35, %v5018_v29  ;;  %v1638_v55 = vmul.f32 %v3934_v35, %v6295_v18 }
 0x12d   : > { %v1639_v11 = vmul.f32 %v3934_v35, %v6296_v7  ;;  %v1640_v63 = vmul.f32 %v3934_v35, %v5020_v31  ;;  %v1641_v56 = vmul.f32 %v3934_v35, %v5022_v51  ;;  %v1642_v19 = vadd.f32 %v1626_v10, %v1593_v30  ;;  %v5043_v30 = vld [vmem:[#allocation2 + $0xc4] sm:$0xff] }
 0x12e   : > { %v1643_v14 = vadd.f32 %v1627_v45, %v1594_v60  ;;  %v1644_v12 = vadd.f32 %v1628_v32, %v1595_v40  ;;  %v1645_v20 = vadd.f32 %v1629_v1, %v1596_v34  ;;  %v1646_v0 = vadd.f32 %v1630_v48, %v1597_v21  ;;  %v5045_v60 = vld [vmem:[#allocation2 + $0xcc] sm:$0xff]  ;;  %v5047_v40 = vld [vmem:[#allocation2 + $0xf4] sm:$0xff]  ;;  %v5049_v34 = vld [vmem:[#allocation2 + $0xfc] sm:$0xff] }
 0x12f   : > { %v1647_v52 = vadd.f32 %v1631_v47, %v1598_v44  ;;  %v1648_v4 = vadd.f32 %v1632_v33, %v1599_v38  ;;  %v1649_v15 = vadd.f32 %v1633_v49, %v1600_v13  ;;  %v1650_v53 = vadd.f32 %v1634_v27, %v1601_v24  ;;  %6297 = vst [vmem:[#allocation86_spill] sm:$0xff] %v5045_v60  ;;  %v6299_v38 = vld [vmem:[#allocation49_spill] sm:$0xff]  ;;  %v6300_v24 = vld [vmem:[#allocation50_spill] sm:$0xff]  ;;  %v6305_v32 = vld [vmem:[#allocation55_spill] sm:$0xff] }
 0x130   : > { %v1651_v46 = vadd.f32 %v1635_v17, %v1602_v5  ;;  %v1652_v6 = vadd.f32 %v1636_v37, %v1603_v62  ;;  %v1653_v18 = vadd.f32 %v1637_v42, %v1604_v50  ;;  %v1654_v7 = vadd.f32 %v1638_v55, %v1605_v2  ;;  %6298 = vst [vmem:[#allocation87_spill] sm:$0xff] %v5047_v40  ;;  %v6301_v62 = vld [vmem:[#allocation51_spill] sm:$0xff]  ;;  %v6303_v2 = vld [vmem:[#allocation53_spill] sm:$0xff]  ;;  %v6304_v10 = vld [vmem:[#allocation54_spill] sm:$0xff] }
 0x131   : > { %v1655_v31 = vadd.f32 %v1639_v11, %v1606_v26  ;;  %v1656_v29 = vadd.f32 %v1640_v63, %v1607_v54  ;;  %v1657_v35 = vadd.f32 %v1641_v56, %v1608_v23  ;;  %v1675_v21 = vmul.f32 %v3935_v25, %v4812_v39  ;;  %v6302_v54 = vld [vmem:[#allocation52_spill] sm:$0xff]  ;;  %v6307_v33 = vld [vmem:[#allocation57_spill] sm:$0xff]  ;;  %v6308_v27 = vld [vmem:[#allocation58_spill] sm:$0xff] }
 0x132   : > { %v1676_v44 = vmul.f32 %v3935_v25, %v4814_v59  ;;  %v1677_v13 = vmul.f32 %v3935_v25, %v6299_v38  ;;  %v1678_v5 = vmul.f32 %v3935_v25, %v6300_v24  ;;  %v1679_v26 = vmul.f32 %v3935_v25, %v6301_v62  ;;  %v6306_v48 = vld [vmem:[#allocation56_spill] sm:$0xff]  ;;  %v3936_v38 = vld [vmem:[%s5767_s1 + $0x1d] ss:$0 sm:$0xff] }
 0x133   : > { %v1680_v50 = vmul.f32 %v3935_v25, %v6302_v54  ;;  %v1681_v23 = vmul.f32 %v3935_v25, %v6303_v2  ;;  %v1682_v45 = vmul.f32 %v3935_v25, %v6304_v10  ;;  %v1683_v1 = vmul.f32 %v3935_v25, %v6305_v32 }
 0x134   : > { %v1684_v47 = vmul.f32 %v3935_v25, %v6306_v48  ;;  %v1685_v39 = vmul.f32 %v3935_v25, %v5043_v30  ;;  %v1686_v59 = vmul.f32 %v3935_v25, %v5045_v60  ;;  %v1687_v49 = vmul.f32 %v3935_v25, %v6307_v33 }
 0x135   : > { %v1688_v17 = vmul.f32 %v3935_v25, %v6308_v27  ;;  %v1689_v37 = vmul.f32 %v3935_v25, %v5047_v40  ;;  %v1690_v42 = vmul.f32 %v3935_v25, %v5049_v34  ;;  %v1691_v55 = vadd.f32 %v1675_v21, %v1642_v19  ;;  %v5070_v19 = vld [vmem:[#allocation2 + $0xc5] sm:$0xff]  ;;  %v6316_v21 = vld [vmem:[#allocation64_spill] sm:$0xff] }
 0x136   : > { %v1692_v11 = vadd.f32 %v1676_v44, %v1643_v14  ;;  %v1693_v63 = vadd.f32 %v1677_v13, %v1644_v12  ;;  %v1694_v56 = vadd.f32 %v1678_v5, %v1645_v20  ;;  %v1695_v24 = vadd.f32 %v1679_v26, %v1646_v0  ;;  %v5072_v14 = vld [vmem:[#allocation2 + $0xcd] sm:$0xff]  ;;  %v5074_v12 = vld [vmem:[#allocation2 + $0xf5] sm:$0xff]  ;;  %v5076_v20 = vld [vmem:[#allocation2 + $0xfd] sm:$0xff] }
 0x137   : > { %v1696_v62 = vadd.f32 %v1680_v50, %v1647_v52  ;;  %v1697_v54 = vadd.f32 %v1681_v23, %v1648_v4  ;;  %v1698_v2 = vadd.f32 %v1682_v45, %v1649_v15  ;;  %v1699_v10 = vadd.f32 %v1683_v1, %v1650_v53  ;;  %6309 = vst [vmem:[#allocation88_spill] sm:$0xff] %v5072_v14  ;;  %v6311_v4 = vld [vmem:[#allocation59_spill] sm:$0xff]  ;;  %v6312_v53 = vld [vmem:[#allocation60_spill] sm:$0xff]  ;;  %v6317_v13 = vld [vmem:[#allocation65_spill] sm:$0xff] }
 0x138   : > { %v1700_v32 = vadd.f32 %v1684_v47, %v1651_v46  ;;  %v1701_v48 = vadd.f32 %v1685_v39, %v1652_v6  ;;  %v1702_v33 = vadd.f32 %v1686_v59, %v1653_v18  ;;  %v1703_v27 = vadd.f32 %v1687_v49, %v1654_v7  ;;  %6310 = vst [vmem:[#allocation89_spill] sm:$0xff] %v5074_v12  ;;  %v6313_v6 = vld [vmem:[#allocation61_spill] sm:$0xff]  ;;  %v6315_v7 = vld [vmem:[#allocation63_spill] sm:$0xff]  ;;  %v6318_v26 = vld [vmem:[#allocation66_spill] sm:$0xff] }
 0x139   : > { %v1704_v40 = vadd.f32 %v1688_v17, %v1655_v31  ;;  %v1705_v60 = vadd.f32 %v1689_v37, %v1656_v29  ;;  %v1706_v25 = vadd.f32 %v1690_v42, %v1657_v35  ;;  %v1724_v0 = vmul.f32 %v3936_v38, %v4853_v61  ;;  %v6314_v29 = vld [vmem:[#allocation62_spill] sm:$0xff]  ;;  %v6319_v23 = vld [vmem:[#allocation67_spill] sm:$0xff]  ;;  %v6320_v1 = vld [vmem:[#allocation68_spill] sm:$0xff] }
 0x13a   : > { %v1725_v52 = vmul.f32 %v3936_v38, %v4855_v43  ;;  %v1726_v15 = vmul.f32 %v3936_v38, %v6311_v4  ;;  %v1727_v46 = vmul.f32 %v3936_v38, %v6312_v53  ;;  %v1728_v31 = vmul.f32 %v3936_v38, %v6313_v6  ;;  %v3937_v4 = vld [vmem:[%s5767_s1 + $0x1e] ss:$0 sm:$0xff] }
 0x13b   : > { %v1729_v18 = vmul.f32 %v3936_v38, %v6314_v29  ;;  %v1730_v35 = vmul.f32 %v3936_v38, %v6315_v7  ;;  %v1731_v44 = vmul.f32 %v3936_v38, %v6316_v21  ;;  %v1732_v5 = vmul.f32 %v3936_v38, %v6317_v13 }
 0x13c   : > { %v1733_v50 = vmul.f32 %v3936_v38, %v6318_v26  ;;  %v1734_v61 = vmul.f32 %v3936_v38, %v5070_v19  ;;  %v1735_v43 = vmul.f32 %v3936_v38, %v5072_v14  ;;  %v1736_v45 = vmul.f32 %v3936_v38, %v6319_v23 }
 0x13d   : > { %v1737_v47 = vmul.f32 %v3936_v38, %v6320_v1  ;;  %v1738_v39 = vmul.f32 %v3936_v38, %v5074_v12  ;;  %v1739_v59 = vmul.f32 %v3936_v38, %v5076_v20  ;;  %v1740_v49 = vadd.f32 %v1724_v0, %v1691_v55  ;;  %v5097_v55 = vld [vmem:[#allocation2 + $0xc6] sm:$0xff] }
 0x13e   : > { %v1741_v17 = vadd.f32 %v1725_v52, %v1692_v11  ;;  %v1742_v37 = vadd.f32 %v1726_v15, %v1693_v63  ;;  %v1743_v42 = vadd.f32 %v1727_v46, %v1694_v56  ;;  %v1744_v53 = vadd.f32 %v1728_v31, %v1695_v24  ;;  %v5099_v11 = vld [vmem:[#allocation2 + $0xce] sm:$0xff]  ;;  %v5101_v63 = vld [vmem:[#allocation2 + $0xf6] sm:$0xff]  ;;  %v5103_v56 = vld [vmem:[#allocation2 + $0xfe] sm:$0xff] }
 0x13f   : > { %v1745_v6 = vadd.f32 %v1729_v18, %v1696_v62  ;;  %v1746_v29 = vadd.f32 %v1730_v35, %v1697_v54  ;;  %v1747_v7 = vadd.f32 %v1731_v44, %v1698_v2  ;;  %v1748_v21 = vadd.f32 %v1732_v5, %v1699_v10  ;;  %v6321_v62 = vld [vmem:[#allocation69_spill] sm:$0xff]  ;;  %v6322_v2 = vld [vmem:[#allocation70_spill] sm:$0xff]  ;;  %v6327_v52 = vld [vmem:[#allocation75_spill] sm:$0xff] }
 0x140   : > { %v1749_v13 = vadd.f32 %v1733_v50, %v1700_v32  ;;  %v1750_v26 = vadd.f32 %v1734_v61, %v1701_v48  ;;  %v1751_v23 = vadd.f32 %v1735_v43, %v1702_v33  ;;  %v1752_v1 = vadd.f32 %v1736_v45, %v1703_v27  ;;  %v6323_v32 = vld [vmem:[#allocation71_spill] sm:$0xff]  ;;  %v6324_v33 = vld [vmem:[#allocation72_spill] sm:$0xff]  ;;  %v6329_v18 = vld [vmem:[#allocation77_spill] sm:$0xff] }
 0x141   : > { %v1753_v12 = vadd.f32 %v1737_v47, %v1704_v40  ;;  %v1754_v14 = vadd.f32 %v1738_v39, %v1705_v60  ;;  %v1755_v38 = vadd.f32 %v1739_v59, %v1706_v25  ;;  %v1773_v24 = vmul.f32 %v3937_v4, %v4894_v58  ;;  %v6325_v60 = vld [vmem:[#allocation73_spill] sm:$0xff]  ;;  %v6326_v25 = vld [vmem:[#allocation74_spill] sm:$0xff]  ;;  %v6328_v46 = vld [vmem:[#allocation76_spill] sm:$0xff] }
 0x142   : > { %v1774_v54 = vmul.f32 %v3937_v4, %v6321_v62  ;;  %v1775_v10 = vmul.f32 %v3937_v4, %v6322_v2  ;;  %v1776_v48 = vmul.f32 %v3937_v4, %v6323_v32  ;;  %v1777_v40 = vmul.f32 %v3937_v4, %v6324_v33  ;;  %v6330_v5 = vld [vmem:[#allocation78_spill] sm:$0xff]  ;;  %v3508_v32 = vld [vmem:[#allocation2 + $0x68] sm:$0xff] }
 0x143   : > { %v1778_v27 = vmul.f32 %v3937_v4, %v6325_v60  ;;  %v1779_v0 = vmul.f32 %v3937_v4, %v6326_v25  ;;  %v1780_v15 = vmul.f32 %v3937_v4, %v6327_v52  ;;  %v1781_v31 = vmul.f32 %v3937_v4, %v6328_v46  ;;  %v3507_v2 = vld [vmem:[#allocation2 + $0x60] sm:$0xff] }
 0x144   : > { %v1782_v35 = vmul.f32 %v3937_v4, %v6329_v18  ;;  %v1783_v58 = vmul.f32 %v3937_v4, %v5097_v55  ;;  %v1784_v44 = vmul.f32 %v3937_v4, %v5099_v11  ;;  %v1785_v50 = vmul.f32 %v3937_v4, %v6330_v5  ;;  %v3938_v33 = vld [vmem:[%s5767_s1 + $0x20] ss:$0 sm:$0xff]  ;;  %v5124_v18 = vld [vmem:[#allocation2 + $0x78] sm:$0xff]  ;;  %v5128_v5 = vld [vmem:[#allocation2 + $0x90] sm:$0xff] }
 0x145   : > { %v1786_v61 = vmul.f32 %v3937_v4, %v4916_v22  ;;  %v1787_v43 = vmul.f32 %v3937_v4, %v5101_v63  ;;  %v1788_v45 = vmul.f32 %v3937_v4, %v5103_v56  ;;  %v1789_v47 = vadd.f32 %v1773_v24, %v1740_v49  ;;  %v5126_v22 = vld [vmem:[#allocation2 + $0x80] sm:$0xff]  ;;  %6331 = vst [vmem:[#allocation90_spill] sm:$0xff] %v5128_v5  ;;  %v5130_v4 = vld [vmem:[#allocation2 + $0x98] sm:$0xff]  ;;  %v5132_v24 = vld [vmem:[#allocation2 + $0xa8] sm:$0xff] }
 0x146   : > { %v1790_v39 = vadd.f32 %v1774_v54, %v1741_v17  ;;  %v1791_v59 = vadd.f32 %v1775_v10, %v1742_v37  ;;  %v1792_v62 = vadd.f32 %v1776_v48, %v1743_v42  ;;  %v1793_v60 = vadd.f32 %v1777_v40, %v1744_v53  ;;  %6332 = vst [vmem:[#allocation91_spill] sm:$0xff] %v5130_v4  ;;  %v5134_v54 = vld [vmem:[#allocation2 + $0xb0] sm:$0xff]  ;;  %v5136_v10 = vld [vmem:[#allocation2 + $0xd8] sm:$0xff]  ;;  %v5138_v48 = vld [vmem:[#allocation2 + $0xe0] sm:$0xff] }
 0x147   : > { %v1794_v25 = vadd.f32 %v1778_v27, %v1745_v6  ;;  %v1795_v52 = vadd.f32 %v1779_v0, %v1746_v29  ;;  %v1796_v46 = vadd.f32 %v1780_v15, %v1747_v7  ;;  %v1797_v49 = vadd.f32 %v1781_v31, %v1748_v21  ;;  %6333 = vst [vmem:[#allocation92_spill] sm:$0xff] %v5132_v24  ;;  %v5140_v40 = vld [vmem:[#allocation2 + $0x108] sm:$0xff]  ;;  %v5142_v21 = vld [vmem:[#allocation2 + $0x110] sm:$0xff] }
 0x148   : > { %v1798_v17 = vadd.f32 %v1782_v35, %v1749_v13  ;;  %v1799_v37 = vadd.f32 %v1783_v58, %v1750_v26  ;;  %v1800_v42 = vadd.f32 %v1784_v44, %v1751_v23  ;;  %6334 = vst [vmem:[#allocation10_spill] sm:$0xff] %v5134_v54  ;;  %v1801_v53 = vadd.f32 %v1785_v50, %v1752_v1  ;;  %v6338_v58 = vld [vmem:[#allocation79_spill] sm:$0xff] }
 0x149   : > { %v1802_v6 = vadd.f32 %v1786_v61, %v1753_v12  ;;  %v1803_v29 = vadd.f32 %v1787_v43, %v1754_v14  ;;  %v1804_v7 = vadd.f32 %v1788_v45, %v1755_v38  ;;  %6335 = vst [vmem:[#allocation11_spill] sm:$0xff] %v5136_v10  ;;  %v1824_v13 = vmul.f32 %v3938_v33, %v3507_v2 }
 0x14a   : > { %6336 = vst [vmem:[#allocation12_spill] sm:$0xff] %v5138_v48  ;;  %v1825_v26 = vmul.f32 %v3938_v33, %v3508_v32  ;;  %v1826_v23 = vmul.f32 %v3938_v33, %v5124_v18  ;;  %v1827_v27 = vmul.f32 %v3938_v33, %v5126_v22  ;;  %v1828_v0 = vmul.f32 %v3938_v33, %v5128_v5  ;;  %v5161_v5 = vld [vmem:[#allocation2 + $0x79] sm:$0xff] }
 0x14b   : > { %6337 = vst [vmem:[#allocation13_spill] sm:$0xff] %v5140_v40  ;;  %v1829_v12 = vmul.f32 %v3938_v33, %v5130_v4  ;;  %v1830_v14 = vmul.f32 %v3938_v33, %v5132_v24  ;;  %v1831_v1 = vmul.f32 %v3938_v33, %v5134_v54  ;;  %v1832_v38 = vmul.f32 %v3938_v33, %v4935_v36  ;;  %v3523_v24 = vld [vmem:[#allocation2 + $0x61] sm:$0xff]  ;;  %v3524_v36 = vld [vmem:[#allocation2 + $0x69] sm:$0xff] }
 0x14c   : > { %v1833_v15 = vmul.f32 %v3938_v33, %v4937_v8  ;;  %v1834_v31 = vmul.f32 %v3938_v33, %v5136_v10  ;;  %v1835_v35 = vmul.f32 %v3938_v33, %v5138_v48  ;;  %v1836_v44 = vmul.f32 %v3938_v33, %v6338_v58  ;;  %v3939_v8 = vld [vmem:[%s5767_s1 + $0x21] ss:$0 sm:$0xff] }
 0x14d   : > { %v1837_v50 = vmul.f32 %v3938_v33, %v4941_v3  ;;  %v1838_v61 = vmul.f32 %v3938_v33, %v5140_v40  ;;  %v1839_v43 = vmul.f32 %v3938_v33, %v5142_v21  ;;  %v1840_v45 = vadd.f32 %v1824_v13, %v1789_v47  ;;  %v5163_v3 = vld [vmem:[#allocation2 + $0x81] sm:$0xff]  ;;  %v5165_v40 = vld [vmem:[#allocation2 + $0x91] sm:$0xff]  ;;  %v5167_v33 = vld [vmem:[#allocation2 + $0x99] sm:$0xff] }
 0x14e   : > { %v1841_v2 = vadd.f32 %v1825_v26, %v1790_v39  ;;  %v1842_v32 = vadd.f32 %v1826_v23, %v1791_v59  ;;  %v1843_v54 = vadd.f32 %v1827_v27, %v1792_v62  ;;  %v1844_v10 = vadd.f32 %v1828_v0, %v1793_v60  ;;  %6339 = vst [vmem:[#allocation14_spill] sm:$0xff] %v5163_v3  ;;  %v5169_v13 = vld [vmem:[#allocation2 + $0xa9] sm:$0xff]  ;;  %v5171_v26 = vld [vmem:[#allocation2 + $0xb1] sm:$0xff]  ;;  %v5173_v23 = vld [vmem:[#allocation2 + $0xd9] sm:$0xff] }
 0x14f   : > { %v1845_v48 = vadd.f32 %v1829_v12, %v1794_v25  ;;  %v1846_v4 = vadd.f32 %v1830_v14, %v1795_v52  ;;  %v1847_v58 = vadd.f32 %v1831_v1, %v1796_v46  ;;  %6340 = vst [vmem:[#allocation15_spill] sm:$0xff] %v5165_v40  ;;  %v1848_v47 = vadd.f32 %v1832_v38, %v1797_v49  ;;  %v5175_v27 = vld [vmem:[#allocation2 + $0xe1] sm:$0xff]  ;;  %v5177_v0 = vld [vmem:[#allocation2 + $0x109] sm:$0xff]  ;;  %v5179_v49 = vld [vmem:[#allocation2 + $0x111] sm:$0xff] }
 0x150   : > { %v1849_v39 = vadd.f32 %v1833_v15, %v1798_v17  ;;  %v1850_v59 = vadd.f32 %v1834_v31, %v1799_v37  ;;  %v1851_v62 = vadd.f32 %v1835_v35, %v1800_v42  ;;  %6341 = vst [vmem:[#allocation16_spill] sm:$0xff] %v5167_v33  ;;  %v1852_v60 = vadd.f32 %v1836_v44, %v1801_v53  ;;  %v6347_v1 = vld [vmem:[#allocation80_spill] sm:$0xff]  ;;  %v6348_v31 = vld [vmem:[#allocation81_spill] sm:$0xff] }
 0x151   : > { %6342 = vst [vmem:[#allocation17_spill] sm:$0xff] %v5169_v13  ;;  %v1853_v25 = vadd.f32 %v1837_v50, %v1802_v6  ;;  %v1854_v52 = vadd.f32 %v1838_v61, %v1803_v29  ;;  %v1855_v46 = vadd.f32 %v1839_v43, %v1804_v7  ;;  %v1873_v17 = vmul.f32 %v3939_v8, %v3523_v24 }
 0x152   : > { %6343 = vst [vmem:[#allocation18_spill] sm:$0xff] %v5171_v26  ;;  %v1874_v37 = vmul.f32 %v3939_v8, %v3524_v36  ;;  %v1875_v42 = vmul.f32 %v3939_v8, %v5161_v5  ;;  %v1876_v12 = vmul.f32 %v3939_v8, %v5163_v3  ;;  %v1877_v14 = vmul.f32 %v3939_v8, %v5165_v40  ;;  %v5198_v3 = vld [vmem:[#allocation2 + $0x7a] sm:$0xff] }
 0x153   : > { %6344 = vst [vmem:[#allocation19_spill] sm:$0xff] %v5173_v23  ;;  %v1878_v53 = vmul.f32 %v3939_v8, %v5167_v33  ;;  %v1879_v6 = vmul.f32 %v3939_v8, %v5169_v13  ;;  %v1880_v29 = vmul.f32 %v3939_v8, %v5171_v26  ;;  %v1881_v7 = vmul.f32 %v3939_v8, %v4962_v41  ;;  %v3539_v33 = vld [vmem:[#allocation2 + $0x62] sm:$0xff]  ;;  %v3540_v41 = vld [vmem:[#allocation2 + $0x6a] sm:$0xff] }
 0x154   : > { %6345 = vst [vmem:[#allocation20_spill] sm:$0xff] %v5175_v27  ;;  %v1882_v38 = vmul.f32 %v3939_v8, %v6347_v1  ;;  %v1883_v15 = vmul.f32 %v3939_v8, %v5173_v23  ;;  %v1884_v24 = vmul.f32 %v3939_v8, %v5175_v27  ;;  %v1885_v35 = vmul.f32 %v3939_v8, %v6348_v31  ;;  %v3940_v1 = vld [vmem:[%s5767_s1 + $0x22] ss:$0 sm:$0xff] }
 0x155   : > { %6346 = vst [vmem:[#allocation21_spill] sm:$0xff] %v5177_v0  ;;  %v1886_v44 = vmul.f32 %v3939_v8, %v4968_v57  ;;  %v1887_v50 = vmul.f32 %v3939_v8, %v5177_v0  ;;  %v1888_v61 = vmul.f32 %v3939_v8, %v5179_v49  ;;  %v1889_v43 = vadd.f32 %v1873_v17, %v1840_v45  ;;  %v5200_v57 = vld [vmem:[#allocation2 + $0x82] sm:$0xff]  ;;  %v5202_v0 = vld [vmem:[#allocation2 + $0x92] sm:$0xff]  ;;  %v5204_v8 = vld [vmem:[#allocation2 + $0x9a] sm:$0xff] }
 0x156   : > { %v1890_v36 = vadd.f32 %v1874_v37, %v1841_v2  ;;  %v1891_v13 = vadd.f32 %v1875_v42, %v1842_v32  ;;  %v1892_v26 = vadd.f32 %v1876_v12, %v1843_v54  ;;  %v1893_v23 = vadd.f32 %v1877_v14, %v1844_v10  ;;  %6349 = vst [vmem:[#allocation22_spill] sm:$0xff] %v5200_v57  ;;  %v5206_v17 = vld [vmem:[#allocation2 + $0xaa] sm:$0xff]  ;;  %v5208_v37 = vld [vmem:[#allocation2 + $0xb2] sm:$0xff]  ;;  %v5210_v42 = vld [vmem:[#allocation2 + $0xda] sm:$0xff] }
 0x157   : > { %v1894_v27 = vadd.f32 %v1878_v53, %v1845_v48  ;;  %v1895_v40 = vadd.f32 %v1879_v6, %v1846_v4  ;;  %v1896_v31 = vadd.f32 %v1880_v29, %v1847_v58  ;;  %6350 = vst [vmem:[#allocation23_spill] sm:$0xff] %v5202_v0  ;;  %v1897_v45 = vadd.f32 %v1881_v7, %v1848_v47  ;;  %v5212_v12 = vld [vmem:[#allocation2 + $0xe2] sm:$0xff]  ;;  %v5214_v14 = vld [vmem:[#allocation2 + $0x10a] sm:$0xff]  ;;  %v5216_v47 = vld [vmem:[#allocation2 + $0x112] sm:$0xff] }
 0x158   : > { %v1898_v2 = vadd.f32 %v1882_v38, %v1849_v39  ;;  %v1899_v32 = vadd.f32 %v1883_v15, %v1850_v59  ;;  %v1900_v54 = vadd.f32 %v1884_v24, %v1851_v62  ;;  %6351 = vst [vmem:[#allocation24_spill] sm:$0xff] %v5204_v8  ;;  %v1901_v10 = vadd.f32 %v1885_v35, %v1852_v60  ;;  %v6357_v29 = vld [vmem:[#allocation82_spill] sm:$0xff]  ;;  %v6358_v15 = vld [vmem:[#allocation83_spill] sm:$0xff] }
 0x159   : > { %6352 = vst [vmem:[#allocation25_spill] sm:$0xff] %v5206_v17  ;;  %v1902_v48 = vadd.f32 %v1886_v44, %v1853_v25  ;;  %v1903_v4 = vadd.f32 %v1887_v50, %v1854_v52  ;;  %v1904_v58 = vadd.f32 %v1888_v61, %v1855_v46  ;;  %v1922_v39 = vmul.f32 %v3940_v1, %v3539_v33 }
 0x15a   : > { %6353 = vst [vmem:[#allocation26_spill] sm:$0xff] %v5208_v37  ;;  %v1923_v59 = vmul.f32 %v3940_v1, %v3540_v41  ;;  %v1924_v62 = vmul.f32 %v3940_v1, %v5198_v3  ;;  %v1925_v53 = vmul.f32 %v3940_v1, %v5200_v57  ;;  %v1926_v6 = vmul.f32 %v3940_v1, %v5202_v0  ;;  %v5235_v57 = vld [vmem:[#allocation2 + $0x7b] sm:$0xff] }
 0x15b   : > { %6354 = vst [vmem:[#allocation27_spill] sm:$0xff] %v5210_v42  ;;  %v1927_v60 = vmul.f32 %v3940_v1, %v5204_v8  ;;  %v1928_v25 = vmul.f32 %v3940_v1, %v5206_v17  ;;  %v1929_v52 = vmul.f32 %v3940_v1, %v5208_v37  ;;  %v1930_v46 = vmul.f32 %v3940_v1, %v4989_v9  ;;  %v3555_v8 = vld [vmem:[#allocation2 + $0x63] sm:$0xff]  ;;  %v3556_v9 = vld [vmem:[#allocation2 + $0x6b] sm:$0xff] }
 0x15c   : > { %6355 = vst [vmem:[#allocation28_spill] sm:$0xff] %v5212_v12  ;;  %v1931_v7 = vmul.f32 %v3940_v1, %v6357_v29  ;;  %v1932_v38 = vmul.f32 %v3940_v1, %v5210_v42  ;;  %v1933_v33 = vmul.f32 %v3940_v1, %v5212_v12  ;;  %v1934_v24 = vmul.f32 %v3940_v1, %v6358_v15  ;;  %v3941_v29 = vld [vmem:[%s5767_s1 + $0x23] ss:$0 sm:$0xff] }
 0x15d   : > { %6356 = vst [vmem:[#allocation29_spill] sm:$0xff] %v5214_v14  ;;  %v1935_v35 = vmul.f32 %v3940_v1, %v4995_v16  ;;  %v1936_v44 = vmul.f32 %v3940_v1, %v5214_v14  ;;  %v1937_v50 = vmul.f32 %v3940_v1, %v5216_v47  ;;  %v1938_v61 = vadd.f32 %v1922_v39, %v1889_v43  ;;  %v5237_v16 = vld [vmem:[#allocation2 + $0x83] sm:$0xff]  ;;  %v5239_v14 = vld [vmem:[#allocation2 + $0x93] sm:$0xff]  ;;  %v5241_v1 = vld [vmem:[#allocation2 + $0x9b] sm:$0xff] }
 0x15e   : > { %v1939_v41 = vadd.f32 %v1923_v59, %v1890_v36  ;;  %v1940_v17 = vadd.f32 %v1924_v62, %v1891_v13  ;;  %v1941_v37 = vadd.f32 %v1925_v53, %v1892_v26  ;;  %v1942_v42 = vadd.f32 %v1926_v6, %v1893_v23  ;;  %6359 = vst [vmem:[#allocation30_spill] sm:$0xff] %v5237_v16  ;;  %v5243_v39 = vld [vmem:[#allocation2 + $0xab] sm:$0xff]  ;;  %v5245_v59 = vld [vmem:[#allocation2 + $0xb3] sm:$0xff]  ;;  %v5247_v62 = vld [vmem:[#allocation2 + $0xdb] sm:$0xff] }
 0x15f   : > { %v1943_v12 = vadd.f32 %v1927_v60, %v1894_v27  ;;  %v1944_v0 = vadd.f32 %v1928_v25, %v1895_v40  ;;  %v1945_v15 = vadd.f32 %v1929_v52, %v1896_v31  ;;  %6360 = vst [vmem:[#allocation31_spill] sm:$0xff] %v5239_v14  ;;  %v1946_v43 = vadd.f32 %v1930_v46, %v1897_v45  ;;  %v5249_v53 = vld [vmem:[#allocation2 + $0xe3] sm:$0xff]  ;;  %v5251_v6 = vld [vmem:[#allocation2 + $0x10b] sm:$0xff]  ;;  %v5253_v45 = vld [vmem:[#allocation2 + $0x113] sm:$0xff] }
 0x160   : > { %v1947_v36 = vadd.f32 %v1931_v7, %v1898_v2  ;;  %v1948_v13 = vadd.f32 %v1932_v38, %v1899_v32  ;;  %v1949_v26 = vadd.f32 %v1933_v33, %v1900_v54  ;;  %6361 = vst [vmem:[#allocation32_spill] sm:$0xff] %v5241_v1  ;;  %v1950_v23 = vadd.f32 %v1934_v24, %v1901_v10  ;;  %v6367_v52 = vld [vmem:[#allocation84_spill] sm:$0xff]  ;;  %v6368_v38 = vld [vmem:[#allocation85_spill] sm:$0xff] }
 0x161   : > { %6362 = vst [vmem:[#allocation33_spill] sm:$0xff] %v5243_v39  ;;  %v1951_v27 = vadd.f32 %v1935_v35, %v1902_v48  ;;  %v1952_v40 = vadd.f32 %v1936_v44, %v1903_v4  ;;  %v1953_v31 = vadd.f32 %v1937_v50, %v1904_v58  ;;  %v1971_v2 = vmul.f32 %v3941_v29, %v3555_v8 }
 0x162   : > { %6363 = vst [vmem:[#allocation34_spill] sm:$0xff] %v5245_v59  ;;  %v1972_v32 = vmul.f32 %v3941_v29, %v3556_v9  ;;  %v1973_v54 = vmul.f32 %v3941_v29, %v5235_v57  ;;  %v1974_v60 = vmul.f32 %v3941_v29, %v5237_v16  ;;  %v1975_v25 = vmul.f32 %v3941_v29, %v5239_v14  ;;  %v5272_v16 = vld [vmem:[#allocation2 + $0x7c] sm:$0xff] }
 0x163   : > { %6364 = vst [vmem:[#allocation35_spill] sm:$0xff] %v5247_v62  ;;  %v1976_v10 = vmul.f32 %v3941_v29, %v5241_v1  ;;  %v1977_v48 = vmul.f32 %v3941_v29, %v5243_v39  ;;  %v1978_v4 = vmul.f32 %v3941_v29, %v5245_v59  ;;  %v1979_v58 = vmul.f32 %v3941_v29, %v5016_v28  ;;  %v3571_v1 = vld [vmem:[#allocation2 + $0x64] sm:$0xff]  ;;  %v3572_v28 = vld [vmem:[#allocation2 + $0x6c] sm:$0xff] }
 0x164   : > { %6365 = vst [vmem:[#allocation36_spill] sm:$0xff] %v5249_v53  ;;  %v1980_v46 = vmul.f32 %v3941_v29, %v6367_v52  ;;  %v1981_v7 = vmul.f32 %v3941_v29, %v5247_v62  ;;  %v1982_v8 = vmul.f32 %v3941_v29, %v5249_v53  ;;  %v1983_v33 = vmul.f32 %v3941_v29, %v6368_v38  ;;  %v3942_v52 = vld [vmem:[%s5767_s1 + $0x24] ss:$0 sm:$0xff] }
 0x165   : > { %6366 = vst [vmem:[#allocation37_spill] sm:$0xff] %v5251_v6  ;;  %v1984_v24 = vmul.f32 %v3941_v29, %v5022_v51  ;;  %v1985_v35 = vmul.f32 %v3941_v29, %v5251_v6  ;;  %v1986_v44 = vmul.f32 %v3941_v29, %v5253_v45  ;;  %v1987_v50 = vadd.f32 %v1971_v2, %v1938_v61  ;;  %v5274_v51 = vld [vmem:[#allocation2 + $0x84] sm:$0xff]  ;;  %v5276_v6 = vld [vmem:[#allocation2 + $0x94] sm:$0xff]  ;;  %v5278_v29 = vld [vmem:[#allocation2 + $0x9c] sm:$0xff] }
 0x166   : > { %v1988_v9 = vadd.f32 %v1972_v32, %v1939_v41  ;;  %v1989_v39 = vadd.f32 %v1973_v54, %v1940_v17  ;;  %v1990_v59 = vadd.f32 %v1974_v60, %v1941_v37  ;;  %v1991_v62 = vadd.f32 %v1975_v25, %v1942_v42  ;;  %6369 = vst [vmem:[#allocation38_spill] sm:$0xff] %v5274_v51  ;;  %v5280_v2 = vld [vmem:[#allocation2 + $0xac] sm:$0xff]  ;;  %v5282_v32 = vld [vmem:[#allocation2 + $0xb4] sm:$0xff]  ;;  %v5284_v54 = vld [vmem:[#allocation2 + $0xdc] sm:$0xff] }
 0x167   : > { %v1992_v53 = vadd.f32 %v1976_v10, %v1943_v12  ;;  %v1993_v14 = vadd.f32 %v1977_v48, %v1944_v0  ;;  %v1994_v38 = vadd.f32 %v1978_v4, %v1945_v15  ;;  %6370 = vst [vmem:[#allocation39_spill] sm:$0xff] %v5276_v6  ;;  %v1995_v61 = vadd.f32 %v1979_v58, %v1946_v43  ;;  %v5286_v60 = vld [vmem:[#allocation2 + $0xe4] sm:$0xff]  ;;  %v5288_v25 = vld [vmem:[#allocation2 + $0x10c] sm:$0xff]  ;;  %v5290_v43 = vld [vmem:[#allocation2 + $0x114] sm:$0xff] }
 0x168   : > { %v1996_v41 = vadd.f32 %v1980_v46, %v1947_v36  ;;  %v1997_v17 = vadd.f32 %v1981_v7, %v1948_v13  ;;  %v1998_v37 = vadd.f32 %v1982_v8, %v1949_v26  ;;  %6371 = vst [vmem:[#allocation40_spill] sm:$0xff] %v5278_v29  ;;  %v1999_v42 = vadd.f32 %v1983_v33, %v1950_v23  ;;  %v6377_v4 = vld [vmem:[#allocation86_spill] sm:$0xff]  ;;  %v6378_v7 = vld [vmem:[#allocation87_spill] sm:$0xff] }
 0x169   : > { %6372 = vst [vmem:[#allocation41_spill] sm:$0xff] %v5280_v2  ;;  %v2000_v12 = vadd.f32 %v1984_v24, %v1951_v27  ;;  %v2001_v0 = vadd.f32 %v1985_v35, %v1952_v40  ;;  %v2002_v15 = vadd.f32 %v1986_v44, %v1953_v31  ;;  %v2020_v36 = vmul.f32 %v3942_v52, %v3571_v1 }
 0x16a   : > { %6373 = vst [vmem:[#allocation42_spill] sm:$0xff] %v5282_v32  ;;  %v2021_v13 = vmul.f32 %v3942_v52, %v3572_v28  ;;  %v2022_v26 = vmul.f32 %v3942_v52, %v5272_v16  ;;  %v2023_v10 = vmul.f32 %v3942_v52, %v5274_v51  ;;  %v2024_v48 = vmul.f32 %v3942_v52, %v5276_v6  ;;  %v5309_v51 = vld [vmem:[#allocation2 + $0x7d] sm:$0xff] }
 0x16b   : > { %6374 = vst [vmem:[#allocation43_spill] sm:$0xff] %v5284_v54  ;;  %v2025_v23 = vmul.f32 %v3942_v52, %v5278_v29  ;;  %v2026_v27 = vmul.f32 %v3942_v52, %v5280_v2  ;;  %v2027_v40 = vmul.f32 %v3942_v52, %v5282_v32  ;;  %v2028_v31 = vmul.f32 %v3942_v52, %v5043_v30  ;;  %v3587_v29 = vld [vmem:[#allocation2 + $0x65] sm:$0xff]  ;;  %v3588_v30 = vld [vmem:[#allocation2 + $0x6d] sm:$0xff] }
 0x16c   : > { %6375 = vst [vmem:[#allocation44_spill] sm:$0xff] %v5286_v60  ;;  %v2029_v58 = vmul.f32 %v3942_v52, %v6377_v4  ;;  %v2030_v46 = vmul.f32 %v3942_v52, %v5284_v54  ;;  %v2031_v1 = vmul.f32 %v3942_v52, %v5286_v60  ;;  %v2032_v8 = vmul.f32 %v3942_v52, %v6378_v7  ;;  %v3943_v4 = vld [vmem:[%s5767_s1 + $0x25] ss:$0 sm:$0xff] }
 0x16d   : > { %6376 = vst [vmem:[#allocation45_spill] sm:$0xff] %v5288_v25  ;;  %v2033_v33 = vmul.f32 %v3942_v52, %v5049_v34  ;;  %v2034_v24 = vmul.f32 %v3942_v52, %v5288_v25  ;;  %v2035_v35 = vmul.f32 %v3942_v52, %v5290_v43  ;;  %v2036_v44 = vadd.f32 %v2020_v36, %v1987_v50  ;;  %v5311_v34 = vld [vmem:[#allocation2 + $0x85] sm:$0xff]  ;;  %v5313_v25 = vld [vmem:[#allocation2 + $0x95] sm:$0xff]  ;;  %v5315_v52 = vld [vmem:[#allocation2 + $0x9d] sm:$0xff] }
 0x16e   : > { %v2037_v28 = vadd.f32 %v2021_v13, %v1988_v9  ;;  %v2038_v2 = vadd.f32 %v2022_v26, %v1989_v39  ;;  %v2039_v32 = vadd.f32 %v2023_v10, %v1990_v59  ;;  %v2040_v54 = vadd.f32 %v2024_v48, %v1991_v62  ;;  %6379 = vst [vmem:[#allocation46_spill] sm:$0xff] %v5311_v34  ;;  %v5317_v36 = vld [vmem:[#allocation2 + $0xad] sm:$0xff]  ;;  %v5319_v13 = vld [vmem:[#allocation2 + $0xb5] sm:$0xff]  ;;  %v5321_v26 = vld [vmem:[#allocation2 + $0xdd] sm:$0xff] }
 0x16f   : > { %v2041_v60 = vadd.f32 %v2025_v23, %v1992_v53  ;;  %v2042_v6 = vadd.f32 %v2026_v27, %v1993_v14  ;;  %v2043_v7 = vadd.f32 %v2027_v40, %v1994_v38  ;;  %6380 = vst [vmem:[#allocation47_spill] sm:$0xff] %v5313_v25  ;;  %v2044_v50 = vadd.f32 %v2028_v31, %v1995_v61  ;;  %v5323_v10 = vld [vmem:[#allocation2 + $0xe5] sm:$0xff]  ;;  %v5325_v48 = vld [vmem:[#allocation2 + $0x10d] sm:$0xff]  ;;  %v5327_v61 = vld [vmem:[#allocation2 + $0x115] sm:$0xff] }
 0x170   : > { %v2045_v9 = vadd.f32 %v2029_v58, %v1996_v41  ;;  %v2046_v39 = vadd.f32 %v2030_v46, %v1997_v17  ;;  %v2047_v59 = vadd.f32 %v2031_v1, %v1998_v37  ;;  %6381 = vst [vmem:[#allocation48_spill] sm:$0xff] %v5315_v52  ;;  %v2048_v62 = vadd.f32 %v2032_v8, %v1999_v42  ;;  %v6387_v40 = vld [vmem:[#allocation88_spill] sm:$0xff]  ;;  %v6388_v46 = vld [vmem:[#allocation89_spill] sm:$0xff] }
 0x171   : > { %6382 = vst [vmem:[#allocation49_spill] sm:$0xff] %v5317_v36  ;;  %v2049_v53 = vadd.f32 %v2033_v33, %v2000_v12  ;;  %v2050_v14 = vadd.f32 %v2034_v24, %v2001_v0  ;;  %v2051_v38 = vadd.f32 %v2035_v35, %v2002_v15  ;;  %v2069_v41 = vmul.f32 %v3943_v4, %v3587_v29 }
 0x172   : > { %6383 = vst [vmem:[#allocation50_spill] sm:$0xff] %v5319_v13  ;;  %v2070_v17 = vmul.f32 %v3943_v4, %v3588_v30  ;;  %v2071_v37 = vmul.f32 %v3943_v4, %v5309_v51  ;;  %v2072_v23 = vmul.f32 %v3943_v4, %v5311_v34  ;;  %v2073_v27 = vmul.f32 %v3943_v4, %v5313_v25  ;;  %v5346_v34 = vld [vmem:[#allocation2 + $0x7e] sm:$0xff] }
 0x173   : > { %6384 = vst [vmem:[#allocation51_spill] sm:$0xff] %v5321_v26  ;;  %v2074_v42 = vmul.f32 %v3943_v4, %v5315_v52  ;;  %v2075_v12 = vmul.f32 %v3943_v4, %v5317_v36  ;;  %v2076_v0 = vmul.f32 %v3943_v4, %v5319_v13  ;;  %v2077_v15 = vmul.f32 %v3943_v4, %v5070_v19  ;;  %v3603_v52 = vld [vmem:[#allocation2 + $0x66] sm:$0xff]  ;;  %v3604_v19 = vld [vmem:[#allocation2 + $0x6e] sm:$0xff] }
 0x174   : > { %6385 = vst [vmem:[#allocation52_spill] sm:$0xff] %v5323_v10  ;;  %v2078_v31 = vmul.f32 %v3943_v4, %v6387_v40  ;;  %v2079_v58 = vmul.f32 %v3943_v4, %v5321_v26  ;;  %v2080_v29 = vmul.f32 %v3943_v4, %v5323_v10  ;;  %v2081_v1 = vmul.f32 %v3943_v4, %v6388_v46  ;;  %v3944_v40 = vld [vmem:[%s5767_s1 + $0x26] ss:$0 sm:$0xff] }
 0x175   : > { %6386 = vst [vmem:[#allocation53_spill] sm:$0xff] %v5325_v48  ;;  %v2082_v8 = vmul.f32 %v3943_v4, %v5076_v20  ;;  %v2083_v33 = vmul.f32 %v3943_v4, %v5325_v48  ;;  %v2084_v24 = vmul.f32 %v3943_v4, %v5327_v61  ;;  %v2085_v35 = vadd.f32 %v2069_v41, %v2036_v44  ;;  %v5348_v20 = vld [vmem:[#allocation2 + $0x86] sm:$0xff]  ;;  %v5350_v48 = vld [vmem:[#allocation2 + $0x96] sm:$0xff]  ;;  %v5352_v4 = vld [vmem:[#allocation2 + $0x9e] sm:$0xff] }
 0x176   : > { %v2086_v30 = vadd.f32 %v2070_v17, %v2037_v28  ;;  %v2087_v36 = vadd.f32 %v2071_v37, %v2038_v2  ;;  %v2088_v13 = vadd.f32 %v2072_v23, %v2039_v32  ;;  %v2089_v26 = vadd.f32 %v2073_v27, %v2040_v54  ;;  %6389 = vst [vmem:[#allocation54_spill] sm:$0xff] %v5350_v48  ;;  %v5354_v41 = vld [vmem:[#allocation2 + $0xae] sm:$0xff]  ;;  %v5356_v17 = vld [vmem:[#allocation2 + $0xb6] sm:$0xff]  ;;  %v5358_v37 = vld [vmem:[#allocation2 + $0xde] sm:$0xff] }
 0x177   : > { %v2090_v10 = vadd.f32 %v2074_v42, %v2041_v60  ;;  %v2091_v25 = vadd.f32 %v2075_v12, %v2042_v6  ;;  %v2092_v46 = vadd.f32 %v2076_v0, %v2043_v7  ;;  %v2093_v44 = vadd.f32 %v2077_v15, %v2044_v50  ;;  %6390 = vst [vmem:[#allocation55_spill] sm:$0xff] %v5352_v4  ;;  %v5360_v23 = vld [vmem:[#allocation2 + $0xe6] sm:$0xff]  ;;  %v5362_v27 = vld [vmem:[#allocation2 + $0x10e] sm:$0xff]  ;;  %v5364_v50 = vld [vmem:[#allocation2 + $0x116] sm:$0xff] }
 0x178   : > { %v2094_v28 = vadd.f32 %v2078_v31, %v2045_v9  ;;  %v2095_v2 = vadd.f32 %v2079_v58, %v2046_v39  ;;  %v2096_v32 = vadd.f32 %v2080_v29, %v2047_v59  ;;  %6391 = vst [vmem:[#allocation56_spill] sm:$0xff] %v5354_v41  ;;  %v2097_v54 = vadd.f32 %v2081_v1, %v2048_v62 }
 0x179   : > { %6392 = vst [vmem:[#allocation57_spill] sm:$0xff] %v5356_v17  ;;  %v2098_v60 = vadd.f32 %v2082_v8, %v2049_v53  ;;  %v2099_v6 = vadd.f32 %v2083_v33, %v2050_v14  ;;  %v2100_v7 = vadd.f32 %v2084_v24, %v2051_v38  ;;  %v2118_v9 = vmul.f32 %v3944_v40, %v3603_v52 }
 0x17a   : > { %6393 = vst [vmem:[#allocation58_spill] sm:$0xff] %v5358_v37  ;;  %v2119_v39 = vmul.f32 %v3944_v40, %v3604_v19  ;;  %v2120_v59 = vmul.f32 %v3944_v40, %v5346_v34  ;;  %v2121_v42 = vmul.f32 %v3944_v40, %v5348_v20  ;;  %v2122_v12 = vmul.f32 %v3944_v40, %v5350_v48  ;;  %v5383_v48 = vld [vmem:[#allocation2 + $0xc0] sm:$0xff] }
 0x17b   : > { %6394 = vst [vmem:[#allocation59_spill] sm:$0xff] %v5360_v23  ;;  %v2123_v62 = vmul.f32 %v3944_v40, %v5352_v4  ;;  %v2124_v53 = vmul.f32 %v3944_v40, %v5354_v41  ;;  %v2125_v14 = vmul.f32 %v3944_v40, %v5356_v17  ;;  %v2126_v38 = vmul.f32 %v3944_v40, %v5097_v55  ;;  %v3945_v55 = vld [vmem:[%s5767_s1 + $0x28] ss:$0 sm:$0xff] }
 0x17c   : > { %6395 = vst [vmem:[#allocation60_spill] sm:$0xff] %v5362_v27  ;;  %v2127_v0 = vmul.f32 %v3944_v40, %v5099_v11  ;;  %v2128_v15 = vmul.f32 %v3944_v40, %v5358_v37  ;;  %v2129_v52 = vmul.f32 %v3944_v40, %v5360_v23  ;;  %v2130_v31 = vmul.f32 %v3944_v40, %v5101_v63 }
 0x17d   : > { %v2131_v58 = vmul.f32 %v3944_v40, %v5103_v56  ;;  %v2132_v29 = vmul.f32 %v3944_v40, %v5362_v27  ;;  %v2133_v1 = vmul.f32 %v3944_v40, %v5364_v50  ;;  %v2134_v8 = vadd.f32 %v2118_v9, %v2085_v35  ;;  %v5385_v27 = vld [vmem:[#allocation2 + $0xc8] sm:$0xff]  ;;  %v5387_v40 = vld [vmem:[#allocation2 + $0xf0] sm:$0xff]  ;;  %v5389_v9 = vld [vmem:[#allocation2 + $0xf8] sm:$0xff] }
 0x17e   : > { %v2135_v33 = vadd.f32 %v2119_v39, %v2086_v30  ;;  %v2136_v24 = vadd.f32 %v2120_v59, %v2087_v36  ;;  %v2137_v19 = vadd.f32 %v2121_v42, %v2088_v13  ;;  %v2138_v11 = vadd.f32 %v2122_v12, %v2089_v26  ;;  %6396 = vst [vmem:[#allocation61_spill] sm:$0xff] %v5387_v40  ;;  %v5391_v26 = vld [vmem:[#allocation2 + $0x120] sm:$0xff]  ;;  %v6403_v42 = vld [vmem:[#allocation11_spill] sm:$0xff] }
 0x17f   : > { %v2139_v37 = vadd.f32 %v2123_v62, %v2090_v10  ;;  %v2140_v17 = vadd.f32 %v2124_v53, %v2091_v25  ;;  %v2141_v23 = vadd.f32 %v2125_v14, %v2092_v46  ;;  %v2142_v41 = vadd.f32 %v2126_v38, %v2093_v44  ;;  %6397 = vst [vmem:[#allocation62_spill] sm:$0xff] %v5389_v9  ;;  %v5393_v25 = vld [vmem:[#allocation2 + $0x128] sm:$0xff]  ;;  %v6399_v44 = vld [vmem:[#allocation90_spill] sm:$0xff]  ;;  %v6404_v62 = vld [vmem:[#allocation12_spill] sm:$0xff] }
 0x180   : > { %v2143_v63 = vadd.f32 %v2127_v0, %v2094_v28  ;;  %v2144_v4 = vadd.f32 %v2128_v15, %v2095_v2  ;;  %v2145_v56 = vadd.f32 %v2129_v52, %v2096_v32  ;;  %v2146_v35 = vadd.f32 %v2130_v31, %v2097_v54  ;;  %6398 = vst [vmem:[#allocation63_spill] sm:$0xff] %v5391_v26  ;;  %v6400_v2 = vld [vmem:[#allocation91_spill] sm:$0xff]  ;;  %v6401_v54 = vld [vmem:[#allocation92_spill] sm:$0xff]  ;;  %v6405_v14 = vld [vmem:[#allocation13_spill] sm:$0xff] }
 0x181   : > { %v2147_v30 = vadd.f32 %v2131_v58, %v2098_v60  ;;  %v2148_v36 = vadd.f32 %v2132_v29, %v2099_v6  ;;  %v2149_v13 = vadd.f32 %v2133_v1, %v2100_v7  ;;  %v2169_v10 = vmul.f32 %v3945_v55, %v5124_v18  ;;  %v6402_v6 = vld [vmem:[#allocation10_spill] sm:$0xff] }
 0x182   : > { %v2170_v46 = vmul.f32 %v3945_v55, %v5126_v22  ;;  %v2171_v28 = vmul.f32 %v3945_v55, %v6399_v44  ;;  %v2172_v32 = vmul.f32 %v3945_v55, %v6400_v2  ;;  %v2173_v60 = vmul.f32 %v3945_v55, %v6401_v54  ;;  %v3946_v44 = vld [vmem:[%s5767_s1 + $0x29] ss:$0 sm:$0xff] }
 0x183   : > { %v2174_v7 = vmul.f32 %v3945_v55, %v6402_v6  ;;  %v2175_v39 = vmul.f32 %v3945_v55, %v5383_v48  ;;  %v2176_v59 = vmul.f32 %v3945_v55, %v5385_v27  ;;  %v2177_v12 = vmul.f32 %v3945_v55, %v6403_v42 }
 0x184   : > { %v2178_v53 = vmul.f32 %v3945_v55, %v6404_v62  ;;  %v2179_v18 = vmul.f32 %v3945_v55, %v5387_v40  ;;  %v2180_v22 = vmul.f32 %v3945_v55, %v5389_v9  ;;  %v2181_v38 = vmul.f32 %v3945_v55, %v6405_v14  ;;  %v5414_v40 = vld [vmem:[#allocation2 + $0xc1] sm:$0xff] }
 0x185   : > { %v2182_v0 = vmul.f32 %v3945_v55, %v5142_v21  ;;  %v2183_v15 = vmul.f32 %v3945_v55, %v5391_v26  ;;  %v2184_v52 = vmul.f32 %v3945_v55, %v5393_v25  ;;  %v2185_v31 = vadd.f32 %v2169_v10, %v2134_v8  ;;  %v5416_v26 = vld [vmem:[#allocation2 + $0xc9] sm:$0xff]  ;;  %v5418_v55 = vld [vmem:[#allocation2 + $0xf1] sm:$0xff]  ;;  %v5420_v10 = vld [vmem:[#allocation2 + $0xf9] sm:$0xff] }
 0x186   : > { %v2186_v58 = vadd.f32 %v2170_v46, %v2135_v33  ;;  %v2187_v29 = vadd.f32 %v2171_v28, %v2136_v24  ;;  %v2188_v1 = vadd.f32 %v2172_v32, %v2137_v19  ;;  %v2189_v2 = vadd.f32 %v2173_v60, %v2138_v11  ;;  %6406 = vst [vmem:[#allocation64_spill] sm:$0xff] %v5416_v26  ;;  %v5422_v11 = vld [vmem:[#allocation2 + $0x121] sm:$0xff] }
 0x187   : > { %v2190_v54 = vadd.f32 %v2174_v7, %v2139_v37  ;;  %v2191_v6 = vadd.f32 %v2175_v39, %v2140_v17  ;;  %v2192_v42 = vadd.f32 %v2176_v59, %v2141_v23  ;;  %v2193_v62 = vadd.f32 %v2177_v12, %v2142_v41  ;;  %6407 = vst [vmem:[#allocation65_spill] sm:$0xff] %v5418_v55  ;;  %v5424_v17 = vld [vmem:[#allocation2 + $0x129] sm:$0xff] }
 0x188   : > { %v2194_v14 = vadd.f32 %v2178_v53, %v2143_v63  ;;  %v2195_v9 = vadd.f32 %v2179_v18, %v2144_v4  ;;  %v2196_v21 = vadd.f32 %v2180_v22, %v2145_v56  ;;  %v2197_v8 = vadd.f32 %v2181_v38, %v2146_v35  ;;  %6408 = vst [vmem:[#allocation66_spill] sm:$0xff] %v5420_v10  ;;  %v6410_v4 = vld [vmem:[#allocation14_spill] sm:$0xff]  ;;  %v6411_v23 = vld [vmem:[#allocation15_spill] sm:$0xff]  ;;  %v6412_v56 = vld [vmem:[#allocation16_spill] sm:$0xff] }
 0x189   : > { %v2198_v33 = vadd.f32 %v2182_v0, %v2147_v30  ;;  %v2199_v24 = vadd.f32 %v2183_v15, %v2148_v36  ;;  %v2200_v19 = vadd.f32 %v2184_v52, %v2149_v13  ;;  %6409 = vst [vmem:[#allocation67_spill] sm:$0xff] %v5422_v11  ;;  %v2218_v41 = vmul.f32 %v3946_v44, %v5161_v5  ;;  %v6413_v35 = vld [vmem:[#allocation17_spill] sm:$0xff]  ;;  %v6414_v36 = vld [vmem:[#allocation18_spill] sm:$0xff]  ;;  %v6415_v60 = vld [vmem:[#allocation19_spill] sm:$0xff] }
 0x18a   : > { %v2219_v37 = vmul.f32 %v3946_v44, %v6410_v4  ;;  %v2220_v63 = vmul.f32 %v3946_v44, %v6411_v23  ;;  %v2221_v46 = vmul.f32 %v3946_v44, %v6412_v56  ;;  %v2222_v30 = vmul.f32 %v3946_v44, %v6413_v35  ;;  %v6416_v39 = vld [vmem:[#allocation20_spill] sm:$0xff]  ;;  %v6417_v53 = vld [vmem:[#allocation21_spill] sm:$0xff]  ;;  %v3947_v56 = vld [vmem:[%s5767_s1 + $0x2a] ss:$0 sm:$0xff] }
 0x18b   : > { %v2223_v13 = vmul.f32 %v3946_v44, %v6414_v36  ;;  %v2224_v28 = vmul.f32 %v3946_v44, %v5414_v40  ;;  %v2225_v32 = vmul.f32 %v3946_v44, %v5416_v26  ;;  %v2226_v7 = vmul.f32 %v3946_v44, %v6415_v60  ;;  %v5445_v26 = vld [vmem:[#allocation2 + $0xc2] sm:$0xff] }
 0x18c   : > { %v2227_v59 = vmul.f32 %v3946_v44, %v6416_v39  ;;  %v2228_v5 = vmul.f32 %v3946_v44, %v5418_v55  ;;  %v2229_v12 = vmul.f32 %v3946_v44, %v5420_v10  ;;  %v2230_v18 = vmul.f32 %v3946_v44, %v6417_v53 }
 0x18d   : > { %v2231_v22 = vmul.f32 %v3946_v44, %v5179_v49  ;;  %v2232_v38 = vmul.f32 %v3946_v44, %v5422_v11  ;;  %v2233_v0 = vmul.f32 %v3946_v44, %v5424_v17  ;;  %v2234_v15 = vadd.f32 %v2218_v41, %v2185_v31  ;;  %v5447_v11 = vld [vmem:[#allocation2 + $0xca] sm:$0xff]  ;;  %v5449_v44 = vld [vmem:[#allocation2 + $0xf2] sm:$0xff]  ;;  %v5451_v41 = vld [vmem:[#allocation2 + $0xfa] sm:$0xff] }
 0x18e   : > { %v2235_v52 = vadd.f32 %v2219_v37, %v2186_v58  ;;  %v2236_v4 = vadd.f32 %v2220_v63, %v2187_v29  ;;  %v2237_v23 = vadd.f32 %v2221_v46, %v2188_v1  ;;  %v2238_v35 = vadd.f32 %v2222_v30, %v2189_v2  ;;  %6418 = vst [vmem:[#allocation68_spill] sm:$0xff] %v5447_v11  ;;  %v5453_v2 = vld [vmem:[#allocation2 + $0x122] sm:$0xff] }
 0x18f   : > { %v2239_v36 = vadd.f32 %v2223_v13, %v2190_v54  ;;  %v2240_v60 = vadd.f32 %v2224_v28, %v2191_v6  ;;  %v2241_v39 = vadd.f32 %v2225_v32, %v2192_v42  ;;  %v2242_v10 = vadd.f32 %v2226_v7, %v2193_v62  ;;  %6419 = vst [vmem:[#allocation69_spill] sm:$0xff] %v5449_v44  ;;  %v5455_v54 = vld [vmem:[#allocation2 + $0x12a] sm:$0xff] }
 0x190   : > { %v2243_v53 = vadd.f32 %v2227_v59, %v2194_v14  ;;  %v2244_v55 = vadd.f32 %v2228_v5, %v2195_v9  ;;  %v2245_v49 = vadd.f32 %v2229_v12, %v2196_v21  ;;  %v2246_v31 = vadd.f32 %v2230_v18, %v2197_v8  ;;  %6420 = vst [vmem:[#allocation70_spill] sm:$0xff] %v5451_v41  ;;  %v6422_v9 = vld [vmem:[#allocation22_spill] sm:$0xff]  ;;  %v6423_v62 = vld [vmem:[#allocation23_spill] sm:$0xff]  ;;  %v6424_v21 = vld [vmem:[#allocation24_spill] sm:$0xff] }
 0x191   : > { %v2247_v58 = vadd.f32 %v2231_v22, %v2198_v33  ;;  %v2248_v29 = vadd.f32 %v2232_v38, %v2199_v24  ;;  %v2249_v1 = vadd.f32 %v2233_v0, %v2200_v19  ;;  %6421 = vst [vmem:[#allocation71_spill] sm:$0xff] %v5453_v2  ;;  %v2267_v6 = vmul.f32 %v3947_v56, %v5198_v3  ;;  %v6425_v8 = vld [vmem:[#allocation25_spill] sm:$0xff]  ;;  %v6426_v24 = vld [vmem:[#allocation26_spill] sm:$0xff]  ;;  %v6427_v30 = vld [vmem:[#allocation27_spill] sm:$0xff] }
 0x192   : > { %v2268_v42 = vmul.f32 %v3947_v56, %v6422_v9  ;;  %v2269_v14 = vmul.f32 %v3947_v56, %v6423_v62  ;;  %v2270_v37 = vmul.f32 %v3947_v56, %v6424_v21  ;;  %v2271_v33 = vmul.f32 %v3947_v56, %v6425_v8  ;;  %v6428_v28 = vld [vmem:[#allocation28_spill] sm:$0xff]  ;;  %v6429_v59 = vld [vmem:[#allocation29_spill] sm:$0xff]  ;;  %v3948_v21 = vld [vmem:[%s5767_s1 + $0x2b] ss:$0 sm:$0xff] }
 0x193   : > { %v2272_v19 = vmul.f32 %v3947_v56, %v6426_v24  ;;  %v2273_v63 = vmul.f32 %v3947_v56, %v5445_v26  ;;  %v2274_v46 = vmul.f32 %v3947_v56, %v5447_v11  ;;  %v2275_v13 = vmul.f32 %v3947_v56, %v6427_v30  ;;  %v5476_v11 = vld [vmem:[#allocation2 + $0xc3] sm:$0xff] }
 0x194   : > { %v2276_v32 = vmul.f32 %v3947_v56, %v6428_v28  ;;  %v2277_v3 = vmul.f32 %v3947_v56, %v5449_v44  ;;  %v2278_v7 = vmul.f32 %v3947_v56, %v5451_v41  ;;  %v2279_v5 = vmul.f32 %v3947_v56, %v6429_v59 }
 0x195   : > { %v2280_v12 = vmul.f32 %v3947_v56, %v5216_v47  ;;  %v2281_v18 = vmul.f32 %v3947_v56, %v5453_v2  ;;  %v2282_v22 = vmul.f32 %v3947_v56, %v5455_v54  ;;  %v2283_v38 = vadd.f32 %v2267_v6, %v2234_v15  ;;  %v5478_v2 = vld [vmem:[#allocation2 + $0xcb] sm:$0xff]  ;;  %v5480_v56 = vld [vmem:[#allocation2 + $0xf3] sm:$0xff]  ;;  %v5482_v6 = vld [vmem:[#allocation2 + $0xfb] sm:$0xff] }
 0x196   : > { %v2284_v0 = vadd.f32 %v2268_v42, %v2235_v52  ;;  %v2285_v9 = vadd.f32 %v2269_v14, %v2236_v4  ;;  %v2286_v62 = vadd.f32 %v2270_v37, %v2237_v23  ;;  %v2287_v8 = vadd.f32 %v2271_v33, %v2238_v35  ;;  %6430 = vst [vmem:[#allocation72_spill] sm:$0xff] %v5478_v2  ;;  %v5484_v35 = vld [vmem:[#allocation2 + $0x123] sm:$0xff] }
 0x197   : > { %v2288_v24 = vadd.f32 %v2272_v19, %v2239_v36  ;;  %v2289_v30 = vadd.f32 %v2273_v63, %v2240_v60  ;;  %v2290_v28 = vadd.f32 %v2274_v46, %v2241_v39  ;;  %v2291_v41 = vadd.f32 %v2275_v13, %v2242_v10  ;;  %6431 = vst [vmem:[#allocation73_spill] sm:$0xff] %v5480_v56  ;;  %v5486_v36 = vld [vmem:[#allocation2 + $0x12b] sm:$0xff] }
 0x198   : > { %v2292_v59 = vadd.f32 %v2276_v32, %v2243_v53  ;;  %v2293_v44 = vadd.f32 %v2277_v3, %v2244_v55  ;;  %v2294_v47 = vadd.f32 %v2278_v7, %v2245_v49  ;;  %v2295_v15 = vadd.f32 %v2279_v5, %v2246_v31  ;;  %6432 = vst [vmem:[#allocation74_spill] sm:$0xff] %v5482_v6  ;;  %v6434_v55 = vld [vmem:[#allocation30_spill] sm:$0xff]  ;;  %v6435_v39 = vld [vmem:[#allocation31_spill] sm:$0xff]  ;;  %v6436_v49 = vld [vmem:[#allocation32_spill] sm:$0xff] }
 0x199   : > { %v2296_v52 = vadd.f32 %v2280_v12, %v2247_v58  ;;  %v2297_v4 = vadd.f32 %v2281_v18, %v2248_v29  ;;  %v2298_v23 = vadd.f32 %v2282_v22, %v2249_v1  ;;  %6433 = vst [vmem:[#allocation75_spill] sm:$0xff] %v5484_v35  ;;  %v2316_v10 = vmul.f32 %v3948_v21, %v5235_v57  ;;  %v6437_v31 = vld [vmem:[#allocation33_spill] sm:$0xff]  ;;  %v6438_v29 = vld [vmem:[#allocation34_spill] sm:$0xff]  ;;  %v6439_v33 = vld [vmem:[#allocation35_spill] sm:$0xff] }
 0x19a   : > { %v2317_v60 = vmul.f32 %v3948_v21, %v6434_v55  ;;  %v2318_v53 = vmul.f32 %v3948_v21, %v6435_v39  ;;  %v2319_v42 = vmul.f32 %v3948_v21, %v6436_v49  ;;  %v2320_v58 = vmul.f32 %v3948_v21, %v6437_v31  ;;  %v6440_v63 = vld [vmem:[#allocation36_spill] sm:$0xff]  ;;  %v6441_v32 = vld [vmem:[#allocation37_spill] sm:$0xff]  ;;  %v3949_v49 = vld [vmem:[%s5767_s1 + $0x2c] ss:$0 sm:$0xff] }
 0x19b   : > { %v2321_v1 = vmul.f32 %v3948_v21, %v6438_v29  ;;  %v2322_v14 = vmul.f32 %v3948_v21, %v5476_v11  ;;  %v2323_v37 = vmul.f32 %v3948_v21, %v5478_v2  ;;  %v2324_v19 = vmul.f32 %v3948_v21, %v6439_v33  ;;  %v5507_v2 = vld [vmem:[#allocation2 + $0xc4] sm:$0xff] }
 0x19c   : > { %v2325_v46 = vmul.f32 %v3948_v21, %v6440_v63  ;;  %v2326_v57 = vmul.f32 %v3948_v21, %v5480_v56  ;;  %v2327_v13 = vmul.f32 %v3948_v21, %v5482_v6  ;;  %v2328_v3 = vmul.f32 %v3948_v21, %v6441_v32 }
 0x19d   : > { %v2329_v7 = vmul.f32 %v3948_v21, %v5253_v45  ;;  %v2330_v5 = vmul.f32 %v3948_v21, %v5484_v35  ;;  %v2331_v12 = vmul.f32 %v3948_v21, %v5486_v36  ;;  %v2332_v18 = vadd.f32 %v2316_v10, %v2283_v38  ;;  %v5509_v35 = vld [vmem:[#allocation2 + $0xcc] sm:$0xff]  ;;  %v5511_v21 = vld [vmem:[#allocation2 + $0xf4] sm:$0xff]  ;;  %v5513_v10 = vld [vmem:[#allocation2 + $0xfc] sm:$0xff] }
 0x19e   : > { %v2333_v22 = vadd.f32 %v2317_v60, %v2284_v0  ;;  %v2334_v55 = vadd.f32 %v2318_v53, %v2285_v9  ;;  %v2335_v39 = vadd.f32 %v2319_v42, %v2286_v62  ;;  %v2336_v31 = vadd.f32 %v2320_v58, %v2287_v8  ;;  %6442 = vst [vmem:[#allocation76_spill] sm:$0xff] %v5509_v35  ;;  %v5515_v8 = vld [vmem:[#allocation2 + $0x124] sm:$0xff] }
 0x19f   : > { %v2337_v29 = vadd.f32 %v2321_v1, %v2288_v24  ;;  %v2338_v33 = vadd.f32 %v2322_v14, %v2289_v30  ;;  %v2339_v63 = vadd.f32 %v2323_v37, %v2290_v28  ;;  %v2340_v6 = vadd.f32 %v2324_v19, %v2291_v41  ;;  %6443 = vst [vmem:[#allocation77_spill] sm:$0xff] %v5511_v21  ;;  %v5517_v24 = vld [vmem:[#allocation2 + $0x12c] sm:$0xff] }
 0x1a0   : > { %v2341_v32 = vadd.f32 %v2325_v46, %v2292_v59  ;;  %v2342_v56 = vadd.f32 %v2326_v57, %v2293_v44  ;;  %v2343_v45 = vadd.f32 %v2327_v13, %v2294_v47  ;;  %v2344_v38 = vadd.f32 %v2328_v3, %v2295_v15  ;;  %6444 = vst [vmem:[#allocation78_spill] sm:$0xff] %v5513_v10  ;;  %v6446_v44 = vld [vmem:[#allocation38_spill] sm:$0xff]  ;;  %v6447_v28 = vld [vmem:[#allocation39_spill] sm:$0xff]  ;;  %v6448_v47 = vld [vmem:[#allocation40_spill] sm:$0xff] }
 0x1a1   : > { %v2345_v0 = vadd.f32 %v2329_v7, %v2296_v52  ;;  %v2346_v9 = vadd.f32 %v2330_v5, %v2297_v4  ;;  %v2347_v62 = vadd.f32 %v2331_v12, %v2298_v23  ;;  %6445 = vst [vmem:[#allocation79_spill] sm:$0xff] %v5515_v8  ;;  %v2365_v41 = vmul.f32 %v3949_v49, %v5272_v16  ;;  %v6449_v15 = vld [vmem:[#allocation41_spill] sm:$0xff]  ;;  %v6450_v4 = vld [vmem:[#allocation42_spill] sm:$0xff]  ;;  %v6451_v58 = vld [vmem:[#allocation43_spill] sm:$0xff] }
 0x1a2   : > { %v2366_v30 = vmul.f32 %v3949_v49, %v6446_v44  ;;  %v2367_v59 = vmul.f32 %v3949_v49, %v6447_v28  ;;  %v2368_v60 = vmul.f32 %v3949_v49, %v6448_v47  ;;  %v2369_v52 = vmul.f32 %v3949_v49, %v6449_v15  ;;  %v6452_v14 = vld [vmem:[#allocation44_spill] sm:$0xff]  ;;  %v6453_v46 = vld [vmem:[#allocation45_spill] sm:$0xff]  ;;  %v3950_v47 = vld [vmem:[%s5767_s1 + $0x2d] ss:$0 sm:$0xff] }
 0x1a3   : > { %v2370_v23 = vmul.f32 %v3949_v49, %v6450_v4  ;;  %v2371_v53 = vmul.f32 %v3949_v49, %v5507_v2  ;;  %v2372_v42 = vmul.f32 %v3949_v49, %v5509_v35  ;;  %v2373_v1 = vmul.f32 %v3949_v49, %v6451_v58  ;;  %v5538_v35 = vld [vmem:[#allocation2 + $0xc5] sm:$0xff] }
 0x1a4   : > { %v2374_v37 = vmul.f32 %v3949_v49, %v6452_v14  ;;  %v2375_v16 = vmul.f32 %v3949_v49, %v5511_v21  ;;  %v2376_v19 = vmul.f32 %v3949_v49, %v5513_v10  ;;  %v2377_v57 = vmul.f32 %v3949_v49, %v6453_v46 }
 0x1a5   : > { %v2378_v13 = vmul.f32 %v3949_v49, %v5290_v43  ;;  %v2379_v3 = vmul.f32 %v3949_v49, %v5515_v8  ;;  %v2380_v7 = vmul.f32 %v3949_v49, %v5517_v24  ;;  %v2381_v5 = vadd.f32 %v2365_v41, %v2332_v18  ;;  %v5540_v8 = vld [vmem:[#allocation2 + $0xcd] sm:$0xff]  ;;  %v5542_v49 = vld [vmem:[#allocation2 + $0xf5] sm:$0xff]  ;;  %v5544_v41 = vld [vmem:[#allocation2 + $0xfd] sm:$0xff] }
 0x1a6   : > { %v2382_v12 = vadd.f32 %v2366_v30, %v2333_v22  ;;  %v2383_v44 = vadd.f32 %v2367_v59, %v2334_v55  ;;  %v2384_v28 = vadd.f32 %v2368_v60, %v2335_v39  ;;  %v2385_v15 = vadd.f32 %v2369_v52, %v2336_v31  ;;  %6454 = vst [vmem:[#allocation80_spill] sm:$0xff] %v5540_v8  ;;  %v5546_v31 = vld [vmem:[#allocation2 + $0x125] sm:$0xff] }
 0x1a7   : > { %v2386_v4 = vadd.f32 %v2370_v23, %v2337_v29  ;;  %v2387_v58 = vadd.f32 %v2371_v53, %v2338_v33  ;;  %v2388_v14 = vadd.f32 %v2372_v42, %v2339_v63  ;;  %v2389_v10 = vadd.f32 %v2373_v1, %v2340_v6  ;;  %6455 = vst [vmem:[#allocation81_spill] sm:$0xff] %v5542_v49  ;;  %v5548_v29 = vld [vmem:[#allocation2 + $0x12d] sm:$0xff] }
 0x1a8   : > { %v2390_v46 = vadd.f32 %v2374_v37, %v2341_v32  ;;  %v2391_v21 = vadd.f32 %v2375_v16, %v2342_v56  ;;  %v2392_v43 = vadd.f32 %v2376_v19, %v2343_v45  ;;  %v2393_v18 = vadd.f32 %v2377_v57, %v2344_v38  ;;  %6456 = vst [vmem:[#allocation82_spill] sm:$0xff] %v5544_v41  ;;  %v6459_v56 = vld [vmem:[#allocation46_spill] sm:$0xff]  ;;  %v6460_v63 = vld [vmem:[#allocation47_spill] sm:$0xff]  ;;  %v6461_v45 = vld [vmem:[#allocation48_spill] sm:$0xff] }
 0x1a9   : > { %v2394_v22 = vadd.f32 %v2378_v13, %v2345_v0  ;;  %v2395_v55 = vadd.f32 %v2379_v3, %v2346_v9  ;;  %v2396_v39 = vadd.f32 %v2380_v7, %v2347_v62  ;;  %6457 = vst [vmem:[#allocation83_spill] sm:$0xff] %v5546_v31  ;;  %v2414_v6 = vmul.f32 %v3950_v47, %v5309_v51  ;;  %v6462_v38 = vld [vmem:[#allocation49_spill] sm:$0xff]  ;;  %v6463_v9 = vld [vmem:[#allocation50_spill] sm:$0xff]  ;;  %v6464_v52 = vld [vmem:[#allocation51_spill] sm:$0xff] }
 0x1aa   : > { %6458 = vst [vmem:[#allocation84_spill] sm:$0xff] %v5548_v29  ;;  %v2415_v33 = vmul.f32 %v3950_v47, %v6459_v56  ;;  %v2416_v32 = vmul.f32 %v3950_v47, %v6460_v63  ;;  %v2417_v30 = vmul.f32 %v3950_v47, %v6461_v45  ;;  %v2418_v0 = vmul.f32 %v3950_v47, %v6462_v38  ;;  %v6465_v53 = vld [vmem:[#allocation52_spill] sm:$0xff]  ;;  %v6466_v37 = vld [vmem:[#allocation53_spill] sm:$0xff]  ;;  %v3951_v45 = vld [vmem:[%s5767_s1 + $0x2e] ss:$0 sm:$0xff] }
 0x1ab   : > { %v2419_v62 = vmul.f32 %v3950_v47, %v6463_v9  ;;  %v2420_v59 = vmul.f32 %v3950_v47, %v5538_v35  ;;  %v2421_v60 = vmul.f32 %v3950_v47, %v5540_v8  ;;  %v2422_v23 = vmul.f32 %v3950_v47, %v6464_v52  ;;  %v5569_v8 = vld [vmem:[#allocation2 + $0xc6] sm:$0xff] }
 0x1ac   : > { %v2423_v42 = vmul.f32 %v3950_v47, %v6465_v53  ;;  %v2424_v51 = vmul.f32 %v3950_v47, %v5542_v49  ;;  %v2425_v1 = vmul.f32 %v3950_v47, %v5544_v41  ;;  %v2426_v16 = vmul.f32 %v3950_v47, %v6466_v37 }
 0x1ad   : > { %v2427_v19 = vmul.f32 %v3950_v47, %v5327_v61  ;;  %v2428_v57 = vmul.f32 %v3950_v47, %v5546_v31  ;;  %v2429_v13 = vmul.f32 %v3950_v47, %v5548_v29  ;;  %v2430_v3 = vadd.f32 %v2414_v6, %v2381_v5  ;;  %v5571_v31 = vld [vmem:[#allocation2 + $0xce] sm:$0xff]  ;;  %v5573_v47 = vld [vmem:[#allocation2 + $0xf6] sm:$0xff]  ;;  %v5575_v6 = vld [vmem:[#allocation2 + $0xfe] sm:$0xff] }
 0x1ae   : > { %v2431_v7 = vadd.f32 %v2415_v33, %v2382_v12  ;;  %v2432_v56 = vadd.f32 %v2416_v32, %v2383_v44  ;;  %v2433_v63 = vadd.f32 %v2417_v30, %v2384_v28  ;;  %v2434_v38 = vadd.f32 %v2418_v0, %v2385_v15  ;;  %6467 = vst [vmem:[#allocation85_spill] sm:$0xff] %v5573_v47  ;;  %v5577_v15 = vld [vmem:[#allocation2 + $0x126] sm:$0xff] }
 0x1af   : > { %v2435_v9 = vadd.f32 %v2419_v62, %v2386_v4  ;;  %v2436_v52 = vadd.f32 %v2420_v59, %v2387_v58  ;;  %v2437_v53 = vadd.f32 %v2421_v60, %v2388_v14  ;;  %v2438_v41 = vadd.f32 %v2422_v23, %v2389_v10  ;;  %6468 = vst [vmem:[#allocation86_spill] sm:$0xff] %v5575_v6  ;;  %v5579_v4 = vld [vmem:[#allocation2 + $0x12e] sm:$0xff]  ;;  %v6471_v58 = vld [vmem:[#allocation54_spill] sm:$0xff] }
 0x1b0   : > { %v2439_v37 = vadd.f32 %v2423_v42, %v2390_v46  ;;  %v2440_v49 = vadd.f32 %v2424_v51, %v2391_v21  ;;  %v2441_v61 = vadd.f32 %v2425_v1, %v2392_v43  ;;  %v2442_v5 = vadd.f32 %v2426_v16, %v2393_v18  ;;  %6469 = vst [vmem:[#allocation87_spill] sm:$0xff] %v5577_v15  ;;  %v6472_v46 = vld [vmem:[#allocation55_spill] sm:$0xff]  ;;  %v6473_v18 = vld [vmem:[#allocation56_spill] sm:$0xff]  ;;  %v6475_v30 = vld [vmem:[#allocation58_spill] sm:$0xff] }
 0x1b1   : > { %v2443_v12 = vadd.f32 %v2427_v19, %v2394_v22  ;;  %v2444_v44 = vadd.f32 %v2428_v57, %v2395_v55  ;;  %v2445_v28 = vadd.f32 %v2429_v13, %v2396_v39  ;;  %6470 = vst [vmem:[#allocation88_spill] sm:$0xff] %v5579_v4  ;;  %v2463_v10 = vmul.f32 %v3951_v45, %v5346_v34  ;;  %v6474_v55 = vld [vmem:[#allocation57_spill] sm:$0xff]  ;;  %v6476_v62 = vld [vmem:[#allocation59_spill] sm:$0xff]  ;;  %v6477_v60 = vld [vmem:[#allocation60_spill] sm:$0xff] }
 0x1b2   : > { %v2464_v21 = vmul.f32 %v3951_v45, %v5348_v20  ;;  %v2465_v14 = vmul.f32 %v3951_v45, %v6471_v58  ;;  %v2466_v43 = vmul.f32 %v3951_v45, %v6472_v46  ;;  %v2467_v22 = vmul.f32 %v3951_v45, %v6473_v18  ;;  %v3731_v58 = vld [vmem:[#allocation2 + $0x90] sm:$0xff] }
 0x1b3   : > { %v2468_v39 = vmul.f32 %v3951_v45, %v6474_v55  ;;  %v2469_v33 = vmul.f32 %v3951_v45, %v5569_v8  ;;  %v2470_v32 = vmul.f32 %v3951_v45, %v5571_v31  ;;  %v2471_v0 = vmul.f32 %v3951_v45, %v6475_v30  ;;  %v3952_v46 = vld [vmem:[%s5767_s1 + $0x30] ss:$0 sm:$0xff] }
 0x1b4   : > { %v2472_v59 = vmul.f32 %v3951_v45, %v6476_v62  ;;  %v2473_v34 = vmul.f32 %v3951_v45, %v5573_v47  ;;  %v2474_v20 = vmul.f32 %v3951_v45, %v5575_v6  ;;  %v2475_v23 = vmul.f32 %v3951_v45, %v6477_v60  ;;  %v3732_v60 = vld [vmem:[#allocation2 + $0x98] sm:$0xff]  ;;  %v3733_v6 = vld [vmem:[#allocation2 + $0xa8] sm:$0xff] }
 0x1b5   : > { %v2476_v42 = vmul.f32 %v3951_v45, %v5364_v50  ;;  %v2477_v51 = vmul.f32 %v3951_v45, %v5577_v15  ;;  %v2478_v1 = vmul.f32 %v3951_v45, %v5579_v4  ;;  %v2479_v16 = vadd.f32 %v2463_v10, %v2430_v3  ;;  %v3734_v50 = vld [vmem:[#allocation2 + $0xb0] sm:$0xff]  ;;  %v3737_v3 = vld [vmem:[#allocation2 + $0xd8] sm:$0xff] }
 0x1b6   : > { %v2480_v19 = vadd.f32 %v2464_v21, %v2431_v7  ;;  %v2481_v57 = vadd.f32 %v2465_v14, %v2432_v56  ;;  %v2482_v13 = vadd.f32 %v2466_v43, %v2433_v63  ;;  %v2483_v18 = vadd.f32 %v2467_v22, %v2434_v38  ;;  %v3738_v7 = vld [vmem:[#allocation2 + $0xe0] sm:$0xff]  ;;  %v3741_v14 = vld [vmem:[#allocation2 + $0x108] sm:$0xff]  ;;  %v3742_v43 = vld [vmem:[#allocation2 + $0x110] sm:$0xff] }
 0x1b7   : > { %v2484_v55 = vadd.f32 %v2468_v39, %v2435_v9  ;;  %v2485_v30 = vadd.f32 %v2469_v33, %v2436_v52  ;;  %v2486_v62 = vadd.f32 %v2470_v32, %v2437_v53  ;;  %v2487_v29 = vadd.f32 %v2471_v0, %v2438_v41  ;;  %v3745_v4 = vld [vmem:[#allocation2 + $0x138] sm:$0xff]  ;;  %v3746_v38 = vld [vmem:[#allocation2 + $0x140] sm:$0xff]  ;;  %v6480_v32 = vld [vmem:[#allocation63_spill] sm:$0xff] }
 0x1b8   : > { %v2488_v15 = vadd.f32 %v2472_v59, %v2439_v37  ;;  %v2489_v47 = vadd.f32 %v2473_v34, %v2440_v49  ;;  %v2490_v45 = vadd.f32 %v2474_v20, %v2441_v61  ;;  %v2491_v56 = vadd.f32 %v2475_v23, %v2442_v5  ;;  %v6478_v61 = vld [vmem:[#allocation61_spill] sm:$0xff]  ;;  %v6479_v5 = vld [vmem:[#allocation62_spill] sm:$0xff] }
 0x1b9   : > { %v2492_v63 = vadd.f32 %v2476_v42, %v2443_v12  ;;  %v2493_v10 = vadd.f32 %v2477_v51, %v2444_v44  ;;  %v2494_v21 = vadd.f32 %v2478_v1, %v2445_v28  ;;  %v2514_v9 = vmul.f32 %v3952_v46, %v3731_v58  ;;  %v3747_v51 = vld [vmem:[#allocation2 + $0x91] sm:$0xff] }
 0x1ba   : > { %v2515_v52 = vmul.f32 %v3952_v46, %v3732_v60  ;;  %v2516_v53 = vmul.f32 %v3952_v46, %v3733_v6  ;;  %v2517_v22 = vmul.f32 %v3952_v46, %v3734_v50  ;;  %v2518_v39 = vmul.f32 %v3952_v46, %v5383_v48 }
 0x1bb   : > { %v2519_v41 = vmul.f32 %v3952_v46, %v5385_v27  ;;  %v2520_v49 = vmul.f32 %v3952_v46, %v3737_v3  ;;  %v2521_v37 = vmul.f32 %v3952_v46, %v3738_v7  ;;  %v2522_v33 = vmul.f32 %v3952_v46, %v6478_v61  ;;  %v3953_v27 = vld [vmem:[%s5767_s1 + $0x31] ss:$0 sm:$0xff]  ;;  %v3748_v3 = vld [vmem:[#allocation2 + $0x99] sm:$0xff]  ;;  %v3749_v7 = vld [vmem:[#allocation2 + $0xa9] sm:$0xff] }
 0x1bc   : > { %v2523_v12 = vmul.f32 %v3952_v46, %v6479_v5  ;;  %v2524_v44 = vmul.f32 %v3952_v46, %v3741_v14  ;;  %v2525_v28 = vmul.f32 %v3952_v46, %v3742_v43  ;;  %v2526_v0 = vmul.f32 %v3952_v46, %v6480_v32  ;;  %v3750_v14 = vld [vmem:[#allocation2 + $0xb1] sm:$0xff]  ;;  %v6484_v61 = vld [vmem:[#allocation67_spill] sm:$0xff] }
 0x1bd   : > { %v2527_v59 = vmul.f32 %v3952_v46, %v5393_v25  ;;  %v2528_v34 = vmul.f32 %v3952_v46, %v3745_v4  ;;  %v2529_v20 = vmul.f32 %v3952_v46, %v3746_v38  ;;  %v2530_v6 = vadd.f32 %v2514_v9, %v2479_v16  ;;  %v3753_v16 = vld [vmem:[#allocation2 + $0xd9] sm:$0xff] }
 0x1be   : > { %v2531_v23 = vadd.f32 %v2515_v52, %v2480_v19  ;;  %v2532_v42 = vadd.f32 %v2516_v53, %v2481_v57  ;;  %v2533_v48 = vadd.f32 %v2517_v22, %v2482_v13  ;;  %v2534_v1 = vadd.f32 %v2518_v39, %v2483_v18  ;;  %v3754_v19 = vld [vmem:[#allocation2 + $0xe1] sm:$0xff]  ;;  %v3757_v52 = vld [vmem:[#allocation2 + $0x109] sm:$0xff]  ;;  %v3758_v53 = vld [vmem:[#allocation2 + $0x111] sm:$0xff] }
 0x1bf   : > { %v2535_v58 = vadd.f32 %v2519_v41, %v2484_v55  ;;  %v2536_v60 = vadd.f32 %v2520_v49, %v2485_v30  ;;  %v2537_v50 = vadd.f32 %v2521_v37, %v2486_v62  ;;  %v2538_v43 = vadd.f32 %v2522_v33, %v2487_v29  ;;  %v3761_v22 = vld [vmem:[#allocation2 + $0x139] sm:$0xff]  ;;  %v3762_v18 = vld [vmem:[#allocation2 + $0x141] sm:$0xff]  ;;  %v6481_v29 = vld [vmem:[#allocation64_spill] sm:$0xff] }
 0x1c0   : > { %v2539_v25 = vadd.f32 %v2523_v12, %v2488_v15  ;;  %v2540_v4 = vadd.f32 %v2524_v44, %v2489_v47  ;;  %v2541_v46 = vadd.f32 %v2525_v28, %v2490_v45  ;;  %v2542_v57 = vadd.f32 %v2526_v0, %v2491_v56  ;;  %v6482_v49 = vld [vmem:[#allocation65_spill] sm:$0xff]  ;;  %v6483_v56 = vld [vmem:[#allocation66_spill] sm:$0xff] }
 0x1c1   : > { %v2543_v13 = vadd.f32 %v2527_v59, %v2492_v63  ;;  %v2544_v38 = vadd.f32 %v2528_v34, %v2493_v10  ;;  %v2545_v9 = vadd.f32 %v2529_v20, %v2494_v21  ;;  %v2563_v55 = vmul.f32 %v3953_v27, %v3747_v51  ;;  %v3763_v59 = vld [vmem:[#allocation2 + $0x92] sm:$0xff] }
 0x1c2   : > { %v2564_v30 = vmul.f32 %v3953_v27, %v3748_v3  ;;  %v2565_v62 = vmul.f32 %v3953_v27, %v3749_v7  ;;  %v2566_v39 = vmul.f32 %v3953_v27, %v3750_v14  ;;  %v2567_v41 = vmul.f32 %v3953_v27, %v5414_v40  ;;  %v3954_v34 = vld [vmem:[%s5767_s1 + $0x32] ss:$0 sm:$0xff]  ;;  %v3764_v14 = vld [vmem:[#allocation2 + $0x9a] sm:$0xff] }
 0x1c3   : > { %v2568_v15 = vmul.f32 %v3953_v27, %v6481_v29  ;;  %v2569_v47 = vmul.f32 %v3953_v27, %v3753_v16  ;;  %v2570_v45 = vmul.f32 %v3953_v27, %v3754_v19  ;;  %v2571_v37 = vmul.f32 %v3953_v27, %v6482_v49  ;;  %v3765_v16 = vld [vmem:[#allocation2 + $0xaa] sm:$0xff]  ;;  %v3766_v19 = vld [vmem:[#allocation2 + $0xb2] sm:$0xff] }
 0x1c4   : > { %v2572_v63 = vmul.f32 %v3953_v27, %v6483_v56  ;;  %v2573_v10 = vmul.f32 %v3953_v27, %v3757_v52  ;;  %v2574_v21 = vmul.f32 %v3953_v27, %v3758_v53  ;;  %v2575_v33 = vmul.f32 %v3953_v27, %v6484_v61  ;;  %v6486_v29 = vld [vmem:[#allocation69_spill] sm:$0xff] }
 0x1c5   : > { %v2576_v5 = vmul.f32 %v3953_v27, %v5424_v17  ;;  %v2577_v12 = vmul.f32 %v3953_v27, %v3761_v22  ;;  %v2578_v44 = vmul.f32 %v3953_v27, %v3762_v18  ;;  %v2579_v28 = vadd.f32 %v2563_v55, %v2530_v6  ;;  %v3769_v6 = vld [vmem:[#allocation2 + $0xda] sm:$0xff]  ;;  %v3773_v55 = vld [vmem:[#allocation2 + $0x10a] sm:$0xff] }
 0x1c6   : > { %v2580_v32 = vadd.f32 %v2564_v30, %v2531_v23  ;;  %v2581_v0 = vadd.f32 %v2565_v62, %v2532_v42  ;;  %v2582_v40 = vadd.f32 %v2566_v39, %v2533_v48  ;;  %v2583_v20 = vadd.f32 %v2567_v41, %v2534_v1  ;;  %v3770_v23 = vld [vmem:[#allocation2 + $0xe2] sm:$0xff]  ;;  %v3774_v30 = vld [vmem:[#allocation2 + $0x112] sm:$0xff]  ;;  %v3777_v62 = vld [vmem:[#allocation2 + $0x13a] sm:$0xff] }
 0x1c7   : > { %v2584_v51 = vadd.f32 %v2568_v15, %v2535_v58  ;;  %v2585_v3 = vadd.f32 %v2569_v47, %v2536_v60  ;;  %v2586_v7 = vadd.f32 %v2570_v45, %v2537_v50  ;;  %v2587_v52 = vadd.f32 %v2571_v37, %v2538_v43  ;;  %v3778_v1 = vld [vmem:[#allocation2 + $0x142] sm:$0xff]  ;;  %v6485_v43 = vld [vmem:[#allocation68_spill] sm:$0xff] }
 0x1c8   : > { %v2588_v17 = vadd.f32 %v2572_v63, %v2539_v25  ;;  %v2589_v53 = vadd.f32 %v2573_v10, %v2540_v4  ;;  %v2590_v27 = vadd.f32 %v2574_v21, %v2541_v46  ;;  %v2591_v42 = vadd.f32 %v2575_v33, %v2542_v57  ;;  %v6487_v57 = vld [vmem:[#allocation70_spill] sm:$0xff]  ;;  %v6488_v47 = vld [vmem:[#allocation71_spill] sm:$0xff]  ;;  %v3779_v61 = vld [vmem:[#allocation2 + $0x93] sm:$0xff] }
 0x1c9   : > { %v2592_v48 = vadd.f32 %v2576_v5, %v2543_v13  ;;  %v2593_v22 = vadd.f32 %v2577_v12, %v2544_v38  ;;  %v2594_v18 = vadd.f32 %v2578_v44, %v2545_v9  ;;  %v2612_v58 = vmul.f32 %v3954_v34, %v3763_v59  ;;  %v3955_v33 = vld [vmem:[%s5767_s1 + $0x33] ss:$0 sm:$0xff] }
 0x1ca   : > { %v2613_v60 = vmul.f32 %v3954_v34, %v3764_v14  ;;  %v2614_v50 = vmul.f32 %v3954_v34, %v3765_v16  ;;  %v2615_v39 = vmul.f32 %v3954_v34, %v3766_v19  ;;  %v2616_v41 = vmul.f32 %v3954_v34, %v5445_v26  ;;  %v3780_v14 = vld [vmem:[#allocation2 + $0x9b] sm:$0xff]  ;;  %v3781_v16 = vld [vmem:[#allocation2 + $0xab] sm:$0xff]  ;;  %v3782_v19 = vld [vmem:[#allocation2 + $0xb3] sm:$0xff] }
 0x1cb   : > { %v2617_v25 = vmul.f32 %v3954_v34, %v6485_v43  ;;  %v2618_v4 = vmul.f32 %v3954_v34, %v3769_v6  ;;  %v2619_v46 = vmul.f32 %v3954_v34, %v3770_v23  ;;  %v2620_v15 = vmul.f32 %v3954_v34, %v6486_v29  ;;  %v6492_v43 = vld [vmem:[#allocation75_spill] sm:$0xff] }
 0x1cc   : > { %v2621_v13 = vmul.f32 %v3954_v34, %v6487_v57  ;;  %v2622_v38 = vmul.f32 %v3954_v34, %v3773_v55  ;;  %v2623_v9 = vmul.f32 %v3954_v34, %v3774_v30  ;;  %v2624_v45 = vmul.f32 %v3954_v34, %v6488_v47 }
 0x1cd   : > { %v2625_v49 = vmul.f32 %v3954_v34, %v5455_v54  ;;  %v2626_v37 = vmul.f32 %v3954_v34, %v3777_v62  ;;  %v2627_v56 = vmul.f32 %v3954_v34, %v3778_v1  ;;  %v2628_v63 = vadd.f32 %v2612_v58, %v2579_v28  ;;  %v3785_v28 = vld [vmem:[#allocation2 + $0xdb] sm:$0xff]  ;;  %v3789_v62 = vld [vmem:[#allocation2 + $0x10b] sm:$0xff]  ;;  %v3790_v1 = vld [vmem:[#allocation2 + $0x113] sm:$0xff] }
 0x1ce   : > { %v2629_v10 = vadd.f32 %v2613_v60, %v2580_v32  ;;  %v2630_v21 = vadd.f32 %v2614_v50, %v2581_v0  ;;  %v2631_v26 = vadd.f32 %v2615_v39, %v2582_v40  ;;  %v2632_v5 = vadd.f32 %v2616_v41, %v2583_v20  ;;  %v3786_v32 = vld [vmem:[#allocation2 + $0xe3] sm:$0xff]  ;;  %v3793_v58 = vld [vmem:[#allocation2 + $0x13b] sm:$0xff] }
 0x1cf   : > { %v2633_v12 = vadd.f32 %v2617_v25, %v2584_v51  ;;  %v2634_v44 = vadd.f32 %v2618_v4, %v2585_v3  ;;  %v2635_v59 = vadd.f32 %v2619_v46, %v2586_v7  ;;  %v2636_v6 = vadd.f32 %v2620_v15, %v2587_v52  ;;  %v3794_v20 = vld [vmem:[#allocation2 + $0x143] sm:$0xff]  ;;  %v6489_v52 = vld [vmem:[#allocation72_spill] sm:$0xff]  ;;  %v6490_v39 = vld [vmem:[#allocation73_spill] sm:$0xff] }
 0x1d0   : > { %v2637_v54 = vadd.f32 %v2621_v13, %v2588_v17  ;;  %v2638_v23 = vadd.f32 %v2622_v38, %v2589_v53  ;;  %v2639_v34 = vadd.f32 %v2623_v9, %v2590_v27  ;;  %v2640_v0 = vadd.f32 %v2624_v45, %v2591_v42  ;;  %v6491_v42 = vld [vmem:[#allocation74_spill] sm:$0xff]  ;;  %v3795_v38 = vld [vmem:[#allocation2 + $0x94] sm:$0xff] }
 0x1d1   : > { %v2641_v40 = vadd.f32 %v2625_v49, %v2592_v48  ;;  %v2642_v55 = vadd.f32 %v2626_v37, %v2593_v22  ;;  %v2643_v30 = vadd.f32 %v2627_v56, %v2594_v18  ;;  %v2661_v51 = vmul.f32 %v3955_v33, %v3779_v61  ;;  %v3956_v9 = vld [vmem:[%s5767_s1 + $0x34] ss:$0 sm:$0xff]  ;;  %v3796_v56 = vld [vmem:[#allocation2 + $0x9c] sm:$0xff]  ;;  %v3797_v61 = vld [vmem:[#allocation2 + $0xac] sm:$0xff] }
 0x1d2   : > { %v2662_v3 = vmul.f32 %v3955_v33, %v3780_v14  ;;  %v2663_v7 = vmul.f32 %v3955_v33, %v3781_v16  ;;  %v2664_v60 = vmul.f32 %v3955_v33, %v3782_v19  ;;  %v2665_v50 = vmul.f32 %v3955_v33, %v5476_v11  ;;  %v3798_v14 = vld [vmem:[#allocation2 + $0xb4] sm:$0xff] }
 0x1d3   : > { %v2666_v17 = vmul.f32 %v3955_v33, %v6489_v52  ;;  %v2667_v53 = vmul.f32 %v3955_v33, %v3785_v28  ;;  %v2668_v27 = vmul.f32 %v3955_v33, %v3786_v32  ;;  %v2669_v41 = vmul.f32 %v3955_v33, %v6490_v39  ;;  %v3812_v52 = vld [vmem:[#allocation2 + $0x9d] sm:$0xff] }
 0x1d4   : > { %v2670_v48 = vmul.f32 %v3955_v33, %v6491_v42  ;;  %v2671_v22 = vmul.f32 %v3955_v33, %v3789_v62  ;;  %v2672_v18 = vmul.f32 %v3955_v33, %v3790_v1  ;;  %v2673_v25 = vmul.f32 %v3955_v33, %v6492_v43  ;;  %v3805_v62 = vld [vmem:[#allocation2 + $0x10c] sm:$0xff]  ;;  %v3806_v1 = vld [vmem:[#allocation2 + $0x114] sm:$0xff] }
 0x1d5   : > { %v2674_v4 = vmul.f32 %v3955_v33, %v5486_v36  ;;  %v2675_v46 = vmul.f32 %v3955_v33, %v3793_v58  ;;  %v2676_v29 = vmul.f32 %v3955_v33, %v3794_v20  ;;  %v2677_v15 = vadd.f32 %v2661_v51, %v2628_v63  ;;  %v3801_v63 = vld [vmem:[#allocation2 + $0xdc] sm:$0xff] }
 0x1d6   : > { %v2678_v57 = vadd.f32 %v2662_v3, %v2629_v10  ;;  %v2679_v13 = vadd.f32 %v2663_v7, %v2630_v21  ;;  %v2680_v11 = vadd.f32 %v2664_v60, %v2631_v26  ;;  %v2681_v47 = vadd.f32 %v2665_v50, %v2632_v5  ;;  %v3802_v10 = vld [vmem:[#allocation2 + $0xe4] sm:$0xff]  ;;  %v3809_v58 = vld [vmem:[#allocation2 + $0x13c] sm:$0xff] }
 0x1d7   : > { %v2682_v45 = vadd.f32 %v2666_v17, %v2633_v12  ;;  %v2683_v49 = vadd.f32 %v2667_v53, %v2634_v44  ;;  %v2684_v37 = vadd.f32 %v2668_v27, %v2635_v59  ;;  %v2685_v16 = vadd.f32 %v2669_v41, %v2636_v6  ;;  %v3810_v5 = vld [vmem:[#allocation2 + $0x144] sm:$0xff]  ;;  %v6493_v6 = vld [vmem:[#allocation76_spill] sm:$0xff] }
 0x1d8   : > { %v2686_v36 = vadd.f32 %v2670_v48, %v2637_v54  ;;  %v2687_v19 = vadd.f32 %v2671_v22, %v2638_v23  ;;  %v2688_v33 = vadd.f32 %v2672_v18, %v2639_v34  ;;  %v2689_v21 = vadd.f32 %v2673_v25, %v2640_v0  ;;  %v5641_v0 = vld [vmem:[%s5767_s1 + $0x35] ss:$0 sm:$0xff]  ;;  %v6496_v17 = vld [vmem:[#allocation79_spill] sm:$0xff] }
 0x1d9   : > { %v2690_v26 = vadd.f32 %v2674_v4, %v2641_v40  ;;  %v2691_v28 = vadd.f32 %v2675_v46, %v2642_v55  ;;  %v2692_v32 = vadd.f32 %v2676_v29, %v2643_v30  ;;  %v2710_v12 = vmul.f32 %v3956_v9, %v3795_v38  ;;  %v6494_v40 = vld [vmem:[#allocation77_spill] sm:$0xff]  ;;  %v6495_v30 = vld [vmem:[#allocation78_spill] sm:$0xff]  ;;  %v3813_v41 = vld [vmem:[#allocation2 + $0xad] sm:$0xff] }
 0x1da   : > { %v2711_v44 = vmul.f32 %v3956_v9, %v3796_v56  ;;  %v2712_v59 = vmul.f32 %v3956_v9, %v3797_v61  ;;  %v2713_v20 = vmul.f32 %v3956_v9, %v3798_v14  ;;  %v2714_v51 = vmul.f32 %v3956_v9, %v5507_v2  ;;  %v3811_v50 = vld [vmem:[#allocation2 + $0x95] sm:$0xff]  ;;  %v3817_v14 = vld [vmem:[#allocation2 + $0xdd] sm:$0xff] }
 0x1db   : > { %v2715_v54 = vmul.f32 %v3956_v9, %v6493_v6  ;;  %v2716_v23 = vmul.f32 %v3956_v9, %v3801_v63  ;;  %v2717_v34 = vmul.f32 %v3956_v9, %v3802_v10  ;;  %v2718_v55 = vmul.f32 %v3956_v9, %v6494_v40  ;;  %v3814_v43 = vld [vmem:[#allocation2 + $0xb5] sm:$0xff]  ;;  %v3818_v10 = vld [vmem:[#allocation2 + $0xe5] sm:$0xff] }
 0x1dc   : > { %v2719_v3 = vmul.f32 %v3956_v9, %v6495_v30  ;;  %v2720_v7 = vmul.f32 %v3956_v9, %v3805_v62  ;;  %v2721_v60 = vmul.f32 %v3956_v9, %v3806_v1  ;;  %v2722_v53 = vmul.f32 %v3956_v9, %v6496_v17  ;;  %v3829_v63 = vld [vmem:[#allocation2 + $0xae] sm:$0xff]  ;;  %v3830_v1 = vld [vmem:[#allocation2 + $0xb6] sm:$0xff]  ;;  %v6499_v40 = vld [vmem:[#allocation82_spill] sm:$0xff] }
 0x1dd   : > { %v2723_v2 = vmul.f32 %v3956_v9, %v5517_v24  ;;  %v2724_v27 = vmul.f32 %v3956_v9, %v3809_v58  ;;  %v2725_v39 = vmul.f32 %v3956_v9, %v3810_v5  ;;  %v2726_v42 = vadd.f32 %v2710_v12, %v2677_v15  ;;  %v5653_v15 = vld [vmem:[%s5767_s1 + $0x36] ss:$0 sm:$0xff]  ;;  %v3821_v12 = vld [vmem:[#allocation2 + $0x10d] sm:$0xff] }
 0x1de   : > { %v2727_v48 = vadd.f32 %v2711_v44, %v2678_v57  ;;  %v2728_v22 = vadd.f32 %v2712_v59, %v2679_v13  ;;  %v2729_v18 = vadd.f32 %v2713_v20, %v2680_v11  ;;  %v2730_v25 = vadd.f32 %v2714_v51, %v2681_v47  ;;  %v3827_v47 = vld [vmem:[#allocation2 + $0x96] sm:$0xff]  ;;  %v3833_v51 = vld [vmem:[#allocation2 + $0xde] sm:$0xff] }
 0x1df   : > { %v2731_v4 = vadd.f32 %v2715_v54, %v2682_v45  ;;  %v2759_v46 = vmul.f32 %v5641_v0, %v3811_v50  ;;  %v2760_v29 = vmul.f32 %v5641_v0, %v3812_v52  ;;  %v2732_v38 = vadd.f32 %v2716_v23, %v2683_v49  ;;  %v3828_v45 = vld [vmem:[#allocation2 + $0x9e] sm:$0xff]  ;;  %v3822_v54 = vld [vmem:[#allocation2 + $0x115] sm:$0xff] }
 0x1e0   : > { %v2733_v56 = vadd.f32 %v2717_v34, %v2684_v37  ;;  %v2734_v61 = vadd.f32 %v2718_v55, %v2685_v16  ;;  %v2761_v24 = vmul.f32 %v5641_v0, %v3813_v41  ;;  %v2735_v57 = vadd.f32 %v2719_v3, %v2686_v36  ;;  %v6497_v36 = vld [vmem:[#allocation80_spill] sm:$0xff]  ;;  %v6498_v23 = vld [vmem:[#allocation81_spill] sm:$0xff]  ;;  %v3834_v3 = vld [vmem:[#allocation2 + $0xe6] sm:$0xff] }
 0x1e1   : > { %v2736_v13 = vadd.f32 %v2720_v7, %v2687_v19  ;;  %v5655_v11 = vadd.f32 %v2721_v60, %v2688_v33  ;;  %v2762_v9 = vmul.f32 %v5641_v0, %v3814_v43  ;;  %v5658_v49 = vadd.f32 %v2722_v53, %v2689_v21  ;;  %v6500_v43 = vld [vmem:[#allocation83_spill] sm:$0xff] }
 0x1e2   : > { %v5660_v37 = vadd.f32 %v2723_v2, %v2690_v26  ;;  %v5662_v16 = vadd.f32 %v2724_v27, %v2691_v28  ;;  %v2763_v62 = vmul.f32 %v5641_v0, %v5538_v35  ;;  %v2764_v19 = vmul.f32 %v5641_v0, %v6497_v36 }
 0x1e3   : > { %v2765_v33 = vmul.f32 %v5641_v0, %v3817_v14  ;;  %v2775_v58 = vadd.f32 %v2759_v46, %v2726_v42  ;;  %v2776_v5 = vadd.f32 %v2760_v29, %v2727_v48  ;;  %v2777_v44 = vadd.f32 %v2761_v24, %v2728_v22  ;;  %v3837_v48 = vld [vmem:[#allocation2 + $0x10e] sm:$0xff]  ;;  %v6501_v46 = vld [vmem:[#allocation85_spill] sm:$0xff] }
 0x1e4   : > { %v2808_v21 = vmul.f32 %v5653_v15, %v3827_v47  ;;  %v2809_v26 = vmul.f32 %v5653_v15, %v3828_v45  ;;  %v2810_v28 = vmul.f32 %v5653_v15, %v3829_v63  ;;  %v5672_v59 = vadd.f32 %v2725_v39, %v2692_v32  ;;  %v3825_v39 = vld [vmem:[#allocation2 + $0x13d] sm:$0xff]  ;;  %v6502_v14 = vld [vmem:[#allocation84_spill] sm:$0xff] }
 0x1e5   : > { %v2766_v35 = vmul.f32 %v5641_v0, %v3818_v10  ;;  %v2778_v20 = vadd.f32 %v2762_v9, %v2729_v18  ;;  %v2811_v6 = vmul.f32 %v5653_v15, %v3830_v1  ;;  %v2767_v34 = vmul.f32 %v5641_v0, %v6498_v23  ;;  %v3826_v18 = vld [vmem:[#allocation2 + $0x145] sm:$0xff] }
 0x1e6   : > { %v2768_v55 = vmul.f32 %v5641_v0, %v6499_v40  ;;  %v2779_v30 = vadd.f32 %v2763_v62, %v2730_v25  ;;  %v2812_v7 = vmul.f32 %v5653_v15, %v5569_v8  ;;  %v2769_v32 = vmul.f32 %v5641_v0, %v3821_v12  ;;  %v6503_v9 = vld [vmem:[#allocation86_spill] sm:$0xff] }
 0x1e7   : > { %v2780_v60 = vadd.f32 %v2764_v19, %v2731_v4  ;;  %v2781_v50 = vadd.f32 %v2765_v33, %v2732_v38  ;;  %v2813_v52 = vmul.f32 %v5653_v15, %v5571_v31  ;;  %v2814_v17 = vmul.f32 %v5653_v15, %v3833_v51  ;;  %v3838_v4 = vld [vmem:[#allocation2 + $0x116] sm:$0xff]  ;;  %v3841_v19 = vld [vmem:[#allocation2 + $0x13e] sm:$0xff] }
 0x1e8   : > { %v2824_v53 = vadd.f32 %v2808_v21, %v2775_v58  ;;  %v2825_v2 = vadd.f32 %v2809_v26, %v2776_v5  ;;  %v2826_v27 = vadd.f32 %v2810_v28, %v2777_v44  ;;  %v2770_v41 = vmul.f32 %v5641_v0, %v3822_v54  ;;  %v3842_v5 = vld [vmem:[#allocation2 + $0x146] sm:$0xff] }
 0x1e9   : > { %v2782_v42 = vadd.f32 %v2766_v35, %v2733_v56  ;;  %v2815_v8 = vmul.f32 %v5653_v15, %v3834_v3  ;;  %v2827_v22 = vadd.f32 %v2811_v6, %v2778_v20  ;;  %v2771_v31 = vmul.f32 %v5641_v0, %v6500_v43 }
 0x1ea   : > { %v2783_v25 = vadd.f32 %v2767_v34, %v2734_v61  ;;  %v2816_v29 = vmul.f32 %v5653_v15, %v6501_v46  ;;  %v2828_v38 = vadd.f32 %v2812_v7, %v2779_v30  ;;  %2840 = vst [vmem:[%s4167_s29] sm:$0xff] %v2824_v53  ;;  %v2772_v56 = vmul.f32 %v5641_v0, %v6502_v14 }
 0x1eb   : > { %v2784_v24 = vadd.f32 %v2768_v55, %v2735_v57  ;;  %v2817_v47 = vmul.f32 %v5653_v15, %v6503_v9  ;;  %v2829_v45 = vadd.f32 %v2813_v52, %v2780_v60  ;;  %2841 = vst [vmem:[%s4167_s29 + $0x8] sm:$0xff] %v2825_v2  ;;  %v2773_v63 = vmul.f32 %v5641_v0, %v3825_v39 }
 0x1ec   : > { %v2785_v61 = vadd.f32 %v2769_v32, %v2736_v13  ;;  %v2818_v10 = vmul.f32 %v5653_v15, %v3837_v48  ;;  %v2830_v62 = vadd.f32 %v2814_v17, %v2781_v50  ;;  %2842 = vst [vmem:[%s4167_s29 + $0x10] sm:$0xff] %v2826_v27  ;;  %v2774_v1 = vmul.f32 %v5641_v0, %v3826_v18  ;;  %v6504_v13 = vld [vmem:[#allocation87_spill] sm:$0xff] }
 0x1ed   : > { %v2786_v36 = vadd.f32 %v2770_v41, %v5655_v11  ;;  %v2819_v57 = vmul.f32 %v5653_v15, %v3838_v4  ;;  %v2831_v33 = vadd.f32 %v2815_v8, %v2782_v42  ;;  %2843 = vst [vmem:[%s4167_s29 + $0x18] sm:$0xff] %v2827_v22  ;;  %v2787_v58 = vadd.f32 %v2771_v31, %v5658_v49  ;;  %v6505_v11 = vld [vmem:[#allocation88_spill] sm:$0xff] }
 0x1ee   : > { %v2820_v12 = vmul.f32 %v5653_v15, %v6504_v13  ;;  %v2832_v44 = vadd.f32 %v2816_v29, %v2783_v25  ;;  %2844 = vst [vmem:[%s4167_s29 + $0x20] sm:$0xff] %v2828_v38  ;;  %v2788_v0 = vadd.f32 %v2772_v56, %v5660_v37  ;;  %v2821_v21 = vmul.f32 %v5653_v15, %v6505_v11 }
 0x1ef   : > { %v2833_v26 = vadd.f32 %v2817_v47, %v2784_v24  ;;  %2845 = vst [vmem:[%s4167_s29 + $0x28] sm:$0xff] %v2829_v45  ;;  %v2789_v28 = vadd.f32 %v2773_v63, %v5662_v16  ;;  %v2822_v49 = vmul.f32 %v5653_v15, %v3841_v19  ;;  %v2834_v35 = vadd.f32 %v2818_v10, %v2785_v61 }
 0x1f0   : > { %2846 = vst [vmem:[%s4167_s29 + $0x30] sm:$0xff] %v2830_v62  ;;  %v2790_v37 = vadd.f32 %v2774_v1, %v5672_v59  ;;  %v2823_v20 = vmul.f32 %v5653_v15, %v3842_v5  ;;  %v2835_v51 = vadd.f32 %v2819_v57, %v2786_v36  ;;  %v2836_v16 = vadd.f32 %v2820_v12, %v2787_v58 }
 0x1f1   : > { %2847 = vst [vmem:[%s4167_s29 + $0x38] sm:$0xff] %v2831_v33  ;;  %v2837_v6 = vadd.f32 %v2821_v21, %v2788_v0  ;;  %v2838_v54 = vadd.f32 %v2822_v49, %v2789_v28 }
 0x1f2   : > { %2848 = vst [vmem:[%s4167_s29 + $0x40] sm:$0xff] %v2832_v44  ;;  %v2839_v23 = vadd.f32 %v2823_v20, %v2790_v37 }
 0x1f3   : > { %2849 = vst [vmem:[%s4167_s29 + $0x48] sm:$0xff] %v2833_v26 }
 0x1f4   : > { %2850 = vst [vmem:[%s4167_s29 + $0x50] sm:$0xff] %v2834_v35 }
 0x1f5   : > { %2851 = vst [vmem:[%s4167_s29 + $0x58] sm:$0xff] %v2835_v51 }
 0x1f6   : > { %2852 = vst [vmem:[%s4167_s29 + $0x60] sm:$0xff] %v2836_v16 }
 0x1f7   : > { %2853 = vst [vmem:[%s4167_s29 + $0x68] sm:$0xff] %v2837_v6 }
 0x1f8   : > { %2854 = vst [vmem:[%s4167_s29 + $0x70] sm:$0xff] %v2838_v54 }
 0x1f9   : > { %2855 = vst [vmem:[%s4167_s29 + $0x78] sm:$0xff] %v2839_v23 }
 0x1fa   : > { %3986 = shalt.err (!%p3983_p3)
}
 0x1fb   : > { %s4041_s23 = smov 128   ;;  %s4042_s29 = smov 8  }
 0x1fc   : > { %3853 = dma.vmem_to_hbm [thread:$0]  (%p4098_p4), %s2874_s7, 2048, %s2876_s8, %s2857_s15, %s4041_s23, %s4041_s23, %s4042_s29  }
 0x1fd PF: > { %p3859_p5 = scmp.ge.s32.totalorder %s4039_s14, 2  ;;  %s2890_s28 = sand.u32 1, %s4019_s9  }
 0x1fe   : > { %s2891_s30 = scalar_lea.sflag [#allocation5], %s2890_s28 }
 0x1ff   : > { %p3856_p6 = pnand %p3859_p5, %p4105_p8 }
 0x201   : > { %p3857_p7 = pneg %p3856_p6 }
 0x203   : > { %4014 = dma.done.wait (%p3857_p7), %s2891_s30, 2048  }
 0x204   : > { %4016 = vsyncadd (%p3857_p7), %s2891_s30, 4294965248  ;;  %s15_s14 = sadd.s32 1, %s4039_s14   ;;  %s6506_s9 = smov %s4023_s10 }
 0x205   : > { %p12_p9 = scmp.ge.s32.totalorder %s15_s14, 4   ;;  %s6507_s10 = smov %s4027_s11 }
 0x206   : > { %s6508_s11 = smov %s4111_s22  ;;  %s6509_s12 = smov %s4035_s13 }
 0x207   : > { %s6510_s13 = smov %s6512_s17  ;;  %14 = sbr.rel (!%p12_p9) target bundleno = 4 (0x4), region = 149 }
 0x20c   :  { %2897 = vsyncpa [#allocation5], 1 }
 0x20d   :  { %2899 = vsyncpa [#allocation5 + $0x1], 1 }
 0x20e   :  { %2900 = vsyncmov [#allocation3] }
 0x211   :  { %s2901_s19 = vpop.sfrf %2900 }
 0x212   :  { %p3849_p4 = scmp.ne.s32.totalorder %s2901_s19, 0 }
 0x214   :  { %2905 = shalt.err (%p3849_p4)  }
 0x215   :  { %2907 = vsyncmov [#allocation3 + $0x1] }
 0x218   :  { %s2908_s21 = vpop.sfrf %2907 }
 0x219   :  { %p3850_p8 = scmp.ne.s32.totalorder %s2908_s21, 0 }
 0x21b   :  { %2912 = shalt.err (%p3850_p8)  }

</bundles_post_ra>
